<compile_context>
chip_gen: v7x
topology: tpu7x:2x2x1
jax: 0.10.0
libtpu: 0.0.40
codegen_flags: <defaults>
</compile_context>

<pallas_src>
import functools

import numpy as np
import jax
import jax.numpy as jnp
from jax.experimental import pallas as pl
from jax.experimental.pallas import tpu as pltpu


# MXU operand precision: bf16 operands + f32 accumulation (MXU-native on v5e/v6e/v7x).
# Set to jnp.float32 for strict f32 parity runs.
MATMUL_DTYPE = jnp.bfloat16


# ---------------------------------------------------------------------------
# In-kernel math helpers
# ---------------------------------------------------------------------------

def _erf(z):
    # Abramowitz & Stegun 7.1.26 (|err| ~ 1.5e-7), matching torch.nn.GELU()'s exact-erf
    # variant; reciprocal/exp ride the EUP slot.
    a1, a2, a3, a4, a5 = 0.254829592, -0.284496736, 1.421413741, -1.453152027, 1.061405429
    q = 0.3275911
    s = jnp.where(z >= 0.0, 1.0, -1.0)
    az = jnp.abs(z)
    t = pl.reciprocal(1.0 + q * az, approx=True)
    poly = ((((a5 * t + a4) * t + a3) * t + a2) * t + a1) * t
    return s * (1.0 - poly * jnp.exp(-az * az))


def _gelu_exact(x):
    return 0.5 * x * (1.0 + _erf(x * 0.7071067811865476))


def _nbytes(a):
    return int(a.size) * a.dtype.itemsize


# ---------------------------------------------------------------------------
# Pallas kernels
# ---------------------------------------------------------------------------

def _twin_conv_kernel(per_ref, x_ref, m1_ref, m2_ref, w1_ref, b1_ref, w2_ref, b2_ref,
                      res_ref, z_ref, yext_ref, slab1_ref, slab2_ref,
                      *, rows, ksize, pd, cin, cff, halo):
    # per_ref : SMEM (k,) int32                 period of this grid step (scalar prefetch)
    # x_ref   : VMEM (rows + 2*halo, cin) f32   zero-padded, halo-extended activation
    # m*_ref  : VMEM (1, rows, K*K*C)           per-(row, tap) validity mask, pre-broadcast
    # w1_ref  : (K*K*cin, 2*cff)  conv[0] || conv_wt[0] packed along Cout  (MATMUL_DTYPE)
    # w2_ref  : (K*K*cff, cout)   conv[2]
    # res_ref : (1, rows, cout)   conv   path output on the padded time grid
    # z_ref   : (1, rows, cff)    conv_wt path output
    # yext_ref: VMEM scratch      d_ff intermediate + halo (never leaves VMEM)
    # slab*   : VMEM scratch      in-VMEM im2col slabs
    i = pl.program_id(0)
    p = per_ref[i]
    seg_len = rows + ksize - 1

    # ---- layer 1: K dynamic row-band gathers, K static column shifts each -> slab ----
    for r in range(ksize):                       # dh = r - pd, offset = dh*p + dw
        base = halo - pd + (r - pd) * p
        seg = x_ref[pl.ds(base, seg_len), :]
        for c in range(ksize):
            tap = r * ksize + c
            slab1_ref[:, tap * cin:(tap + 1) * cin] = seg[c:c + rows, :]
    lhs1 = (slab1_ref[...] * m1_ref[0]).astype(MATMUL_DTYPE)
    y_all = _gelu_exact(
        jnp.dot(lhs1, w1_ref[...], preferred_element_type=jnp.float32) + b1_ref[...])

    # conv_wt branch output = second half of the packed channel dim.
    z_ref[0] = y_all[:, cff:].astype(z_ref.dtype)

    # ---- layer 2: same fold on the d_ff intermediate (zero only the halo rows) ----
    yext_ref[:halo, :] = jnp.zeros((halo, cff), jnp.float32)
    yext_ref[halo + rows:, :] = jnp.zeros((halo, cff), jnp.float32)
    yext_ref[halo:halo + rows, :] = y_all[:, :cff]
    for r in range(ksize):
        base = halo - pd + (r - pd) * p
        seg = yext_ref[pl.ds(base, seg_len), :]
        for c in range(ksize):
            tap = r * ksize + c
            slab2_ref[:, tap * cff:(tap + 1) * cff] = seg[c:c + rows, :]
    lhs2 = (slab2_ref[...] * m2_ref[0]).astype(MATMUL_DTYPE)
    res = jnp.dot(lhs2, w2_ref[...], preferred_element_type=jnp.float32) + b2_ref[...]
    res_ref[0] = res.astype(res_ref.dtype)


def _aggregate_kernel(w_ref, pw_ref, x_ref, res_ref, reswt_ref, o_ref, *, k):
    # w_ref : SMEM (2,)        self.w
    # pw_ref: VMEM (B, k)      softmax(period_weight)
    # x_ref : VMEM (B, T*N)    residual input (lane-dense)
    # res_ref/reswt_ref: (k, B, T*N)
    w0, w1 = w_ref[0], w_ref[1]
    acc = x_ref[...]
    for i in range(k):
        pwi = pw_ref[:, i:i + 1]                           # (B, 1) -> lane broadcast
        acc = acc + pwi * (w0 * res_ref[i] + w1 * reswt_ref[i])
    o_ref[...] = acc


# ---------------------------------------------------------------------------
# pallas_call wrappers
# ---------------------------------------------------------------------------

def _period_conv(periods, xbuf, mask1, mask2, w13, b13, w2, b2,
                 *, top_k, rows, ksize, pd, cin, cff, cout, halo):
    xrows = xbuf.shape[0]
    kk = ksize * ksize
    cff2 = 2 * cff
    kern = functools.partial(_twin_conv_kernel, rows=rows, ksize=ksize, pd=pd,
                             cin=cin, cff=cff, halo=halo)
    cost = pl.CostEstimate(
        flops=2 * top_k * rows * kk * (cin * cff2 + cff * cout),
        transcendentals=top_k * rows * cff2,
        bytes_accessed=_nbytes(xbuf) + _nbytes(mask1) + _nbytes(mask2)
        + _nbytes(w13) + _nbytes(b13) + _nbytes(w2) + _nbytes(b2)
        + top_k * rows * (cout + cff) * 4,
    )
    grid_spec = pltpu.PrefetchScalarGridSpec(
        num_scalar_prefetch=1,
        grid=(top_k,),
        in_specs=[
            pl.BlockSpec((xrows, cin), lambda i, per: (0, 0)),
            pl.BlockSpec((1, rows, kk * cin), lambda i, per: (i, 0, 0)),
            pl.BlockSpec((1, rows, kk * cff), lambda i, per: (i, 0, 0)),
            pl.BlockSpec((kk * cin, cff2), lambda i, per: (0, 0)),
            pl.BlockSpec((1, cff2), lambda i, per: (0, 0)),
            pl.BlockSpec((kk * cff, cout), lambda i, per: (0, 0)),
            pl.BlockSpec((1, cout), lambda i, per: (0, 0)),
        ],
        out_specs=[
            pl.BlockSpec((1, rows, cout), lambda i, per: (i, 0, 0)),
            pl.BlockSpec((1, rows, cff), lambda i, per: (i, 0, 0)),
        ],
        scratch_shapes=[
            pltpu.VMEM((rows + 2 * halo, cff), jnp.float32),
            pltpu.VMEM((rows, kk * cin), jnp.float32),
            pltpu.VMEM((rows, kk * cff), jnp.float32),
        ],
    )
    return pl.pallas_call(
        kern,
        grid_spec=grid_spec,
        out_shape=(jax.ShapeDtypeStruct((top_k, rows, cout), jnp.float32),
                   jax.ShapeDtypeStruct((top_k, rows, cff), jnp.float32)),
        compiler_params=pltpu.CompilerParams(
            dimension_semantics=("parallel",),
            vmem_limit_bytes=32 * 1024 * 1024),
        cost_estimate=cost,
    )(periods, xbuf, mask1, mask2, w13, b13, w2, b2)


def _aggregate(w, pw, x_flat, res_stack, reswt_stack):
    B, TN = x_flat.shape
    k = res_stack.shape[0]
    return pl.pallas_call(
        functools.partial(_aggregate_kernel, k=k),
        out_shape=jax.ShapeDtypeStruct((B, TN), jnp.float32),
        in_specs=[pl.BlockSpec(memory_space=pltpu.MemorySpace.SMEM),
                  pl.BlockSpec(memory_space=pltpu.MemorySpace.VMEM),
                  pl.BlockSpec(memory_space=pltpu.MemorySpace.VMEM),
                  pl.BlockSpec(memory_space=pltpu.MemorySpace.VMEM),
                  pl.BlockSpec(memory_space=pltpu.MemorySpace.VMEM)],
        out_specs=pl.BlockSpec(memory_space=pltpu.MemorySpace.VMEM),
    )(w, pw, x_flat, res_stack, reswt_stack)


# ---------------------------------------------------------------------------
# Parameters (Inception_Block_V1 folded into one KxK conv - exact)
# ---------------------------------------------------------------------------

def _make_inception_weights(key, cin, cout, num_kernels):
    # Fold the num_kernels parallel Conv2d layers (kernel sizes 1,3,...,2k-1, 'same'
    # padding, outputs averaged) into ONE KxK conv by zero-embedding each centered
    # kernel and averaging weights/biases.  Exact equivalence.
    K = 2 * num_kernels - 1
    w_comb = jnp.zeros((K, K, cin, cout), jnp.float32)
    b_comb = jnp.zeros((cout,), jnp.float32)
    for i in range(num_kernels):
        ks = 2 * i + 1
        key, kw_, kb_ = jax.random.split(key, 3)
        fan_in = cin * ks * ks
        wgt = jax.random.normal(kw_, (ks, ks, cin, cout), jnp.float32) * (2.0 / fan_in) ** 0.5
        b = jax.random.normal(kb_, (cout,), jnp.float32) * 0.02
        off = (K - ks) // 2
        w_comb = w_comb.at[off:off + ks, off:off + ks, :, :].add(wgt)
        b_comb = b_comb + b
    w_comb = (w_comb / num_kernels).reshape(K * K * cin, cout).astype(MATMUL_DTYPE)
    b_comb = (b_comb / num_kernels).reshape(1, cout)
    return w_comb, b_comb


def init_params(key, d_model, d_ff, num_kernels):
    k1, k2, k3 = jax.random.split(key, 3)
    w1, b1 = _make_inception_weights(k1, d_model, d_ff, num_kernels)   # conv[0]
    w2, b2 = _make_inception_weights(k2, d_ff, d_model, num_kernels)   # conv[2]
    w3, b3 = _make_inception_weights(k3, d_model, d_ff, num_kernels)   # conv_wt[0]
    # conv[0] and conv_wt[0] share their input fold (WT fallback), so pack along Cout.
    return {"w13": jnp.concatenate([w1, w3], axis=-1),
            "b13": jnp.concatenate([b1, b3], axis=-1),
            "w2": w2, "b2": b2,
            "w": jnp.array([0.5, 0.5], jnp.float32)}


# ---------------------------------------------------------------------------
# TwinBlock forward (jittable end to end)
# ---------------------------------------------------------------------------

def twin_block_forward(params, x, *, seq_len, pred_len, top_k, num_kernels):
    B, T, N = x.shape
    assert T == seq_len + pred_len
    K = 2 * num_kernels - 1
    pd = num_kernels - 1
    KK = K * K
    cff = params["w13"].shape[-1] // 2
    cout = params["w2"].shape[-1]
    assert cff >= N, "requires d_ff >= d_model (same constraint as the torch reshape)"

    # Static fold geometry: pad every period's fold to the max length over the static
    # candidate-period set {T // f}; the runtime period enters the kernel only through
    # dynamic offsets + masks, so shapes are static and the forward jits (no host sync).
    cand = sorted({max(T // f, 1) for f in range(1, max(T // 2, 1) + 1)} | {T})
    Lm = max(-(-T // p) * p for p in cand)                  # max padded length
    halo = -(-(pd * T + pd) // 8) * 8                       # >= max |dh*p + dw|, 8-aligned
    rows = B * Lm

    # --- FFT_for_Period, fully on device ---
    xf = jnp.fft.rfft(x, axis=1)
    axf = jnp.abs(xf)
    freq = axf.mean(axis=0).mean(axis=-1).at[0].set(0.0)
    _, top = jax.lax.top_k(freq, top_k)
    period_weight = axf.mean(-1)[:, top]                    # (B, k)
    periods = (T // jnp.maximum(top, 1)).astype(jnp.int32)  # (k,)
    lengths = ((T + periods - 1) // periods) * periods
    hrows = lengths // periods

    # --- per-(row, tap) validity masks for the 'same'-padded conv on each fold ---
    dh = (np.repeat(np.arange(K), K) - pd).astype(np.int32)     # tap = r*K + c
    dw = (np.tile(np.arange(K), K) - pd).astype(np.int32)
    t = jnp.arange(Lm, dtype=jnp.int32)
    gh = t[None, :] // periods[:, None]                         # (k, Lm)
    gw = t[None, :] % periods[:, None]
    hh = gh[:, :, None] + dh[None, None, :]
    ww = gw[:, :, None] + dw[None, None, :]
    valid = ((hh >= 0) & (hh < hrows[:, None, None])
             & (ww >= 0) & (ww < periods[:, None, None]))       # (k, Lm, KK)
    mask = jnp.broadcast_to(valid[:, None].astype(jnp.float32),
                            (top_k, B, Lm, KK)).reshape(top_k, rows, KK)
    mask1 = jnp.repeat(mask, N, axis=-1)                        # (k, rows, KK*N)
    mask2 = jnp.repeat(mask, cff, axis=-1)                      # (k, rows, KK*cff)

    # --- shared zero-padded + halo-extended activation (one tiny buffer, all periods) ---
    xpad = jnp.pad(x.astype(jnp.float32), ((0, 0), (0, Lm - T), (0, 0)))
    xbuf = jnp.pad(xpad.reshape(rows, N), ((halo, halo), (0, 0)))

    # TODO(synk): WT_for_Period needs pywt.cwtline ('cgau8' CWT) + host thresholding with
    # no JAX/Pallas equivalent; its fallback branch (idx = [0, T-1]) is used for every
    # period, which makes conv_wt's input fold identical to conv's and enables the packed
    # w1||w3 layer-1 evaluation.

    res_out, z_out = _period_conv(
        periods, xbuf, mask1, mask2,
        params["w13"], params["b13"], params["w2"], params["b2"],
        top_k=top_k, rows=rows, ksize=K, pd=pd, cin=N, cff=cff, cout=cout, halo=halo)

    # conv path: unfold the (length//p, p) grid back to time, keep the first T steps.
    res_flat = res_out.reshape(top_k, B, Lm, N)[:, :, :T, :].reshape(top_k, B, T * N)
    # conv_wt path: reference does permute->reshape(B,-1,N)[:, :T] -> first T*N elements
    # of the row-major (length, d_ff) block per batch.
    z_flat = z_out.reshape(top_k, B, Lm * cff)[:, :, :T * N]

    pw = jax.nn.softmax(period_weight, axis=1)                  # (B, k)
    out = _aggregate(params["w"], pw, x.reshape(B, T * N).astype(jnp.float32),
                     res_flat, z_flat)
    return out.reshape(B, T, N)


# ---------------------------------------------------------------------------

if __name__ == "__main__":
    # configs: seq_len=12, pred_len=4, d_model=8, d_ff=16, num_kernels=3, top_k=2
    seq_len, pred_len = 12, 4
    d_model, d_ff, num_kernels, top_k = 8, 16, 3, 2
    B = 2
    T = seq_len + pred_len

    key = jax.random.PRNGKey(0)
    kx, kp = jax.random.split(key)
    x = jax.random.normal(kx, (B, T, d_model), jnp.float32)
    params = init_params(kp, d_model, d_ff, num_kernels)

    fwd = jax.jit(functools.partial(twin_block_forward, seq_len=seq_len,
                                    pred_len=pred_len, top_k=top_k,
                                    num_kernels=num_kernels))
    out = jax.block_until_ready(fwd(params, x))
    assert out.shape == (B, T, d_model) and out.dtype == jnp.float32
    assert bool(jnp.isfinite(out).all())
    print("KERNEL_OK")
</pallas_src>

<mosaic_0001>
module attributes {stable_mosaic.version = 11 : i64} {
  func.func @_aggregate_kernel(%arg0: memref<2xf32, #tpu.memory_space<smem>>, %arg1: memref<2x2xf32, #tpu.memory_space<vmem>>, %arg2: memref<2x128xf32, #tpu.memory_space<vmem>>, %arg3: memref<2x2x128xf32, #tpu.memory_space<vmem>>, %arg4: memref<2x2x128xf32, #tpu.memory_space<vmem>>, %arg5: memref<2x128xf32, #tpu.memory_space<vmem>>) attributes {dimension_semantics = [], scalar_prefetch = 0 : i64, scratch_operands = 0 : i64, tpu.core_type = #tpu.core_type<tc>} {
    %c0 = arith.constant 0 : index
    %0 = memref.load %arg0[%c0] : memref<2xf32, #tpu.memory_space<smem>>
    %c1 = arith.constant 1 : index
    %1 = memref.load %arg0[%c1] : memref<2xf32, #tpu.memory_space<smem>>
    %c0_0 = arith.constant 0 : index
    %c0_1 = arith.constant 0 : index
    %2 = vector.load %arg2[%c0_0, %c0_1] : memref<2x128xf32, #tpu.memory_space<vmem>>, vector<2x128xf32>
    %c0_2 = arith.constant 0 : index
    %c0_3 = arith.constant 0 : index
    %3 = vector.load %arg1[%c0_2, %c0_3] : memref<2x2xf32, #tpu.memory_space<vmem>>, vector<2x1xf32>
    %c0_4 = arith.constant 0 : index
    %c0_5 = arith.constant 0 : index
    %c0_6 = arith.constant 0 : index
    %4 = vector.load %arg3[%c0_4, %c0_5, %c0_6] : memref<2x2x128xf32, #tpu.memory_space<vmem>>, vector<1x2x128xf32>
    %5 = vector.shape_cast %4 : vector<1x2x128xf32> to vector<2x128xf32>
    %6 = vector.broadcast %0 : f32 to vector<2x128xf32>
    %7 = arith.mulf %6, %5 : vector<2x128xf32>
    %c0_7 = arith.constant 0 : index
    %c0_8 = arith.constant 0 : index
    %c0_9 = arith.constant 0 : index
    %8 = vector.load %arg4[%c0_7, %c0_8, %c0_9] : memref<2x2x128xf32, #tpu.memory_space<vmem>>, vector<1x2x128xf32>
    %9 = vector.shape_cast %8 : vector<1x2x128xf32> to vector<2x128xf32>
    %10 = vector.broadcast %1 : f32 to vector<2x128xf32>
    %11 = arith.mulf %10, %9 : vector<2x128xf32>
    %12 = arith.addf %7, %11 : vector<2x128xf32>
    %13 = vector.broadcast %3 : vector<2x1xf32> to vector<2x128xf32>
    %14 = arith.mulf %13, %12 : vector<2x128xf32>
    %15 = arith.addf %2, %14 : vector<2x128xf32>
    %c0_10 = arith.constant 0 : index
    %c1_11 = arith.constant 1 : index
    %16 = vector.load %arg1[%c0_10, %c1_11] : memref<2x2xf32, #tpu.memory_space<vmem>>, vector<2x1xf32>
    %c1_12 = arith.constant 1 : index
    %c0_13 = arith.constant 0 : index
    %c0_14 = arith.constant 0 : index
    %17 = vector.load %arg3[%c1_12, %c0_13, %c0_14] : memref<2x2x128xf32, #tpu.memory_space<vmem>>, vector<1x2x128xf32>
    %18 = vector.shape_cast %17 : vector<1x2x128xf32> to vector<2x128xf32>
    %19 = vector.broadcast %0 : f32 to vector<2x128xf32>
    %20 = arith.mulf %19, %18 : vector<2x128xf32>
    %c1_15 = arith.constant 1 : index
    %c0_16 = arith.constant 0 : index
    %c0_17 = arith.constant 0 : index
    %21 = vector.load %arg4[%c1_15, %c0_16, %c0_17] : memref<2x2x128xf32, #tpu.memory_space<vmem>>, vector<1x2x128xf32>
    %22 = vector.shape_cast %21 : vector<1x2x128xf32> to vector<2x128xf32>
    %23 = vector.broadcast %1 : f32 to vector<2x128xf32>
    %24 = arith.mulf %23, %22 : vector<2x128xf32>
    %25 = arith.addf %20, %24 : vector<2x128xf32>
    %26 = vector.broadcast %16 : vector<2x1xf32> to vector<2x128xf32>
    %27 = arith.mulf %26, %25 : vector<2x128xf32>
    %28 = arith.addf %15, %27 : vector<2x128xf32>
    %c0_18 = arith.constant 0 : index
    %c0_19 = arith.constant 0 : index
    %29 = vector.load %arg5[%c0_18, %c0_19] : memref<2x128xf32, #tpu.memory_space<vmem>>, vector<2x128xf32>
    tpu.vector_store %arg5[%c0_18, %c0_19], %28 {strides = array<i32>} : memref<2x128xf32, #tpu.memory_space<vmem>>, vector<2x128xf32>,
    return
  }
}

module attributes {stable_mosaic.version = 11 : i64} {
  func.func @_twin_conv_kernel(%arg0: i32, %arg1: memref<2xi32, #tpu.memory_space<smem>>, %arg2: memref<120x8xf32, #tpu.memory_space<vmem>>, %arg3: memref<1x40x200xf32, #tpu.memory_space<vmem>>, %arg4: memref<1x40x400xf32, #tpu.memory_space<vmem>>, %arg5: memref<200x32xbf16, #tpu.memory_space<vmem>>, %arg6: memref<1x32xf32, #tpu.memory_space<vmem>>, %arg7: memref<400x8xbf16, #tpu.memory_space<vmem>>, %arg8: memref<1x8xf32, #tpu.memory_space<vmem>>, %arg9: memref<1x40x8xf32, #tpu.memory_space<vmem>>, %arg10: memref<1x40x16xf32, #tpu.memory_space<vmem>>, %arg11: memref<120x16xf32, #tpu.memory_space<vmem>>, %arg12: memref<40x200xf32, #tpu.memory_space<vmem>>, %arg13: memref<40x400xf32, #tpu.memory_space<vmem>>) attributes {dimension_semantics = [#tpu.dimension_semantics<parallel>], iteration_bounds = array<i64: 2>, scalar_prefetch = 1 : i64, scratch_operands = 3 : i64, tpu.core_type = #tpu.core_type<tc>, window_params = [{pipeline_mode = #tpu.pipeline_mode<synchronous>, transform_indices = @transform_0, window_bounds = array<i64: 120, 8>}, {transform_indices = @transform_1, window_bounds = array<i64: 1, 40, 200>}, {transform_indices = @transform_2, window_bounds = array<i64: 1, 40, 400>}, {pipeline_mode = #tpu.pipeline_mode<synchronous>, transform_indices = @transform_3, window_bounds = array<i64: 200, 32>}, {pipeline_mode = #tpu.pipeline_mode<synchronous>, transform_indices = @transform_4, window_bounds = array<i64: 1, 32>}, {pipeline_mode = #tpu.pipeline_mode<synchronous>, transform_indices = @transform_5, window_bounds = array<i64: 400, 8>}, {pipeline_mode = #tpu.pipeline_mode<synchronous>, transform_indices = @transform_6, window_bounds = array<i64: 1, 8>}, {transform_indices = @transform_7, window_bounds = array<i64: 1, 40, 8>}, {transform_indices = @transform_8, window_bounds = array<i64: 1, 40, 16>}]} {
    %0 = arith.index_cast %arg0 : i32 to index
    %1 = memref.load %arg1[%0] : memref<2xi32, #tpu.memory_space<smem>>
    %c-2_i32 = arith.constant -2 : i32
    %2 = arith.muli %c-2_i32, %1 : i32
    %c38_i32 = arith.constant 38 : i32
    %3 = arith.addi %c38_i32, %2 : i32
    %4 = arith.index_cast %3 : i32 to index
    %c0 = arith.constant 0 : index
    %5 = vector.load %arg2[%4, %c0] : memref<120x8xf32, #tpu.memory_space<vmem>>, vector<44x8xf32>
    %6 = vector.extract_strided_slice %5 {offsets = [0, 0], sizes = [40, 8], strides = [1, 1]} : vector<44x8xf32> to vector<40x8xf32>
    %c0_0 = arith.constant 0 : index
    %c0_1 = arith.constant 0 : index
    %7 = vector.load %arg12[%c0_0, %c0_1] : memref<40x200xf32, #tpu.memory_space<vmem>>, vector<40x8xf32>
    tpu.vector_store %arg12[%c0_0, %c0_1], %6 {strides = array<i32>} : memref<40x200xf32, #tpu.memory_space<vmem>>, vector<40x8xf32>,
    %8 = vector.extract_strided_slice %5 {offsets = [1, 0], sizes = [40, 8], strides = [1, 1]} : vector<44x8xf32> to vector<40x8xf32>
    %c0_2 = arith.constant 0 : index
    %c8 = arith.constant 8 : index
    %9 = vector.load %arg12[%c0_2, %c8] : memref<40x200xf32, #tpu.memory_space<vmem>>, vector<40x8xf32>
    tpu.vector_store %arg12[%c0_2, %c8], %8 {strides = array<i32>} : memref<40x200xf32, #tpu.memory_space<vmem>>, vector<40x8xf32>,
    %10 = vector.extract_strided_slice %5 {offsets = [2, 0], sizes = [40, 8], strides = [1, 1]} : vector<44x8xf32> to vector<40x8xf32>
    %c0_3 = arith.constant 0 : index
    %c16 = arith.constant 16 : index
    %11 = vector.load %arg12[%c0_3, %c16] : memref<40x200xf32, #tpu.memory_space<vmem>>, vector<40x8xf32>
    tpu.vector_store %arg12[%c0_3, %c16], %10 {strides = array<i32>} : memref<40x200xf32, #tpu.memory_space<vmem>>, vector<40x8xf32>,
    %12 = vector.extract_strided_slice %5 {offsets = [3, 0], sizes = [40, 8], strides = [1, 1]} : vector<44x8xf32> to vector<40x8xf32>
    %c0_4 = arith.constant 0 : index
    %c24 = arith.constant 24 : index
    %13 = vector.load %arg12[%c0_4, %c24] : memref<40x200xf32, #tpu.memory_space<vmem>>, vector<40x8xf32>
    tpu.vector_store %arg12[%c0_4, %c24], %12 {strides = array<i32>} : memref<40x200xf32, #tpu.memory_space<vmem>>, vector<40x8xf32>,
    %14 = vector.extract_strided_slice %5 {offsets = [4, 0], sizes = [40, 8], strides = [1, 1]} : vector<44x8xf32> to vector<40x8xf32>
    %c0_5 = arith.constant 0 : index
    %c32 = arith.constant 32 : index
    %15 = vector.load %arg12[%c0_5, %c32] : memref<40x200xf32, #tpu.memory_space<vmem>>, vector<40x8xf32>
    tpu.vector_store %arg12[%c0_5, %c32], %14 {strides = array<i32>} : memref<40x200xf32, #tpu.memory_space<vmem>>, vector<40x8xf32>,
    %c-1_i32 = arith.constant -1 : i32
    %16 = arith.muli %c-1_i32, %1 : i32
    %c38_i32_6 = arith.constant 38 : i32
    %17 = arith.addi %c38_i32_6, %16 : i32
    %18 = arith.index_cast %17 : i32 to index
    %c0_7 = arith.constant 0 : index
    %19 = vector.load %arg2[%18, %c0_7] : memref<120x8xf32, #tpu.memory_space<vmem>>, vector<44x8xf32>
    %20 = vector.extract_strided_slice %19 {offsets = [0, 0], sizes = [40, 8], strides = [1, 1]} : vector<44x8xf32> to vector<40x8xf32>
    %c0_8 = arith.constant 0 : index
    %c40 = arith.constant 40 : index
    %21 = vector.load %arg12[%c0_8, %c40] : memref<40x200xf32, #tpu.memory_space<vmem>>, vector<40x8xf32>
    tpu.vector_store %arg12[%c0_8, %c40], %20 {strides = array<i32>} : memref<40x200xf32, #tpu.memory_space<vmem>>, vector<40x8xf32>,
    %22 = vector.extract_strided_slice %19 {offsets = [1, 0], sizes = [40, 8], strides = [1, 1]} : vector<44x8xf32> to vector<40x8xf32>
    %c0_9 = arith.constant 0 : index
    %c48 = arith.constant 48 : index
    %23 = vector.load %arg12[%c0_9, %c48] : memref<40x200xf32, #tpu.memory_space<vmem>>, vector<40x8xf32>
    tpu.vector_store %arg12[%c0_9, %c48], %22 {strides = array<i32>} : memref<40x200xf32, #tpu.memory_space<vmem>>, vector<40x8xf32>,
    %24 = vector.extract_strided_slice %19 {offsets = [2, 0], sizes = [40, 8], strides = [1, 1]} : vector<44x8xf32> to vector<40x8xf32>
    %c0_10 = arith.constant 0 : index
    %c56 = arith.constant 56 : index
    %25 = vector.load %arg12[%c0_10, %c56] : memref<40x200xf32, #tpu.memory_space<vmem>>, vector<40x8xf32>
    tpu.vector_store %arg12[%c0_10, %c56], %24 {strides = array<i32>} : memref<40x200xf32, #tpu.memory_space<vmem>>, vector<40x8xf32>,
    %26 = vector.extract_strided_slice %19 {offsets = [3, 0], sizes = [40, 8], strides = [1, 1]} : vector<44x8xf32> to vector<40x8xf32>
    %c0_11 = arith.constant 0 : index
    %c64 = arith.constant 64 : index
    %27 = vector.load %arg12[%c0_11, %c64] : memref<40x200xf32, #tpu.memory_space<vmem>>, vector<40x8xf32>
    tpu.vector_store %arg12[%c0_11, %c64], %26 {strides = array<i32>} : memref<40x200xf32, #tpu.memory_space<vmem>>, vector<40x8xf32>,
    %28 = vector.extract_strided_slice %19 {offsets = [4, 0], sizes = [40, 8], strides = [1, 1]} : vector<44x8xf32> to vector<40x8xf32>
    %c0_12 = arith.constant 0 : index
    %c72 = arith.constant 72 : index
    %29 = vector.load %arg12[%c0_12, %c72] : memref<40x200xf32, #tpu.memory_space<vmem>>, vector<40x8xf32>
    tpu.vector_store %arg12[%c0_12, %c72], %28 {strides = array<i32>} : memref<40x200xf32, #tpu.memory_space<vmem>>, vector<40x8xf32>,
    %c0_i32 = arith.constant 0 : i32
    %30 = arith.muli %c0_i32, %1 : i32
    %c38_i32_13 = arith.constant 38 : i32
    %31 = arith.addi %c38_i32_13, %30 : i32
    %32 = arith.index_cast %31 : i32 to index
    %c0_14 = arith.constant 0 : index
    %33 = vector.load %arg2[%32, %c0_14] : memref<120x8xf32, #tpu.memory_space<vmem>>, vector<44x8xf32>
    %34 = vector.extract_strided_slice %33 {offsets = [0, 0], sizes = [40, 8], strides = [1, 1]} : vector<44x8xf32> to vector<40x8xf32>
    %c0_15 = arith.constant 0 : index
    %c80 = arith.constant 80 : index
    %35 = vector.load %arg12[%c0_15, %c80] : memref<40x200xf32, #tpu.memory_space<vmem>>, vector<40x8xf32>
    tpu.vector_store %arg12[%c0_15, %c80], %34 {strides = array<i32>} : memref<40x200xf32, #tpu.memory_space<vmem>>, vector<40x8xf32>,
    %36 = vector.extract_strided_slice %33 {offsets = [1, 0], sizes = [40, 8], strides = [1, 1]} : vector<44x8xf32> to vector<40x8xf32>
    %c0_16 = arith.constant 0 : index
    %c88 = arith.constant 88 : index
    %37 = vector.load %arg12[%c0_16, %c88] : memref<40x200xf32, #tpu.memory_space<vmem>>, vector<40x8xf32>
    tpu.vector_store %arg12[%c0_16, %c88], %36 {strides = array<i32>} : memref<40x200xf32, #tpu.memory_space<vmem>>, vector<40x8xf32>,
    %38 = vector.extract_strided_slice %33 {offsets = [2, 0], sizes = [40, 8], strides = [1, 1]} : vector<44x8xf32> to vector<40x8xf32>
    %c0_17 = arith.constant 0 : index
    %c96 = arith.constant 96 : index
    %39 = vector.load %arg12[%c0_17, %c96] : memref<40x200xf32, #tpu.memory_space<vmem>>, vector<40x8xf32>
    tpu.vector_store %arg12[%c0_17, %c96], %38 {strides = array<i32>} : memref<40x200xf32, #tpu.memory_space<vmem>>, vector<40x8xf32>,
    %40 = vector.extract_strided_slice %33 {offsets = [3, 0], sizes = [40, 8], strides = [1, 1]} : vector<44x8xf32> to vector<40x8xf32>
    %c0_18 = arith.constant 0 : index
    %c104 = arith.constant 104 : index
    %41 = vector.load %arg12[%c0_18, %c104] : memref<40x200xf32, #tpu.memory_space<vmem>>, vector<40x8xf32>
    tpu.vector_store %arg12[%c0_18, %c104], %40 {strides = array<i32>} : memref<40x200xf32, #tpu.memory_space<vmem>>, vector<40x8xf32>,
    %42 = vector.extract_strided_slice %33 {offsets = [4, 0], sizes = [40, 8], strides = [1, 1]} : vector<44x8xf32> to vector<40x8xf32>
    %c0_19 = arith.constant 0 : index
    %c112 = arith.constant 112 : index
    %43 = vector.load %arg12[%c0_19, %c112] : memref<40x200xf32, #tpu.memory_space<vmem>>, vector<40x8xf32>
    tpu.vector_store %arg12[%c0_19, %c112], %42 {strides = array<i32>} : memref<40x200xf32, #tpu.memory_space<vmem>>, vector<40x8xf32>,
    %c1_i32 = arith.constant 1 : i32
    %44 = arith.muli %c1_i32, %1 : i32
    %c38_i32_20 = arith.constant 38 : i32
    %45 = arith.addi %c38_i32_20, %44 : i32
    %46 = arith.index_cast %45 : i32 to index
    %c0_21 = arith.constant 0 : index
    %47 = vector.load %arg2[%46, %c0_21] : memref<120x8xf32, #tpu.memory_space<vmem>>, vector<44x8xf32>
    %48 = vector.extract_strided_slice %47 {offsets = [0, 0], sizes = [40, 8], strides = [1, 1]} : vector<44x8xf32> to vector<40x8xf32>
    %c0_22 = arith.constant 0 : index
    %c120 = arith.constant 120 : index
    %49 = vector.load %arg12[%c0_22, %c120] : memref<40x200xf32, #tpu.memory_space<vmem>>, vector<40x8xf32>
    tpu.vector_store %arg12[%c0_22, %c120], %48 {strides = array<i32>} : memref<40x200xf32, #tpu.memory_space<vmem>>, vector<40x8xf32>,
    %50 = vector.extract_strided_slice %47 {offsets = [1, 0], sizes = [40, 8], strides = [1, 1]} : vector<44x8xf32> to vector<40x8xf32>
    %c0_23 = arith.constant 0 : index
    %c128 = arith.constant 128 : index
    %51 = vector.load %arg12[%c0_23, %c128] : memref<40x200xf32, #tpu.memory_space<vmem>>, vector<40x8xf32>
    tpu.vector_store %arg12[%c0_23, %c128], %50 {strides = array<i32>} : memref<40x200xf32, #tpu.memory_space<vmem>>, vector<40x8xf32>,
    %52 = vector.extract_strided_slice %47 {offsets = [2, 0], sizes = [40, 8], strides = [1, 1]} : vector<44x8xf32> to vector<40x8xf32>
    %c0_24 = arith.constant 0 : index
    %c136 = arith.constant 136 : index
    %53 = vector.load %arg12[%c0_24, %c136] : memref<40x200xf32, #tpu.memory_space<vmem>>, vector<40x8xf32>
    tpu.vector_store %arg12[%c0_24, %c136], %52 {strides = array<i32>} : memref<40x200xf32, #tpu.memory_space<vmem>>, vector<40x8xf32>,
    %54 = vector.extract_strided_slice %47 {offsets = [3, 0], sizes = [40, 8], strides = [1, 1]} : vector<44x8xf32> to vector<40x8xf32>
    %c0_25 = arith.constant 0 : index
    %c144 = arith.constant 144 : index
    %55 = vector.load %arg12[%c0_25, %c144] : memref<40x200xf32, #tpu.memory_space<vmem>>, vector<40x8xf32>
    tpu.vector_store %arg12[%c0_25, %c144], %54 {strides = array<i32>} : memref<40x200xf32, #tpu.memory_space<vmem>>, vector<40x8xf32>,
    %56 = vector.extract_strided_slice %47 {offsets = [4, 0], sizes = [40, 8], strides = [1, 1]} : vector<44x8xf32> to vector<40x8xf32>
    %c0_26 = arith.constant 0 : index
    %c152 = arith.constant 152 : index
    %57 = vector.load %arg12[%c0_26, %c152] : memref<40x200xf32, #tpu.memory_space<vmem>>, vector<40x8xf32>
    tpu.vector_store %arg12[%c0_26, %c152], %56 {strides = array<i32>} : memref<40x200xf32, #tpu.memory_space<vmem>>, vector<40x8xf32>,
    %c2_i32 = arith.constant 2 : i32
    %58 = arith.muli %c2_i32, %1 : i32
    %c38_i32_27 = arith.constant 38 : i32
    %59 = arith.addi %c38_i32_27, %58 : i32
    %60 = arith.index_cast %59 : i32 to index
    %c0_28 = arith.constant 0 : index
    %61 = vector.load %arg2[%60, %c0_28] : memref<120x8xf32, #tpu.memory_space<vmem>>, vector<44x8xf32>
    %62 = vector.extract_strided_slice %61 {offsets = [0, 0], sizes = [40, 8], strides = [1, 1]} : vector<44x8xf32> to vector<40x8xf32>
    %c0_29 = arith.constant 0 : index
    %c160 = arith.constant 160 : index
    %63 = vector.load %arg12[%c0_29, %c160] : memref<40x200xf32, #tpu.memory_space<vmem>>, vector<40x8xf32>
    tpu.vector_store %arg12[%c0_29, %c160], %62 {strides = array<i32>} : memref<40x200xf32, #tpu.memory_space<vmem>>, vector<40x8xf32>,
    %64 = vector.extract_strided_slice %61 {offsets = [1, 0], sizes = [40, 8], strides = [1, 1]} : vector<44x8xf32> to vector<40x8xf32>
    %c0_30 = arith.constant 0 : index
    %c168 = arith.constant 168 : index
    %65 = vector.load %arg12[%c0_30, %c168] : memref<40x200xf32, #tpu.memory_space<vmem>>, vector<40x8xf32>
    tpu.vector_store %arg12[%c0_30, %c168], %64 {strides = array<i32>} : memref<40x200xf32, #tpu.memory_space<vmem>>, vector<40x8xf32>,
    %66 = vector.extract_strided_slice %61 {offsets = [2, 0], sizes = [40, 8], strides = [1, 1]} : vector<44x8xf32> to vector<40x8xf32>
    %c0_31 = arith.constant 0 : index
    %c176 = arith.constant 176 : index
    %67 = vector.load %arg12[%c0_31, %c176] : memref<40x200xf32, #tpu.memory_space<vmem>>, vector<40x8xf32>
    tpu.vector_store %arg12[%c0_31, %c176], %66 {strides = array<i32>} : memref<40x200xf32, #tpu.memory_space<vmem>>, vector<40x8xf32>,
    %68 = vector.extract_strided_slice %61 {offsets = [3, 0], sizes = [40, 8], strides = [1, 1]} : vector<44x8xf32> to vector<40x8xf32>
    %c0_32 = arith.constant 0 : index
    %c184 = arith.constant 184 : index
    %69 = vector.load %arg12[%c0_32, %c184] : memref<40x200xf32, #tpu.memory_space<vmem>>, vector<40x8xf32>
    tpu.vector_store %arg12[%c0_32, %c184], %68 {strides = array<i32>} : memref<40x200xf32, #tpu.memory_space<vmem>>, vector<40x8xf32>,
    %70 = vector.extract_strided_slice %61 {offsets = [4, 0], sizes = [40, 8], strides = [1, 1]} : vector<44x8xf32> to vector<40x8xf32>
    %c0_33 = arith.constant 0 : index
    %c192 = arith.constant 192 : index
    %71 = vector.load %arg12[%c0_33, %c192] : memref<40x200xf32, #tpu.memory_space<vmem>>, vector<40x8xf32>
    tpu.vector_store %arg12[%c0_33, %c192], %70 {strides = array<i32>} : memref<40x200xf32, #tpu.memory_space<vmem>>, vector<40x8xf32>,
    %c0_34 = arith.constant 0 : index
    %c0_35 = arith.constant 0 : index
    %72 = vector.load %arg12[%c0_34, %c0_35] : memref<40x200xf32, #tpu.memory_space<vmem>>, vector<40x200xf32>
    %c0_36 = arith.constant 0 : index
    %c0_37 = arith.constant 0 : index
    %c0_38 = arith.constant 0 : index
    %73 = vector.load %arg3[%c0_36, %c0_37, %c0_38] : memref<1x40x200xf32, #tpu.memory_space<vmem>>, vector<1x40x200xf32>
    %74 = vector.shape_cast %73 : vector<1x40x200xf32> to vector<40x200xf32>
    %75 = arith.mulf %72, %74 : vector<40x200xf32>
    %76 = arith.truncf %75 : vector<40x200xf32> to vector<40x200xbf16>
    %c0_39 = arith.constant 0 : index
    %c0_40 = arith.constant 0 : index
    %77 = vector.load %arg5[%c0_39, %c0_40] : memref<200x32xbf16, #tpu.memory_space<vmem>>, vector<200x32xbf16>
    %cst = arith.constant dense<0.000000e+00> : vector<40x32xf32>
    %78 = tpu.matmul %76, %77, %cst {dimension_numbers = #tpu.dot_dimension_numbers<[1], [0], [0], [1], [0, 0, 1, 1], [], []>} : vector<40x200xbf16>, vector<200x32xbf16>, vector<40x32xf32> -> vector<40x32xf32>
    %c0_41 = arith.constant 0 : index
    %c0_42 = arith.constant 0 : index
    %79 = vector.load %arg6[%c0_41, %c0_42] : memref<1x32xf32, #tpu.memory_space<vmem>>, vector<1x32xf32>
    %80 = vector.broadcast %79 : vector<1x32xf32> to vector<40x32xf32>
    %81 = arith.addf %78, %80 : vector<40x32xf32>
    %cst_43 = arith.constant 5.000000e-01 : f32
    %82 = vector.broadcast %cst_43 : f32 to vector<40x32xf32>
    %83 = arith.mulf %82, %81 : vector<40x32xf32>
    %cst_44 = arith.constant 0.707106769 : f32
    %84 = vector.broadcast %cst_44 : f32 to vector<40x32xf32>
    %85 = arith.mulf %81, %84 : vector<40x32xf32>
    %cst_45 = arith.constant 0.000000e+00 : f32
    %86 = vector.broadcast %cst_45 : f32 to vector<40x32xf32>
    %87 = arith.cmpf oge, %85, %86 : vector<40x32xf32>
    %cst_46 = arith.constant 1.000000e+00 : f32
    %cst_47 = arith.constant -1.000000e+00 : f32
    %88 = vector.broadcast %cst_46 : f32 to vector<40x32xf32>
    %89 = vector.broadcast %cst_47 : f32 to vector<40x32xf32>
    %90 = arith.select %87, %88, %89 : vector<40x32xi1>, vector<40x32xf32>
    %91 = math.absf %85 : vector<40x32xf32>
    %cst_48 = arith.constant 0.327591091 : f32
    %92 = vector.broadcast %cst_48 : f32 to vector<40x32xf32>
    %93 = arith.mulf %92, %91 : vector<40x32xf32>
    %cst_49 = arith.constant 1.000000e+00 : f32
    %94 = vector.broadcast %cst_49 : f32 to vector<40x32xf32>
    %95 = arith.addf %94, %93 : vector<40x32xf32>
    %96 = tpu.reciprocal %95 {approx = true} : vector<40x32xf32> -> vector<40x32xf32>
    %cst_50 = arith.constant 1.06140542 : f32
    %97 = vector.broadcast %cst_50 : f32 to vector<40x32xf32>
    %98 = arith.mulf %97, %96 : vector<40x32xf32>
    %cst_51 = arith.constant -1.45315206 : f32
    %99 = vector.broadcast %cst_51 : f32 to vector<40x32xf32>
    %100 = arith.addf %98, %99 : vector<40x32xf32>
    %101 = arith.mulf %100, %96 : vector<40x32xf32>
    %cst_52 = arith.constant 1.42141378 : f32
    %102 = vector.broadcast %cst_52 : f32 to vector<40x32xf32>
    %103 = arith.addf %101, %102 : vector<40x32xf32>
    %104 = arith.mulf %103, %96 : vector<40x32xf32>
    %cst_53 = arith.constant -0.284496725 : f32
    %105 = vector.broadcast %cst_53 : f32 to vector<40x32xf32>
    %106 = arith.addf %104, %105 : vector<40x32xf32>
    %107 = arith.mulf %106, %96 : vector<40x32xf32>
    %cst_54 = arith.constant 0.254829586 : f32
    %108 = vector.broadcast %cst_54 : f32 to vector<40x32xf32>
    %109 = arith.addf %107, %108 : vector<40x32xf32>
    %110 = arith.mulf %109, %96 : vector<40x32xf32>
    %cst_55 = arith.constant 0.000000e+00 : f32
    %111 = vector.broadcast %cst_55 : f32 to vector<40x32xf32>
    %112 = arith.subf %111, %91 : vector<40x32xf32>
    %113 = arith.mulf %112, %91 : vector<40x32xf32>
    %114 = math.exp %113 : vector<40x32xf32>
    %115 = arith.mulf %110, %114 : vector<40x32xf32>
    %cst_56 = arith.constant 1.000000e+00 : f32
    %116 = vector.broadcast %cst_56 : f32 to vector<40x32xf32>
    %117 = arith.subf %116, %115 : vector<40x32xf32>
    %118 = arith.mulf %90, %117 : vector<40x32xf32>
    %cst_57 = arith.constant 1.000000e+00 : f32
    %119 = vector.broadcast %cst_57 : f32 to vector<40x32xf32>
    %120 = arith.addf %119, %118 : vector<40x32xf32>
    %121 = arith.mulf %83, %120 : vector<40x32xf32>
    %122 = vector.extract_strided_slice %121 {offsets = [0, 16], sizes = [40, 16], strides = [1, 1]} : vector<40x32xf32> to vector<40x16xf32>
    %c0_58 = arith.constant 0 : index
    %c0_59 = arith.constant 0 : index
    %c0_60 = arith.constant 0 : index
    %123 = vector.load %arg10[%c0_58, %c0_59, %c0_60] : memref<1x40x16xf32, #tpu.memory_space<vmem>>, vector<1x40x16xf32>
    %124 = vector.shape_cast %123 : vector<1x40x16xf32> to vector<40x16xf32>
    %125 = vector.shape_cast %122 : vector<40x16xf32> to vector<1x40x16xf32>
    tpu.vector_store %arg10[%c0_58, %c0_59, %c0_60], %125 {strides = array<i32>} : memref<1x40x16xf32, #tpu.memory_space<vmem>>, vector<1x40x16xf32>,
    %cst_61 = arith.constant 0.000000e+00 : f32
    %126 = vector.broadcast %cst_61 : f32 to vector<40x16xf32>
    %c0_62 = arith.constant 0 : index
    %c0_63 = arith.constant 0 : index
    %127 = vector.load %arg11[%c0_62, %c0_63] : memref<120x16xf32, #tpu.memory_space<vmem>>, vector<40x16xf32>
    tpu.vector_store %arg11[%c0_62, %c0_63], %126 {strides = array<i32>} : memref<120x16xf32, #tpu.memory_space<vmem>>, vector<40x16xf32>,
    %cst_64 = arith.constant 0.000000e+00 : f32
    %128 = vector.broadcast %cst_64 : f32 to vector<40x16xf32>
    %c80_65 = arith.constant 80 : index
    %c0_66 = arith.constant 0 : index
    %129 = vector.load %arg11[%c80_65, %c0_66] : memref<120x16xf32, #tpu.memory_space<vmem>>, vector<40x16xf32>
    tpu.vector_store %arg11[%c80_65, %c0_66], %128 {strides = array<i32>} : memref<120x16xf32, #tpu.memory_space<vmem>>, vector<40x16xf32>,
    %130 = vector.extract_strided_slice %121 {offsets = [0, 0], sizes = [40, 16], strides = [1, 1]} : vector<40x32xf32> to vector<40x16xf32>
    %c40_67 = arith.constant 40 : index
    %c0_68 = arith.constant 0 : index
    %131 = vector.load %arg11[%c40_67, %c0_68] : memref<120x16xf32, #tpu.memory_space<vmem>>, vector<40x16xf32>
    tpu.vector_store %arg11[%c40_67, %c0_68], %130 {strides = array<i32>} : memref<120x16xf32, #tpu.memory_space<vmem>>, vector<40x16xf32>,
    %c-2_i32_69 = arith.constant -2 : i32
    %132 = arith.muli %c-2_i32_69, %1 : i32
    %c38_i32_70 = arith.constant 38 : i32
    %133 = arith.addi %c38_i32_70, %132 : i32
    %134 = arith.index_cast %133 : i32 to index
    %c0_71 = arith.constant 0 : index
    %135 = vector.load %arg11[%134, %c0_71] : memref<120x16xf32, #tpu.memory_space<vmem>>, vector<44x16xf32>
    %136 = vector.extract_strided_slice %135 {offsets = [0, 0], sizes = [40, 16], strides = [1, 1]} : vector<44x16xf32> to vector<40x16xf32>
    %c0_72 = arith.constant 0 : index
    %c0_73 = arith.constant 0 : index
    %137 = vector.load %arg13[%c0_72, %c0_73] : memref<40x400xf32, #tpu.memory_space<vmem>>, vector<40x16xf32>
    tpu.vector_store %arg13[%c0_72, %c0_73], %136 {strides = array<i32>} : memref<40x400xf32, #tpu.memory_space<vmem>>, vector<40x16xf32>,
    %138 = vector.extract_strided_slice %135 {offsets = [1, 0], sizes = [40, 16], strides = [1, 1]} : vector<44x16xf32> to vector<40x16xf32>
    %c0_74 = arith.constant 0 : index
    %c16_75 = arith.constant 16 : index
    %139 = vector.load %arg13[%c0_74, %c16_75] : memref<40x400xf32, #tpu.memory_space<vmem>>, vector<40x16xf32>
    tpu.vector_store %arg13[%c0_74, %c16_75], %138 {strides = array<i32>} : memref<40x400xf32, #tpu.memory_space<vmem>>, vector<40x16xf32>,
    %140 = vector.extract_strided_slice %135 {offsets = [2, 0], sizes = [40, 16], strides = [1, 1]} : vector<44x16xf32> to vector<40x16xf32>
    %c0_76 = arith.constant 0 : index
    %c32_77 = arith.constant 32 : index
    %141 = vector.load %arg13[%c0_76, %c32_77] : memref<40x400xf32, #tpu.memory_space<vmem>>, vector<40x16xf32>
    tpu.vector_store %arg13[%c0_76, %c32_77], %140 {strides = array<i32>} : memref<40x400xf32, #tpu.memory_space<vmem>>, vector<40x16xf32>,
    %142 = vector.extract_strided_slice %135 {offsets = [3, 0], sizes = [40, 16], strides = [1, 1]} : vector<44x16xf32> to vector<40x16xf32>
    %c0_78 = arith.constant 0 : index
    %c48_79 = arith.constant 48 : index
    %143 = vector.load %arg13[%c0_78, %c48_79] : memref<40x400xf32, #tpu.memory_space<vmem>>, vector<40x16xf32>
    tpu.vector_store %arg13[%c0_78, %c48_79], %142 {strides = array<i32>} : memref<40x400xf32, #tpu.memory_space<vmem>>, vector<40x16xf32>,
    %144 = vector.extract_strided_slice %135 {offsets = [4, 0], sizes = [40, 16], strides = [1, 1]} : vector<44x16xf32> to vector<40x16xf32>
    %c0_80 = arith.constant 0 : index
    %c64_81 = arith.constant 64 : index
    %145 = vector.load %arg13[%c0_80, %c64_81] : memref<40x400xf32, #tpu.memory_space<vmem>>, vector<40x16xf32>
    tpu.vector_store %arg13[%c0_80, %c64_81], %144 {strides = array<i32>} : memref<40x400xf32, #tpu.memory_space<vmem>>, vector<40x16xf32>,
    %c-1_i32_82 = arith.constant -1 : i32
    %146 = arith.muli %c-1_i32_82, %1 : i32
    %c38_i32_83 = arith.constant 38 : i32
    %147 = arith.addi %c38_i32_83, %146 : i32
    %148 = arith.index_cast %147 : i32 to index
    %c0_84 = arith.constant 0 : index
    %149 = vector.load %arg11[%148, %c0_84] : memref<120x16xf32, #tpu.memory_space<vmem>>, vector<44x16xf32>
    %150 = vector.extract_strided_slice %149 {offsets = [0, 0], sizes = [40, 16], strides = [1, 1]} : vector<44x16xf32> to vector<40x16xf32>
    %c0_85 = arith.constant 0 : index
    %c80_86 = arith.constant 80 : index
    %151 = vector.load %arg13[%c0_85, %c80_86] : memref<40x400xf32, #tpu.memory_space<vmem>>, vector<40x16xf32>
    tpu.vector_store %arg13[%c0_85, %c80_86], %150 {strides = array<i32>} : memref<40x400xf32, #tpu.memory_space<vmem>>, vector<40x16xf32>,
    %152 = vector.extract_strided_slice %149 {offsets = [1, 0], sizes = [40, 16], strides = [1, 1]} : vector<44x16xf32> to vector<40x16xf32>
    %c0_87 = arith.constant 0 : index
    %c96_88 = arith.constant 96 : index
    %153 = vector.load %arg13[%c0_87, %c96_88] : memref<40x400xf32, #tpu.memory_space<vmem>>, vector<40x16xf32>
    tpu.vector_store %arg13[%c0_87, %c96_88], %152 {strides = array<i32>} : memref<40x400xf32, #tpu.memory_space<vmem>>, vector<40x16xf32>,
    %154 = vector.extract_strided_slice %149 {offsets = [2, 0], sizes = [40, 16], strides = [1, 1]} : vector<44x16xf32> to vector<40x16xf32>
    %c0_89 = arith.constant 0 : index
    %c112_90 = arith.constant 112 : index
    %155 = vector.load %arg13[%c0_89, %c112_90] : memref<40x400xf32, #tpu.memory_space<vmem>>, vector<40x16xf32>
    tpu.vector_store %arg13[%c0_89, %c112_90], %154 {strides = array<i32>} : memref<40x400xf32, #tpu.memory_space<vmem>>, vector<40x16xf32>,
    %156 = vector.extract_strided_slice %149 {offsets = [3, 0], sizes = [40, 16], strides = [1, 1]} : vector<44x16xf32> to vector<40x16xf32>
    %c0_91 = arith.constant 0 : index
    %c128_92 = arith.constant 128 : index
    %157 = vector.load %arg13[%c0_91, %c128_92] : memref<40x400xf32, #tpu.memory_space<vmem>>, vector<40x16xf32>
    tpu.vector_store %arg13[%c0_91, %c128_92], %156 {strides = array<i32>} : memref<40x400xf32, #tpu.memory_space<vmem>>, vector<40x16xf32>,
    %158 = vector.extract_strided_slice %149 {offsets = [4, 0], sizes = [40, 16], strides = [1, 1]} : vector<44x16xf32> to vector<40x16xf32>
    %c0_93 = arith.constant 0 : index
    %c144_94 = arith.constant 144 : index
    %159 = vector.load %arg13[%c0_93, %c144_94] : memref<40x400xf32, #tpu.memory_space<vmem>>, vector<40x16xf32>
    tpu.vector_store %arg13[%c0_93, %c144_94], %158 {strides = array<i32>} : memref<40x400xf32, #tpu.memory_space<vmem>>, vector<40x16xf32>,
    %c0_i32_95 = arith.constant 0 : i32
    %160 = arith.muli %c0_i32_95, %1 : i32
    %c38_i32_96 = arith.constant 38 : i32
    %161 = arith.addi %c38_i32_96, %160 : i32
    %162 = arith.index_cast %161 : i32 to index
    %c0_97 = arith.constant 0 : index
    %163 = vector.load %arg11[%162, %c0_97] : memref<120x16xf32, #tpu.memory_space<vmem>>, vector<44x16xf32>
    %164 = vector.extract_strided_slice %163 {offsets = [0, 0], sizes = [40, 16], strides = [1, 1]} : vector<44x16xf32> to vector<40x16xf32>
    %c0_98 = arith.constant 0 : index
    %c160_99 = arith.constant 160 : index
    %165 = vector.load %arg13[%c0_98, %c160_99] : memref<40x400xf32, #tpu.memory_space<vmem>>, vector<40x16xf32>
    tpu.vector_store %arg13[%c0_98, %c160_99], %164 {strides = array<i32>} : memref<40x400xf32, #tpu.memory_space<vmem>>, vector<40x16xf32>,
    %166 = vector.extract_strided_slice %163 {offsets = [1, 0], sizes = [40, 16], strides = [1, 1]} : vector<44x16xf32> to vector<40x16xf32>
    %c0_100 = arith.constant 0 : index
    %c176_101 = arith.constant 176 : index
    %167 = vector.load %arg13[%c0_100, %c176_101] : memref<40x400xf32, #tpu.memory_space<vmem>>, vector<40x16xf32>
    tpu.vector_store %arg13[%c0_100, %c176_101], %166 {strides = array<i32>} : memref<40x400xf32, #tpu.memory_space<vmem>>, vector<40x16xf32>,
    %168 = vector.extract_strided_slice %163 {offsets = [2, 0], sizes = [40, 16], strides = [1, 1]} : vector<44x16xf32> to vector<40x16xf32>
    %c0_102 = arith.constant 0 : index
    %c192_103 = arith.constant 192 : index
    %169 = vector.load %arg13[%c0_102, %c192_103] : memref<40x400xf32, #tpu.memory_space<vmem>>, vector<40x16xf32>
    tpu.vector_store %arg13[%c0_102, %c192_103], %168 {strides = array<i32>} : memref<40x400xf32, #tpu.memory_space<vmem>>, vector<40x16xf32>,
    %170 = vector.extract_strided_slice %163 {offsets = [3, 0], sizes = [40, 16], strides = [1, 1]} : vector<44x16xf32> to vector<40x16xf32>
    %c0_104 = arith.constant 0 : index
    %c208 = arith.constant 208 : index
    %171 = vector.load %arg13[%c0_104, %c208] : memref<40x400xf32, #tpu.memory_space<vmem>>, vector<40x16xf32>
    tpu.vector_store %arg13[%c0_104, %c208], %170 {strides = array<i32>} : memref<40x400xf32, #tpu.memory_space<vmem>>, vector<40x16xf32>,
    %172 = vector.extract_strided_slice %163 {offsets = [4, 0], sizes = [40, 16], strides = [1, 1]} : vector<44x16xf32> to vector<40x16xf32>
    %c0_105 = arith.constant 0 : index
    %c224 = arith.constant 224 : index
    %173 = vector.load %arg13[%c0_105, %c224] : memref<40x400xf32, #tpu.memory_space<vmem>>, vector<40x16xf32>
    tpu.vector_store %arg13[%c0_105, %c224], %172 {strides = array<i32>} : memref<40x400xf32, #tpu.memory_space<vmem>>, vector<40x16xf32>,
    %c1_i32_106 = arith.constant 1 : i32
    %174 = arith.muli %c1_i32_106, %1 : i32
    %c38_i32_107 = arith.constant 38 : i32
    %175 = arith.addi %c38_i32_107, %174 : i32
    %176 = arith.index_cast %175 : i32 to index
    %c0_108 = arith.constant 0 : index
    %177 = vector.load %arg11[%176, %c0_108] : memref<120x16xf32, #tpu.memory_space<vmem>>, vector<44x16xf32>
    %178 = vector.extract_strided_slice %177 {offsets = [0, 0], sizes = [40, 16], strides = [1, 1]} : vector<44x16xf32> to vector<40x16xf32>
    %c0_109 = arith.constant 0 : index
    %c240 = arith.constant 240 : index
    %179 = vector.load %arg13[%c0_109, %c240] : memref<40x400xf32, #tpu.memory_space<vmem>>, vector<40x16xf32>
    tpu.vector_store %arg13[%c0_109, %c240], %178 {strides = array<i32>} : memref<40x400xf32, #tpu.memory_space<vmem>>, vector<40x16xf32>,
    %180 = vector.extract_strided_slice %177 {offsets = [1, 0], sizes = [40, 16], strides = [1, 1]} : vector<44x16xf32> to vector<40x16xf32>
    %c0_110 = arith.constant 0 : index
    %c256 = arith.constant 256 : index
    %181 = vector.load %arg13[%c0_110, %c256] : memref<40x400xf32, #tpu.memory_space<vmem>>, vector<40x16xf32>
    tpu.vector_store %arg13[%c0_110, %c256], %180 {strides = array<i32>} : memref<40x400xf32, #tpu.memory_space<vmem>>, vector<40x16xf32>,
    %182 = vector.extract_strided_slice %177 {offsets = [2, 0], sizes = [40, 16], strides = [1, 1]} : vector<44x16xf32> to vector<40x16xf32>
    %c0_111 = arith.constant 0 : index
    %c272 = arith.constant 272 : index
    %183 = vector.load %arg13[%c0_111, %c272] : memref<40x400xf32, #tpu.memory_space<vmem>>, vector<40x16xf32>
    tpu.vector_store %arg13[%c0_111, %c272], %182 {strides = array<i32>} : memref<40x400xf32, #tpu.memory_space<vmem>>, vector<40x16xf32>,
    %184 = vector.extract_strided_slice %177 {offsets = [3, 0], sizes = [40, 16], strides = [1, 1]} : vector<44x16xf32> to vector<40x16xf32>
    %c0_112 = arith.constant 0 : index
    %c288 = arith.constant 288 : index
    %185 = vector.load %arg13[%c0_112, %c288] : memref<40x400xf32, #tpu.memory_space<vmem>>, vector<40x16xf32>
    tpu.vector_store %arg13[%c0_112, %c288], %184 {strides = array<i32>} : memref<40x400xf32, #tpu.memory_space<vmem>>, vector<40x16xf32>,
    %186 = vector.extract_strided_slice %177 {offsets = [4, 0], sizes = [40, 16], strides = [1, 1]} : vector<44x16xf32> to vector<40x16xf32>
    %c0_113 = arith.constant 0 : index
    %c304 = arith.constant 304 : index
    %187 = vector.load %arg13[%c0_113, %c304] : memref<40x400xf32, #tpu.memory_space<vmem>>, vector<40x16xf32>
    tpu.vector_store %arg13[%c0_113, %c304], %186 {strides = array<i32>} : memref<40x400xf32, #tpu.memory_space<vmem>>, vector<40x16xf32>,
    %c2_i32_114 = arith.constant 2 : i32
    %188 = arith.muli %c2_i32_114, %1 : i32
    %c38_i32_115 = arith.constant 38 : i32
    %189 = arith.addi %c38_i32_115, %188 : i32
    %190 = arith.index_cast %189 : i32 to index
    %c0_116 = arith.constant 0 : index
    %191 = vector.load %arg11[%190, %c0_116] : memref<120x16xf32, #tpu.memory_space<vmem>>, vector<44x16xf32>
    %192 = vector.extract_strided_slice %191 {offsets = [0, 0], sizes = [40, 16], strides = [1, 1]} : vector<44x16xf32> to vector<40x16xf32>
    %c0_117 = arith.constant 0 : index
    %c320 = arith.constant 320 : index
    %193 = vector.load %arg13[%c0_117, %c320] : memref<40x400xf32, #tpu.memory_space<vmem>>, vector<40x16xf32>
    tpu.vector_store %arg13[%c0_117, %c320], %192 {strides = array<i32>} : memref<40x400xf32, #tpu.memory_space<vmem>>, vector<40x16xf32>,
    %194 = vector.extract_strided_slice %191 {offsets = [1, 0], sizes = [40, 16], strides = [1, 1]} : vector<44x16xf32> to vector<40x16xf32>
    %c0_118 = arith.constant 0 : index
    %c336 = arith.constant 336 : index
    %195 = vector.load %arg13[%c0_118, %c336] : memref<40x400xf32, #tpu.memory_space<vmem>>, vector<40x16xf32>
    tpu.vector_store %arg13[%c0_118, %c336], %194 {strides = array<i32>} : memref<40x400xf32, #tpu.memory_space<vmem>>, vector<40x16xf32>,
    %196 = vector.extract_strided_slice %191 {offsets = [2, 0], sizes = [40, 16], strides = [1, 1]} : vector<44x16xf32> to vector<40x16xf32>
    %c0_119 = arith.constant 0 : index
    %c352 = arith.constant 352 : index
    %197 = vector.load %arg13[%c0_119, %c352] : memref<40x400xf32, #tpu.memory_space<vmem>>, vector<40x16xf32>
    tpu.vector_store %arg13[%c0_119, %c352], %196 {strides = array<i32>} : memref<40x400xf32, #tpu.memory_space<vmem>>, vector<40x16xf32>,
    %198 = vector.extract_strided_slice %191 {offsets = [3, 0], sizes = [40, 16], strides = [1, 1]} : vector<44x16xf32> to vector<40x16xf32>
    %c0_120 = arith.constant 0 : index
    %c368 = arith.constant 368 : index
    %199 = vector.load %arg13[%c0_120, %c368] : memref<40x400xf32, #tpu.memory_space<vmem>>, vector<40x16xf32>
    tpu.vector_store %arg13[%c0_120, %c368], %198 {strides = array<i32>} : memref<40x400xf32, #tpu.memory_space<vmem>>, vector<40x16xf32>,
    %200 = vector.extract_strided_slice %191 {offsets = [4, 0], sizes = [40, 16], strides = [1, 1]} : vector<44x16xf32> to vector<40x16xf32>
    %c0_121 = arith.constant 0 : index
    %c384 = arith.constant 384 : index
    %201 = vector.load %arg13[%c0_121, %c384] : memref<40x400xf32, #tpu.memory_space<vmem>>, vector<40x16xf32>
    tpu.vector_store %arg13[%c0_121, %c384], %200 {strides = array<i32>} : memref<40x400xf32, #tpu.memory_space<vmem>>, vector<40x16xf32>,
    %c0_122 = arith.constant 0 : index
    %c0_123 = arith.constant 0 : index
    %202 = vector.load %arg13[%c0_122, %c0_123] : memref<40x400xf32, #tpu.memory_space<vmem>>, vector<40x400xf32>
    %c0_124 = arith.constant 0 : index
    %c0_125 = arith.constant 0 : index
    %c0_126 = arith.constant 0 : index
    %203 = vector.load %arg4[%c0_124, %c0_125, %c0_126] : memref<1x40x400xf32, #tpu.memory_space<vmem>>, vector<1x40x400xf32>
    %204 = vector.shape_cast %203 : vector<1x40x400xf32> to vector<40x400xf32>
    %205 = arith.mulf %202, %204 : vector<40x400xf32>
    %206 = arith.truncf %205 : vector<40x400xf32> to vector<40x400xbf16>
    %c0_127 = arith.constant 0 : index
    %c0_128 = arith.constant 0 : index
    %207 = vector.load %arg7[%c0_127, %c0_128] : memref<400x8xbf16, #tpu.memory_space<vmem>>, vector<400x8xbf16>
    %cst_129 = arith.constant dense<0.000000e+00> : vector<40x8xf32>
    %208 = tpu.matmul %206, %207, %cst_129 {dimension_numbers = #tpu.dot_dimension_numbers<[1], [0], [0], [1], [0, 0, 1, 1], [], []>} : vector<40x400xbf16>, vector<400x8xbf16>, vector<40x8xf32> -> vector<40x8xf32>
    %c0_130 = arith.constant 0 : index
    %c0_131 = arith.constant 0 : index
    %209 = vector.load %arg8[%c0_130, %c0_131] : memref<1x8xf32, #tpu.memory_space<vmem>>, vector<1x8xf32>
    %210 = vector.broadcast %209 : vector<1x8xf32> to vector<40x8xf32>
    %211 = arith.addf %208, %210 : vector<40x8xf32>
    %c0_132 = arith.constant 0 : index
    %c0_133 = arith.constant 0 : index
    %c0_134 = arith.constant 0 : index
    %212 = vector.load %arg9[%c0_132, %c0_133, %c0_134] : memref<1x40x8xf32, #tpu.memory_space<vmem>>, vector<1x40x8xf32>
    %213 = vector.shape_cast %212 : vector<1x40x8xf32> to vector<40x8xf32>
    %214 = vector.shape_cast %211 : vector<40x8xf32> to vector<1x40x8xf32>
    tpu.vector_store %arg9[%c0_132, %c0_133, %c0_134], %214 {strides = array<i32>} : memref<1x40x8xf32, #tpu.memory_space<vmem>>, vector<1x40x8xf32>,
    return
  }
  func.func @transform_0(%arg0: i32, %arg1: memref<2xi32, #tpu.memory_space<smem>>) -> (i32, i32) {
    %c0_i32 = arith.constant 0 : i32
    %c0_i32_0 = arith.constant 0 : i32
    %c0_i32_1 = arith.constant 0 : i32
    return %c0_i32, %c0_i32_0 : i32, i32
  }
  func.func @transform_1(%arg0: i32, %arg1: memref<2xi32, #tpu.memory_space<smem>>) -> (i32, i32, i32) {
    %c0_i32 = arith.constant 0 : i32
    %c0_i32_0 = arith.constant 0 : i32
    %c0_i32_1 = arith.constant 0 : i32
    return %arg0, %c0_i32, %c0_i32_0 : i32, i32, i32
  }
  func.func @transform_2(%arg0: i32, %arg1: memref<2xi32, #tpu.memory_space<smem>>) -> (i32, i32, i32) {
    %c0_i32 = arith.constant 0 : i32
    %c0_i32_0 = arith.constant 0 : i32
    %c0_i32_1 = arith.constant 0 : i32
    return %arg0, %c0_i32, %c0_i32_0 : i32, i32, i32
  }
  func.func @transform_3(%arg0: i32, %arg1: memref<2xi32, #tpu.memory_space<smem>>) -> (i32, i32) {
    %c0_i32 = arith.constant 0 : i32
    %c0_i32_0 = arith.constant 0 : i32
    %c0_i32_1 = arith.constant 0 : i32
    return %c0_i32, %c0_i32_0 : i32, i32
  }
  func.func @transform_4(%arg0: i32, %arg1: memref<2xi32, #tpu.memory_space<smem>>) -> (i32, i32) {
    %c0_i32 = arith.constant 0 : i32
    %c0_i32_0 = arith.constant 0 : i32
    %c0_i32_1 = arith.constant 0 : i32
    return %c0_i32, %c0_i32_0 : i32, i32
  }
  func.func @transform_5(%arg0: i32, %arg1: memref<2xi32, #tpu.memory_space<smem>>) -> (i32, i32) {
    %c0_i32 = arith.constant 0 : i32
    %c0_i32_0 = arith.constant 0 : i32
    %c0_i32_1 = arith.constant 0 : i32
    return %c0_i32, %c0_i32_0 : i32, i32
  }
  func.func @transform_6(%arg0: i32, %arg1: memref<2xi32, #tpu.memory_space<smem>>) -> (i32, i32) {
    %c0_i32 = arith.constant 0 : i32
    %c0_i32_0 = arith.constant 0 : i32
    %c0_i32_1 = arith.constant 0 : i32
    return %c0_i32, %c0_i32_0 : i32, i32
  }
  func.func @transform_7(%arg0: i32, %arg1: memref<2xi32, #tpu.memory_space<smem>>) -> (i32, i32, i32) {
    %c0_i32 = arith.constant 0 : i32
    %c0_i32_0 = arith.constant 0 : i32
    %c0_i32_1 = arith.constant 0 : i32
    return %arg0, %c0_i32, %c0_i32_0 : i32, i32, i32
  }
  func.func @transform_8(%arg0: i32, %arg1: memref<2xi32, #tpu.memory_space<smem>>) -> (i32, i32, i32) {
    %c0_i32 = arith.constant 0 : i32
    %c0_i32_0 = arith.constant 0 : i32
    %c0_i32_1 = arith.constant 0 : i32
    return %arg0, %c0_i32, %c0_i32_0 : i32, i32, i32
  }
}

</mosaic_0001>

<bundles_post_ra>
// kernel: twin_block_forward.3
= control target key start
LH: loop header
LB: loop body
LE: loop exit
PB: predicated region body
PF: predicated region fallthrough
CT: control target
= control target key end

     0   :  { %10 = vsyncpa [#allocation3], 0  ;;  %s149_s0 = inlined_call_operand.vmem [shape: f32[2], index: 0, kind: input, shape index: {}]   ;;  %s150_s1 = inlined_call_operand.vmem [shape: f32[2,2], index: 1, kind: input, shape index: {}]   ;;  %s151_s2 = inlined_call_operand.vmem [shape: f32[2,128], index: 2, kind: input, shape index: {}]   ;;  %s152_s3 = inlined_call_operand.vmem [shape: f32[2,2,128], index: 3, kind: input, shape index: {}]   ;;  %s153_s4 = inlined_call_operand.vmem [shape: f32[2,2,128], index: 4, kind: input, shape index: {}]   ;;  %s154_s5 = inlined_call_operand.vmem [shape: f32[2,128], index: 5, kind: output, shape index: {}]  }
   0x1   :  { %s17_s20 = sshll.u32 %s149_s0, 4  ;;  %s18_s20 = int_to_ptr.vmem [resolvable:$true] %s17_s20 }
   0x2   :  { %s78_s21 = scalar_lea.vmem %s18_s20, 16  ;;  %p83_p1 = scmp.lt.s32.totalorder %s18_s20, %s18_s20 }
   0x3   :  { %p79_p0 = scmp.ne.s32.totalorder %s18_s20, %s78_s21  ;;  %p84_p2 = scmp.lt.s32.totalorder %s78_s21, %s78_s21 }
   0x5   :  { %p85_p3 = por %p84_p2, %p83_p1 }
   0x7   :  { %p86_p4 = pnand %p85_p3, %p79_p0 }
   0x9   :  { %89 = shalt.err (!%p86_p4)
}
   0xa   :  { %s92_s22 = smov [#allocation2]  }
   0xb   :  { %20 = dma.vmem_to_smem %s18_s20, 16, %s92_s22, [#allocation3]  }
   0xc   :  { %90 = dma.done.wait [#allocation3], 16  }
   0xd   :  { %91 = vsyncadd [#allocation3], 4294967280 }
   0xe   :  { %32 = sfence }
   0xf   :  { %v36_v0 = vld [vmem:[%s150_s1] sm:$0x3]  ;;  %v93_v1 = vmov 0   ;;  %v94_v2 = vmov 1   ;;  %s33_s0 = sld [smem:[#allocation2]]  ;;  %s70_s25 = sld [smem:[#allocation2 + $0x1]] }
  0x10   :  { %76 = vset.pattern.permute.xlu0 %v93_v1  ;;  %v37_v3 = vld [vmem:[%s152_s3] sm:$0x3]  ;;  %v71_v9 = vld [vmem:[%s152_s3 + $0x2] sm:$0x3] }
  0x11   :  { %46 = vperm.xlu0 %76, %v36_v0   ;;  %v40_v4 = vld [vmem:[%s153_s4] sm:$0x3]  ;;  %v72_v10 = vld [vmem:[%s153_s4 + $0x2] sm:$0x3] }
  0x12   :  { %v35_v17 = vld [vmem:[%s151_s2] sm:$0x3] }
  0x15   :  { %77 = vset.pattern.permute.xlu0 %v94_v2  ;;  %v38_v5 = vstv %s33_s0  ;;  %v41_v6 = vstv %s70_s25 }
  0x16   :  { %59 = vperm.xlu0 %77, %v36_v0   ;;  %v39_v7 = vmul.f32 %v38_v5, %v37_v3  ;;  %v42_v8 = vmul.f32 %v41_v6, %v40_v4  ;;  %v53_v12 = vmul.f32 %v71_v9, %v38_v5  ;;  %v56_v13 = vmul.f32 %v72_v10, %v41_v6 }
  0x18   :  { %v43_v11 = vadd.f32 %v42_v8, %v39_v7  ;;  %v57_v16 = vadd.f32 %v56_v13, %v53_v12 }
  0x90   :  { %v47_v14 = vpop.permute.xlu0 %46 }
  0x91   :  { %v49_v15 = vmul.f32 %v47_v14, %v43_v11 }
  0x93   :  { %v50_v19 = vadd.f32 %v49_v15, %v35_v17 }
  0x95   :  { %v60_v18 = vpop.permute.xlu0 %59 }
  0x96   :  { %v62_v20 = vmul.f32 %v60_v18, %v57_v16 }
  0x98   :  { %v63_v21 = vadd.f32 %v62_v20, %v50_v19 }
  0x9a   :  { %64 = vst [vmem:[%s154_s5] sm:$0x3] %v63_v21 }
  0x9b   :  { %69 = vsyncpa [#allocation3], 1 }

// kernel: twin_block_forward.2
= control target key start
LH: loop header
LB: loop body
LE: loop exit
PB: predicated region body
PF: predicated region fallthrough
CT: control target
= control target key end

     0   :  { %s5054_s0 = inlined_call_operand.vmem [shape: s32[2], index: 0, kind: input, shape index: {}]   ;;  %s5055_s1 = inlined_call_operand.vmem [shape: f32[120,8], index: 1, kind: input, shape index: {}]   ;;  %s5056_s2 = inlined_call_operand.vmem [shape: f32[2,40,200], index: 2, kind: input, shape index: {}]   ;;  %s5057_s3 = inlined_call_operand.vmem [shape: f32[2,40,400], index: 3, kind: input, shape index: {}]   ;;  %s5058_s4 = inlined_call_operand.vmem [shape: bf16[200,32], index: 4, kind: input, shape index: {}]   ;;  %s5059_s5 = inlined_call_operand.vmem [shape: f32[1,32], index: 5, kind: input, shape index: {}]   ;;  %s5060_s6 = inlined_call_operand.vmem [shape: bf16[400,8], index: 6, kind: input, shape index: {}]   ;;  %s5061_s7 = inlined_call_operand.vmem [shape: f32[1,8], index: 7, kind: input, shape index: {}]   ;;  %s5062_s8 = inlined_call_operand.vmem [shape: f32[2,40,8], index: 8, kind: output, shape index: {0}]   ;;  %s5063_s9 = inlined_call_operand.vmem [shape: f32[2,40,16], index: 9, kind: output, shape index: {1}]  }
   0x1   :  { %s15_s11 = sshll.u32 %s5054_s0, 4  ;;  %s16_s11 = int_to_ptr.vmem [resolvable:$true] %s15_s11 }
   0x2   :  { %s3002_s12 = scalar_lea.vmem %s16_s11, 16  ;;  %p3007_p1 = scmp.lt.s32.totalorder %s16_s11, %s16_s11 }
   0x3   :  { %p3003_p0 = scmp.ne.s32.totalorder %s16_s11, %s3002_s12  ;;  %p3008_p2 = scmp.lt.s32.totalorder %s3002_s12, %s3002_s12 }
   0x5   :  { %p3009_p3 = por %p3008_p2, %p3007_p1 }
   0x7   :  { %p3010_p4 = pnand %p3009_p3, %p3003_p0 }
   0x9   :  { %3013 = shalt.err (!%p3010_p4)  }
   0xa   :  { %s3024_s13 = smov [#allocation6]  }
   0xb   :  { %18 = dma.vmem_to_smem %s16_s11, 16, %s3024_s13, [#allocation5] }
   0xc   :  { %3018 = dma.done.wait [#allocation5], 16 }
   0xd   :  { %3019 = vsyncadd [#allocation5], 4294967280 }
   0xe   :  { %20 = sfence }
   0xf   :  { %s3096_s14 = smov 0  }
  0x10 LB: > { %s3102_s0 = sadd.s32 4294967295, %s3022_s14   ;;  %p2789_p5 = scmp.ge.s32.totalorder %s3022_s14, 1  ;;  %s3022_s14 = sphi %s3096_s14, %s26_s14  }
  0x11   : > { %p282_p6 = scmp.lt.s32.totalorder %s3022_s14, 3 }
  0x13   : > { %p283_p7 = pnand %p2789_p5, %p282_p6 }
  0x15   : > { %286 = sbr.rel (%p283_p7) target bundleno = 1202 (0x4b2), region = 48 }
  0x1c   : > { %s3107_s15 = sld [smem:[#allocation6 + %s3102_s0]]  ;;  %vm5069_vm0 = vcmask 64512   ;;  %vm5074_vm1 = vcmask 1045504   ;;  %vm5071_vm2 = vcmask 1046528   ;;  %s3025_s20 = smov 16   ;;  %vm5073_vm3 = vcmask 1044480  }
  0x1d   : > { %s3026_s21 = smov 8   ;;  %vm5072_vm4 = vcmask 1043456   ;;  %s3027_s26 = smov 24   ;;  %vm396_vm5 = vcmask 130112   ;;  %vm429_vm6 = vcmask 195712   ;;  %vm462_vm7 = vcmask 261312  }
  0x1e   : > { %s3028_s27 = smov 32   ;;  %s3029_s10 = smov 40   ;;  %vm495_vm8 = vcmask 326912   ;;  %vm529_vm9 = vcmask 392512   ;;  %vm562_vm10 = vcmask 458112   ;;  %vm594_vm11 = vcmask 523712  }
  0x1f   : > { %s3030_s11 = smov 48   ;;  %s3031_s12 = smov 56   ;;  %vm626_vm12 = vcmask 589312   ;;  %vm658_vm13 = vcmask 654912   ;;  %vm5075_vm14 = vcmask 720512   ;;  %vm723_vm15 = vcmask 786112  }
  0x20   : > { %s3032_s13 = smov 64   ;;  %s3033_s17 = smov 72  }
  0x21   : > { %s3037_s24 = smov 96   ;;  %s3038_s29 = smov 104  }
  0x22   : > { %s5064_s16 = smul.u32 4294967294, %s3107_s15  ;;  %s5065_s22 = ssub.s32 38, %s3107_s15 }
  0x23   : > { %s3157_s25 = scalar_lea.vmem %s5055_s1, %s5065_s22  ;;  %s3185_s30 = scalar_lea.vmem %s5055_s1, %s3107_s15 }
  0x24   : > { %s3115_s19 = scalar_lea.vmem %s5055_s1, %s5064_s16  ;;  %v3165_v23 = vld [vmem:[%s3157_s25 + $0x8] sm:$0xff]  ;;  %v3172_v26 = vld [vmem:[%s3157_s25 + $0x10] sm:$0xff]  ;;  %v3175_v27 = vld [vmem:[%s3157_s25] sm:$0xff]  ;;  %s5066_s18 = sshll.u32 %s3107_s15, 1 }
  0x25   : > { %v2794_v0 = vld [vmem:[%s3115_s19 + $0x26] sm:$0xff]  ;;  %v2795_v1 = vld [vmem:[%s3115_s19 + $0x2e] sm:$0xff]  ;;  %v3120_v2 = vld [vmem:[%s3115_s19 + $0x36] sm:$0xff]  ;;  %v537_v28 = vrot.slane %v3165_v23, 1  ;;  %v539_v29 = vrot.slane %v3172_v26, 1  ;;  %v536_v30 = vrot.slane %v3175_v27, 1  ;;  %s3360_s16 = scalar_lea.vmem %s5055_s1, %s5066_s18 }
  0x26   : > { %v403_v3 = vrot.slane %v2794_v0, 2  ;;  %v404_v4 = vrot.slane %v2795_v1, 2  ;;  %v370_v5 = vrot.slane %v2794_v0, 1  ;;  %v371_v6 = vrot.slane %v2795_v1, 1  ;;  %358 = vst.msk [vmem:[#allocation3] sm:$0xff] %vm5069_vm0, %v2794_v0  ;;  %359 = vst.msk [vmem:[#allocation3 + $0x10] sm:$0xff] %vm5069_vm0, %v2795_v1 }
  0x27   : > { %360 = vst.msk [vmem:[#allocation3 + $0x20] sm:$0xff] %vm5069_vm0, %v3120_v2  ;;  %v406_v7 = vrot.slane %v3120_v2, 2  ;;  %v373_v8 = vrot.slane %v3120_v2, 1  ;;  %v3129_v9 = vld [vmem:[%s3115_s19 + $0x3e] sm:$0xff]  ;;  %v3134_v12 = vld [vmem:[%s3115_s19 + $0x46] sm:$0xff]  ;;  %v437_v13 = vrot.slane %v2795_v1, 3  ;;  %v540_v39 = vsel %vm5071_vm2, %v537_v28, %v539_v29 }
  0x28   : > { %v405_v10 = vsel %vm5074_vm1, %v403_v3, %v404_v4  ;;  %v372_v11 = vsel %vm5071_vm2, %v370_v5, %v371_v6  ;;  %361 = vst.msk [vmem:[#allocation3 + $0x30] sm:$0xff] %vm5069_vm0, %v3129_v9  ;;  %362 = vst.msk [vmem:[#allocation3 + $0x40] sm:$0xff] %vm5069_vm0, %v3134_v12  ;;  %v439_v16 = vrot.slane %v3120_v2, 3  ;;  %v436_v17 = vrot.slane %v2794_v0, 3  ;;  %v3191_v33 = vld [vmem:[%s3185_s30 + $0x2e] sm:$0xff]  ;;  %v3197_v35 = vld [vmem:[%s3157_s25 + $0x18] sm:$0xff] }
  0x29   : > { %414 = vrot.lane.b32.xlu1 %v405_v10, %s3025_s20  ;;  %381 = vrot.lane.b32.xlu0 %v372_v11, %s3026_s21  ;;  %v407_v14 = vsel %vm5074_vm1, %v404_v4, %v406_v7  ;;  %v374_v15 = vsel %vm5071_vm2, %v371_v6, %v373_v8  ;;  %v470_v18 = vrot.slane %v2795_v1, 4  ;;  %v472_v21 = vrot.slane %v3120_v2, 4  ;;  %v3214_v42 = vld [vmem:[%s3185_s30 + $0x36] sm:$0xff]  ;;  %v3217_v43 = vld [vmem:[%s3185_s30 + $0x26] sm:$0xff]  ;;  %s3034_s22 = smov 80   ;;  %s5067_s18 = smov 112  }
  0x2a   : > { %v440_v19 = vsel %vm5073_vm3, %v437_v13, %v439_v16  ;;  %v438_v20 = vsel %vm5073_vm3, %v436_v17, %v437_v13  ;;  %v469_v22 = vrot.slane %v2794_v0, 4  ;;  %v474_v31 = vrot.slane %v3129_v9, 4  ;;  %v2799_v48 = vld [vmem:[%s3115_s19 + $0x4e] sm:$0xf]  ;;  %s3036_s19 = smov 88   ;;  %s5097_s28 = smov 112  }
  0x2b   : > { %v473_v24 = vsel %vm5072_vm4, %v470_v18, %v472_v21  ;;  %v476_v32 = vrot.slane %v3134_v12, 4  ;;  %v569_v36 = vrot.slane %v3165_v23, 2  ;;  %v571_v37 = vrot.slane %v3172_v26, 2  ;;  %p326_p8 = scmp.lt.s32.totalorder %s3102_s0, 1  ;;  %s4088_s23 = scalar_lea.vmem [#allocation2], %s3107_s15 }
  0x2c   : > { %v471_v25 = vsel %vm5072_vm4, %v469_v22, %v470_v18  ;;  %v3194_v34 = vsel %vm5072_vm4, %v472_v21, %v474_v31  ;;  %v538_v40 = vsel %vm5071_vm2, %v536_v30, %v537_v28  ;;  %v568_v41 = vrot.slane %v3175_v27, 2 }
  0x2d   : > { %416 = vrot.lane.b32.xlu1 %v407_v14, %s3025_s20  ;;  %383 = vrot.lane.b32.xlu0 %v374_v15, %s3026_s21  ;;  %v3208_v38 = vsel %vm5072_vm4, %v474_v31, %v476_v32  ;;  %v541_v44 = vrot.slane %v3197_v35, 1  ;;  %v882_v45 = vrot.slane %v3191_v33, 2  ;;  %v573_v47 = vrot.slane %v3197_v35, 2  ;;  %s5282_s0 = smov (!%p326_p8, %s3102_s0), 1 }
  0x2e   : > { %v572_v49 = vsel %vm5074_vm1, %v569_v36, %v571_v37  ;;  %v884_v50 = vrot.slane %v3214_v42, 2  ;;  %v881_v51 = vrot.slane %v3217_v43, 2  ;;  %v570_v52 = vsel %vm5074_vm1, %v568_v41, %v569_v36 }
  0x2f   : > { %v3224_v46 = vsel %vm5071_vm2, %v539_v29, %v541_v44  ;;  %v603_v53 = vrot.slane %v3172_v26, 3  ;;  %v3238_v54 = vsel %vm5074_vm1, %v571_v37, %v573_v47  ;;  %v605_v55 = vrot.slane %v3197_v35, 3 }
  0x30   : > { %v601_v56 = vrot.slane %v3165_v23, 3  ;;  %v377_v58 = vrot.slane %v3134_v12, 1  ;;  %v635_v59 = vrot.slane %v3172_v26, 4  ;;  %v637_v60 = vrot.slane %v3197_v35, 4 }
  0x31   : > { %449 = vrot.lane.b32.xlu1 %v440_v19, %s3027_s26  ;;  %447 = vrot.lane.b32.xlu0 %v438_v20, %s3027_s26  ;;  %v3245_v57 = vsel %vm5073_vm3, %v603_v53, %v605_v55  ;;  %v379_v61 = vrot.slane %v2799_v48, 1  ;;  %v885_v62 = vsel %vm5074_vm1, %v882_v45, %v884_v50  ;;  %v883_v63 = vsel %vm5074_vm1, %v881_v51, %v882_v45  ;;  %v3324_v51 = vld [vmem:[%s3157_s25 + $0x20] sm:$0xff] }
  0x32   : > { %v600_v0 = vrot.slane %v3175_v27, 3  ;;  %v913_v1 = vrot.slane %v3191_v33, 3  ;;  %v410_v3 = vrot.slane %v3134_v12, 2  ;;  %v3262_v4 = vsel %vm5072_vm4, %v635_v59, %v637_v60 }
  0x33   : > { %v3265_v5 = vsel %vm5071_vm2, %v377_v58, %v379_v61  ;;  %v412_v6 = vrot.slane %v2799_v48, 2  ;;  %v604_v10 = vsel %vm5073_vm3, %v601_v56, %v603_v53  ;;  %v861_v11 = vrot.slane %v3191_v33, 1 }
  0x34   : > { %v863_v13 = vrot.slane %v3214_v42, 1  ;;  %v915_v14 = vrot.slane %v3214_v42, 3  ;;  %v912_v15 = vrot.slane %v3217_v43, 3  ;;  %v860_v18 = vrot.slane %v3217_v43, 1 }
  0x35   : > { %482 = vrot.lane.b32.xlu1 %v473_v24, %s3028_s27  ;;  %480 = vrot.lane.b32.xlu0 %v471_v25, %s3028_s27  ;;  %v3275_v17 = vsel %vm5074_vm1, %v410_v3, %v412_v6  ;;  %v602_v19 = vsel %vm5073_vm3, %v600_v0, %v601_v56  ;;  %v443_v20 = vrot.slane %v3134_v12, 3  ;;  %v445_v22 = vrot.slane %v2799_v48, 3  ;;  %v3370_v0 = vld [vmem:[%s3360_s16 + $0x26] sm:$0xff] }
  0x36   : > { %v864_v21 = vsel %vm5071_vm2, %v861_v11, %v863_v13  ;;  %v862_v24 = vsel %vm5071_vm2, %v860_v18, %v861_v11  ;;  %v478_v25 = vrot.slane %v2799_v48, 4  ;;  %v916_v30 = vsel %vm5073_vm3, %v913_v1, %v915_v14 }
  0x37   : > { %877 = vst.msk [vmem:[#allocation3 + $0x18] sm:$0xff] %vm5069_vm0, %v864_v21  ;;  %876 = vst.msk [vmem:[#allocation3 + $0x8] sm:$0xff] %vm5069_vm0, %v862_v24  ;;  %v3287_v28 = vsel %vm5073_vm3, %v443_v20, %v445_v22  ;;  %v914_v31 = vsel %vm5073_vm3, %v912_v15, %v913_v1  ;;  %v375_v36 = vrot.slane %v3129_v9, 1  ;;  %v946_v48 = vrot.slane %v3214_v42, 4  ;;  %v3392_v21 = vld [vmem:[%s3360_s16 + $0x36] sm:$0xff]  ;;  %v2944_v22 = vld [vmem:[%s5058_s4] sm:$0xff]  }
  0x38   : > { %v3294_v29 = vsel %vm5072_vm4, %v476_v32, %v478_v25  ;;  %v633_v32 = vrot.slane %v3165_v23, 4  ;;  %v441_v1 = vrot.slane %v3129_v9, 3  ;;  %v575_v18 = vrot.slane %v3324_v51, 2 }
  0x39   : > { %516 = vrot.lane.b32.xlu1 %v3165_v23, %s3029_s10  ;;  %514 = vrot.lane.b32.xlu0 %v3175_v27, %s3029_s10  ;;  %v378_v37 = vsel %vm5071_vm2, %v375_v36, %v377_v58  ;;  %v376_v12 = vsel %vm5071_vm2, %v373_v8, %v375_v36  ;;  %v943_v8 = vrot.slane %v3217_v43, 4  ;;  %v543_v58 = vrot.slane %v3324_v51, 1  ;;  %v2945_v36 = vld [vmem:[%s5058_s4 + $0x8] sm:$0xff]  }
  0x3a   : > { %v636_v41 = vsel %vm5072_vm4, %v633_v32, %v635_v59  ;;  %v444_v15 = vsel %vm5073_vm3, %v441_v1, %v443_v20  ;;  %v5080_v24 = vmov 0  }
  0x3b   : > { %1289 = vmatprep.subr.bf16.mxu0 %v5080_v24 }
  0x3c   : > { %1290 = vmatpush1.bf16.msra.mxu0 %v2944_v22 }
  0x3d   : > { %549 = vrot.lane.b32.xlu1 %v540_v39, %s3030_s11  ;;  %547 = vrot.lane.b32.xlu0 %v538_v40, %s3030_s11  ;;  %v632_v39 = vrot.slane %v3175_v27, 4  ;;  %v944_v40 = vrot.slane %v3191_v33, 4 }
  0x3e   : > { %1291 = vmatprep.subr.bf16.mxu0 %v5080_v24 }
  0x3f   : > { %v634_v45 = vsel %vm5072_vm4, %v632_v39, %v633_v32  ;;  %v947_v23 = vsel %vm5072_vm4, %v944_v40, %v946_v48  ;;  %v945_v27 = vsel %vm5072_vm4, %v943_v8, %v944_v40  ;;  %v607_v32 = vrot.slane %v3324_v51, 3  ;;  %v2946_v40 = vld [vmem:[%s5058_s4 + $0x10] sm:$0xff]  }
  0x40   : > { %1292 = vmatpush1.bf16.msra.mxu0 %v2945_v36 }
  0x41   : > { %581 = vrot.lane.b32.xlu1 %v572_v49, %s3031_s12  ;;  %579 = vrot.lane.b32.xlu0 %v570_v52, %s3031_s12  ;;  %v408_v49 = vrot.slane %v3129_v9, 2  ;;  %v3329_v52 = vld [vmem:[%s3157_s25 + $0x28] sm:$0xf]  ;;  %v442_v9 = vsel %vm5073_vm3, %v439_v16, %v441_v1  ;;  %s5120_s25 = sshll.u32 %s3107_s15, 1 }
  0x42   : > { %v545_v59 = vrot.slane %v3329_v52, 1  ;;  %v609_v39 = vrot.slane %v3329_v52, 3  ;;  %1293 = vmatprep.subr.bf16.mxu0 %v5080_v24 }
  0x43   : > { %v411_v53 = vsel %vm5074_vm1, %v408_v49, %v410_v3  ;;  %v409_v56 = vsel %vm5074_vm1, %v406_v7, %v408_v49  ;;  %v3353_v7 = vld [vmem:[%s5055_s1 + $0x26] sm:$0xff]  ;;  %v3376_v3 = vld [vmem:[%s5055_s1 + $0x36] sm:$0xff]  ;;  %v641_v49 = vrot.slane %v3329_v52, 4 }
  0x44   : > { %v3341_v61 = vsel %vm5071_vm2, %v543_v58, %v545_v59  ;;  %v697_v11 = vrot.slane %v3353_v7, 1  ;;  %v732_v8 = vrot.slane %v3376_v3, 2  ;;  %1294 = vmatpush1.bf16.msra.mxu0 %v2946_v40  ;;  %v764_v22 = vrot.slane %v3376_v3, 3 }
  0x45   : > { %894 = vrot.lane.b32.xlu1 %v885_v62, %s3026_s21  ;;  %892 = vrot.lane.b32.xlu0 %v883_v63, %s3026_s21  ;;  %v3348_v62 = vld [vmem:[%s5055_s1 + $0x2e] sm:$0xff] }
  0x46   : > { %v3367_v63 = vld [vmem:[%s3360_s16 + $0x2e] sm:$0xff]  ;;  %v698_v6 = vrot.slane %v3348_v62, 1  ;;  %1295 = vmatprep.subr.bf16.mxu0 %v5080_v24 }
  0x47   : > { %v1010_v25 = vrot.slane %v3367_v63, 1  ;;  %v1041_v1 = vrot.slane %v3367_v63, 2  ;;  %v1072_v36 = vrot.slane %v3367_v63, 3 }
  0x48   : > { %v699_v16 = vsel %vm5071_vm2, %v697_v11, %v698_v6  ;;  %v1040_v11 = vrot.slane %v3370_v0, 2 }
  0x49   : > { %613 = vrot.lane.b32.xlu1 %v604_v10, %s3032_s13  ;;  %611 = vrot.lane.b32.xlu0 %v602_v19, %s3032_s13  ;;  %v700_v10 = vrot.slane %v3376_v3, 1  ;;  %v577_v19 = vrot.slane %v3329_v52, 2 }
  0x4b   : > { %v3401_v20 = vsel %vm5074_vm1, %v575_v18, %v577_v19  ;;  %v701_v2 = vsel %vm5071_vm2, %v698_v6, %v700_v10  ;;  %v1043_v6 = vrot.slane %v3392_v21, 2  ;;  %v762_v19 = vrot.slane %v3348_v62, 3 }
  0x4d   : > { %925 = vrot.lane.b32.xlu1 %v916_v30, %s3025_s20  ;;  %923 = vrot.lane.b32.xlu0 %v914_v31, %s3025_s20  ;;  %v1012_v30 = vrot.slane %v3392_v21, 1  ;;  %v1009_v31 = vrot.slane %v3370_v0, 1 }
  0x51   : > { %387 = vrot.lane.b32.xlu1 %v378_v37, %s3026_s21  ;;  %385 = vrot.lane.b32.xlu0 %v376_v12, %s3026_s21  ;;  %v1013_v37 = vsel %vm5071_vm2, %v1010_v25, %v1012_v30  ;;  %v1011_v12 = vsel %vm5071_vm2, %v1009_v31, %v1010_v25  ;;  %v765_v25 = vsel %vm5073_vm3, %v762_v19, %v764_v22 }
  0x55   : > { %645 = vrot.lane.b32.xlu1 %v636_v41, %s3033_s17  ;;  %643 = vrot.lane.b32.xlu0 %v634_v45, %s3033_s17  ;;  %v3431_v41 = vsel %vm5073_vm3, %v607_v32, %v609_v39  ;;  %v730_v45 = vrot.slane %v3348_v62, 2  ;;  %v2951_v39 = vld [vmem:[%s5058_s4 + $0x38] sm:$0xff]  }
  0x57   : > { %v733_v52 = vsel %vm5074_vm1, %v730_v45, %v732_v8 }
  0x59   : > { %956 = vrot.lane.b32.xlu1 %v947_v23, %s3027_s26  ;;  %954 = vrot.lane.b32.xlu0 %v945_v27, %s3027_s26  ;;  %v729_v23 = vrot.slane %v3353_v7, 2  ;;  %v639_v27 = vrot.slane %v3324_v51, 4 }
  0x5b   : > { %v731_v59 = vsel %vm5074_vm1, %v729_v23, %v730_v45  ;;  %v2952_v45 = vld [vmem:[%s5058_s4 + $0x40] sm:$0xff]   ;;  %v794_v23 = vrot.slane %v3348_v62, 4 }
  0x5d   : > { %420 = vrot.lane.b32.xlu1 %v411_v53, %s3025_s20  ;;  %418 = vrot.lane.b32.xlu0 %v409_v56, %s3025_s20  ;;  %v2947_v53 = vld [vmem:[%s5058_s4 + $0x18] sm:$0xff]   ;;  %v3447_v56 = vsel %vm5072_vm4, %v639_v27, %v641_v49  ;;  %v796_v49 = vrot.slane %v3376_v3, 4 }
  0x5e   : > { %1296 = vmatpush1.bf16.msra.mxu0 %v2947_v53  ;;  %v544_v53 = vsel %vm5071_vm2, %v541_v44, %v543_v58  ;;  %v1103_v58 = vrot.slane %v3367_v63, 4 }
  0x5f   : > { %1297 = vmatprep.subr.bf16.mxu0 %v5080_v24 }
  0x61   : > { %677 = vrot.lane.b32.xlu1 %v3348_v62, %s3034_s22  ;;  %675 = vrot.lane.b32.xlu0 %v3353_v7, %s3034_s22  ;;  %v797_v62 = vsel %vm5072_vm4, %v794_v23, %v796_v49 }
  0x65   : > { %990 = vrot.lane.b32.xlu1 %v3367_v63, %s3028_s27  ;;  %988 = vrot.lane.b32.xlu0 %v3370_v0, %s3028_s27 }
  0x69   : > { %453 = vrot.lane.b32.xlu1 %v444_v15, %s3027_s26  ;;  %451 = vrot.lane.b32.xlu0 %v442_v9, %s3027_s26  ;;  %v1042_v15 = vsel %vm5074_vm1, %v1040_v11, %v1041_v1  ;;  %v2949_v9 = vld [vmem:[%s5058_s4 + $0x28] sm:$0xff]   ;;  %v3533_v11 = vld [vmem:[%s3185_s30 + $0x3e] sm:$0xff] }
  0x6d   : > { %710 = vrot.lane.b32.xlu1 %v701_v2, %s3036_s19  ;;  %708 = vrot.lane.b32.xlu0 %v699_v16, %s3036_s19  ;;  %v761_v2 = vrot.slane %v3353_v7, 3  ;;  %v2950_v16 = vld [vmem:[%s5058_s4 + $0x30] sm:$0xff]  }
  0x6f   : > { %v763_v31 = vsel %vm5073_vm3, %v761_v2, %v762_v19  ;;  %v2955_v2 = vld [vmem:[%s5058_s4 + $0x58] sm:$0xff]  }
  0x71   : > { %1022 = vrot.lane.b32.xlu1 %v1013_v37, %s3029_s10  ;;  %1020 = vrot.lane.b32.xlu0 %v1011_v12, %s3029_s10  ;;  %v1074_v37 = vrot.slane %v3392_v21, 3  ;;  %v1071_v12 = vrot.slane %v3370_v0, 3 }
  0x73   : > { %v1073_v40 = vsel %vm5073_vm3, %v1071_v12, %v1072_v36 }
  0x75   : > { %486 = vrot.lane.b32.xlu1 %v3208_v38, %s3028_s27  ;;  %484 = vrot.lane.b32.xlu0 %v3194_v34, %s3028_s27  ;;  %v2948_v38 = vld [vmem:[%s5058_s4 + $0x20] sm:$0xff]   ;;  %v1044_v34 = vsel %vm5074_vm1, %v1041_v1, %v1043_v6  ;;  %v1102_v1 = vrot.slane %v3370_v0, 4 }
  0x76   : > { %1298 = vmatpush1.bf16.msra.mxu0 %v2948_v38  ;;  %v3536_v38 = vld [vmem:[%s3185_s30 + $0x46] sm:$0xff] }
  0x77   : > { %1299 = vmatprep.subr.bf16.mxu0 %v5080_v24  ;;  %v1104_v0 = vsel %vm5072_vm4, %v1102_v1, %v1103_v58 }
  0x79   : > { %742 = vrot.lane.b32.xlu1 %v733_v52, %s3037_s24  ;;  %740 = vrot.lane.b32.xlu0 %v731_v59, %s3037_s24  ;;  %v793_v52 = vrot.slane %v3353_v7, 4  ;;  %v2953_v59 = vld [vmem:[%s5058_s4 + $0x48] sm:$0xff]   ;;  %v1105_v7 = vrot.slane %v3392_v21, 4 }
  0x7a   : > { %1300 = vmatpush1.bf16.msra.mxu0 %v2949_v9 }
  0x7b   : > { %1301 = vmatprep.subr.bf16.mxu0 %v5080_v24  ;;  %v795_v44 = vsel %vm5072_vm4, %v793_v52, %v794_v23  ;;  %v1106_v63 = vsel %vm5072_vm4, %v1103_v58, %v1105_v7 }
  0x7d   : > { %1053 = vrot.lane.b32.xlu1 %v1044_v34, %s3030_s11  ;;  %1051 = vrot.lane.b32.xlu0 %v1042_v15, %s3030_s11  ;;  %v865_v34 = vrot.slane %v3533_v11, 1  ;;  %v867_v15 = vrot.slane %v3536_v38, 1 }
  0x7e   : > { %1302 = vmatpush1.bf16.msra.mxu0 %v2950_v16  ;;  %v2956_v16 = vld [vmem:[%s5058_s4 + $0x60] ss:$0 sps:$4 sm:$0xff]  }
  0x7f   : > { %1303 = vmatprep.subr.bf16.mxu0 %v5080_v24  ;;  %v868_v9 = vsel %vm5071_vm2, %v865_v34, %v867_v15  ;;  %v866_v19 = vsel %vm5071_vm2, %v863_v13, %v865_v34  ;;  %v576_v13 = vsel %vm5074_vm1, %v573_v47, %v575_v18 }
  0x80   : > { %879 = vst.msk [vmem:[#allocation3 + $0x38] sm:$0xff] %vm5069_vm0, %v868_v9  ;;  %878 = vst.msk [vmem:[#allocation3 + $0x28] sm:$0xff] %vm5069_vm0, %v866_v19 }
  0x81   : > { %520 = vrot.lane.b32.xlu1 %v3197_v35, %s3029_s10  ;;  %518 = vrot.lane.b32.xlu0 %v3172_v26, %s3029_s10  ;;  %v1075_v26 = vsel %vm5073_vm3, %v1072_v36, %v1074_v37  ;;  %v888_v36 = vrot.slane %v3536_v38, 2 }
  0x82   : > { %1304 = vmatpush1.bf16.msra.mxu0 %v2951_v39 }
  0x83   : > { %1305 = vmatprep.subr.bf16.mxu0 %v5080_v24 }
  0x85   : > { %774 = vrot.lane.b32.xlu1 %v765_v25, %s3038_s29  ;;  %772 = vrot.lane.b32.xlu0 %v763_v31, %s3038_s29  ;;  %v1287_v25 = vsel %vm5072_vm4, %v2956_v16, 0  ;;  %v886_v31 = vrot.slane %v3533_v11, 2 }
  0x86   : > { %1306 = vmatpush1.bf16.msra.mxu0 %v2952_v45 }
  0x87   : > { %1307 = vmatprep.subr.bf16.mxu0 %v5080_v24  ;;  %v887_v12 = vsel %vm5074_vm1, %v884_v50, %v886_v31  ;;  %v919_v50 = vrot.slane %v3536_v38, 3 }
  0x89   : > { %1084 = vrot.lane.b32.xlu1 %v1075_v26, %s3031_s12  ;;  %1082 = vrot.lane.b32.xlu0 %v1073_v40, %s3031_s12 }
  0x8a   : > { %1308 = vmatpush1.bf16.msra.mxu0 %v2953_v59 }
  0x8b   : > { %1309 = vmatprep.subr.bf16.mxu0 %v5080_v24 }
  0x8d   : > { %553 = vrot.lane.b32.xlu1 %v544_v53, %s3030_s11  ;;  %551 = vrot.lane.b32.xlu0 %v3224_v46, %s3030_s11  ;;  %v2954_v46 = vld [vmem:[%s5058_s4 + $0x50] sm:$0xff]  }
  0x8e   : > { %1310 = vmatpush1.bf16.msra.mxu0 %v2954_v46 }
  0x8f   : > { %1311 = vmatprep.subr.bf16.mxu0 %v5080_v24 }
  0x91   : > { %806 = vrot.lane.b32.xlu1 %v797_v62, %s5067_s18  ;;  %804 = vrot.lane.b32.xlu0 %v795_v44, %s5067_s18  ;;  %s3040_s18 = smov 120   ;;  %v640_v62 = vsel %vm5072_vm4, %v637_v60, %v639_v27  ;;  %v950_v44 = vrot.slane %v3536_v38, 4 }
  0x92   : > { %1312 = vmatpush1.bf16.msra.mxu0 %v2955_v2 }
  0x93   : > { %1313 = vmatprep.subr.bf16.mxu0 %v5080_v24 }
  0x95   : > { %1115 = vrot.lane.b32.xlu1 %v1106_v63, %s3032_s13  ;;  %1113 = vrot.lane.b32.xlu0 %v1104_v0, %s3032_s13  ;;  %v3663_v0 = vld [vmem:[%s5055_s1 + $0x46] sm:$0xff] }
  0x96   : > { %1314 = vmatpush1.bf16.msra.mxu0 %v1287_v25  ;;  %v704_v2 = vrot.slane %v3663_v0, 1  ;;  %v3677_v25 = vld [vmem:[%s3360_s16 + $0x46] sm:$0xff] }
  0x99   : > { %585 = vrot.lane.b32.xlu1 %v576_v13, %s3031_s12  ;;  %583 = vrot.lane.b32.xlu0 %v3238_v54, %s3031_s12  ;;  %v889_v54 = vsel %vm5074_vm1, %v886_v31, %v888_v36 }
  0x9b   : > { %v415_v47 = vpop.permute.xlu1 %414  ;;  %v382_v18 = vpop.permute.xlu0 %381 }
  0x9c   : > { %397 = vst.msk [vmem:[#allocation3] sm:$0xff] %vm396_vm5, %v382_v18 }
  0x9d   : > { %840 = vrot.lane.b32.xlu1 %v3191_v33, %s3040_s18  ;;  %838 = vrot.lane.b32.xlu0 %v3217_v43, %s3040_s18  ;;  %430 = vst.msk [vmem:[#allocation3] sm:$0xff] %vm429_vm6, %v415_v47  ;;  %v608_v33 = vsel %vm5073_vm3, %v605_v55, %v607_v32  ;;  %v917_v43 = vrot.slane %v3533_v11, 3  ;;  %v1016_v47 = vrot.slane %v3677_v25, 1 }
  0x9f   : > { %v417_v39 = vpop.permute.xlu1 %416  ;;  %v384_v26 = vpop.permute.xlu0 %383  ;;  %v920_v55 = vsel %vm5073_vm3, %v917_v43, %v919_v50  ;;  %v918_v32 = vsel %vm5073_vm3, %v915_v14, %v917_v43 }
  0xa0   : > { %398 = vst.msk [vmem:[#allocation3 + $0x10] sm:$0xff] %vm396_vm5, %v384_v26 }
  0xa1   : > { %898 = vrot.lane.b32.xlu1 %v889_v54, %s3026_s21  ;;  %896 = vrot.lane.b32.xlu0 %v887_v12, %s3026_s21  ;;  %431 = vst.msk [vmem:[#allocation3 + $0x10] sm:$0xff] %vm429_vm6, %v417_v39  ;;  %v736_v12 = vrot.slane %v3663_v0, 2 }
  0xa3   : > { %v450_v40 = vpop.permute.xlu1 %449  ;;  %v448_v45 = vpop.permute.xlu0 %447 }
  0xa4   : > { %464 = vst.msk [vmem:[#allocation3 + $0x10] sm:$0xff] %vm462_vm7, %v450_v40  ;;  %463 = vst.msk [vmem:[#allocation3] sm:$0xff] %vm462_vm7, %v448_v45  ;;  %v1047_v45 = vrot.slane %v3677_v25, 2 }
  0xa5   : > { %617 = vrot.lane.b32.xlu1 %v608_v33, %s3032_s13  ;;  %615 = vrot.lane.b32.xlu0 %v3245_v57, %s3032_s13  ;;  %v948_v57 = vrot.slane %v3533_v11, 4 }
  0xa7   : > { %v483_v23 = vpop.permute.xlu1 %482  ;;  %v481_v53 = vpop.permute.xlu0 %480  ;;  %v949_v14 = vsel %vm5072_vm4, %v946_v48, %v948_v57  ;;  %v951_v35 = vsel %vm5072_vm4, %v948_v57, %v950_v44 }
  0xa8   : > { %497 = vst.msk [vmem:[#allocation3 + $0x10] sm:$0xff] %vm495_vm8, %v483_v23  ;;  %496 = vst.msk [vmem:[#allocation3] sm:$0xff] %vm495_vm8, %v481_v53 }
  0xa9   : > { %929 = vrot.lane.b32.xlu1 %v920_v55, %s3025_s20  ;;  %927 = vrot.lane.b32.xlu0 %v918_v32, %s3025_s20 }
  0xab   : > { %v517_v52 = vpop.permute.xlu1 %516  ;;  %v515_v59 = vpop.permute.xlu0 %514 }
  0xac   : > { %531 = vst.msk [vmem:[#allocation3 + $0x10] sm:$0xff] %vm529_vm9, %v517_v52  ;;  %530 = vst.msk [vmem:[#allocation3] sm:$0xff] %vm529_vm9, %v515_v59 }
  0xad   : > { %647 = vrot.lane.b32.xlu1 %v3262_v4, %s3033_s17  ;;  %389 = vrot.lane.b32.xlu0 %v3265_v5, %s3026_s21  ;;  %v3648_v5 = vld [vmem:[%s5055_s1 + $0x3e] sm:$0xff] }
  0xae   : > { %v702_v46 = vrot.slane %v3648_v5, 1  ;;  %v766_v23 = vrot.slane %v3648_v5, 3 }
  0xaf   : > { %v550_v58 = vpop.permute.xlu1 %549  ;;  %v548_v1 = vpop.permute.xlu0 %547 }
  0xb0   : > { %564 = vst.msk [vmem:[#allocation3 + $0x10] sm:$0xff] %vm562_vm10, %v550_v58  ;;  %563 = vst.msk [vmem:[#allocation3] sm:$0xff] %vm562_vm10, %v548_v1  ;;  %v703_v9 = vsel %vm5071_vm2, %v700_v10, %v702_v46  ;;  %v705_v31 = vsel %vm5071_vm2, %v702_v46, %v704_v2  ;;  %v767_v52 = vsel %vm5073_vm3, %v764_v22, %v766_v23  ;;  %v1078_v1 = vrot.slane %v3677_v25, 3 }
  0xb1   : > { %958 = vrot.lane.b32.xlu1 %v949_v14, %s3027_s26  ;;  %649 = vrot.lane.b32.xlu0 %v640_v62, %s3033_s17 }
  0xb3   : > { %v582_v4 = vpop.permute.xlu1 %581  ;;  %v580_v60 = vpop.permute.xlu0 %579 }
  0xb4   : > { %596 = vst.msk [vmem:[#allocation3 + $0x10] sm:$0xff] %vm594_vm11, %v582_v4  ;;  %595 = vst.msk [vmem:[#allocation3] sm:$0xff] %vm594_vm11, %v580_v60  ;;  %v800_v60 = vrot.slane %v3663_v0, 4 }
  0xb5   : > { %422 = vrot.lane.b32.xlu1 %v3275_v17, %s3025_s20  ;;  %960 = vrot.lane.b32.xlu0 %v951_v35, %s3027_s26  ;;  %v3657_v17 = vld [vmem:[%s3360_s16 + $0x3e] sm:$0xff] }
  0xb6   : > { %v1014_v19 = vrot.slane %v3657_v17, 1  ;;  %v1045_v40 = vrot.slane %v3657_v17, 2  ;;  %v1076_v59 = vrot.slane %v3657_v17, 3 }
  0xb7   : > { %v895_v48 = vpop.permute.xlu1 %894  ;;  %v893_v27 = vpop.permute.xlu0 %892 }
  0xb8   : > { %908 = vst.msk [vmem:[#allocation3 + $0x18] sm:$0xff] %vm396_vm5, %v895_v48  ;;  %907 = vst.msk [vmem:[#allocation3 + $0x8] sm:$0xff] %vm396_vm5, %v893_v27  ;;  %v1015_v10 = vsel %vm5071_vm2, %v1012_v30, %v1014_v19  ;;  %v734_v30 = vrot.slane %v3648_v5, 2  ;;  %v1077_v58 = vsel %vm5073_vm3, %v1074_v37, %v1076_v59  ;;  %v798_v37 = vrot.slane %v3648_v5, 4 }
  0xb9   : > { %681 = vrot.lane.b32.xlu1 %v3648_v5, %s3034_s22  ;;  %679 = vrot.lane.b32.xlu0 %v3376_v3, %s3034_s22 }
  0xba   : > { %v737_v33 = vsel %vm5074_vm1, %v734_v30, %v736_v12  ;;  %v735_v43 = vsel %vm5074_vm1, %v732_v8, %v734_v30  ;;  %v1046_v8 = vsel %vm5074_vm1, %v1043_v6, %v1045_v40  ;;  %v768_v6 = vrot.slane %v3663_v0, 3 }
  0xbb   : > { %v614_v34 = vpop.permute.xlu1 %613  ;;  %v612_v63 = vpop.permute.xlu0 %611  ;;  %v801_v46 = vsel %vm5072_vm4, %v798_v37, %v800_v60  ;;  %v799_v5 = vsel %vm5072_vm4, %v796_v49, %v798_v37 }
  0xbc   : > { %628 = vst.msk [vmem:[#allocation3 + $0x10] sm:$0xff] %vm626_vm12, %v614_v34  ;;  %627 = vst.msk [vmem:[#allocation3] sm:$0xff] %vm626_vm12, %v612_v63  ;;  %v769_v22 = vsel %vm5073_vm3, %v766_v23, %v768_v6  ;;  %v1107_v34 = vrot.slane %v3657_v17, 4  ;;  %v1109_v63 = vrot.slane %v3677_v25, 4 }
  0xbd   : > { %994 = vrot.lane.b32.xlu1 %v3657_v17, %s3028_s27  ;;  %992 = vrot.lane.b32.xlu0 %v3392_v21, %s3028_s27 }
  0xbe   : > { %v1110_v3 = vsel %vm5072_vm4, %v1107_v34, %v1109_v63  ;;  %v1108_v49 = vsel %vm5072_vm4, %v1105_v7, %v1107_v34 }
  0xbf   : > { %v926_v13 = vpop.permute.xlu1 %925  ;;  %v924_v16 = vpop.permute.xlu0 %923 }
  0xc0   : > { %939 = vst.msk [vmem:[#allocation3 + $0x18] sm:$0xff] %vm429_vm6, %v926_v13  ;;  %938 = vst.msk [vmem:[#allocation3 + $0x8] sm:$0xff] %vm429_vm6, %v924_v16 }
  0xc1   : > { %712 = vrot.lane.b32.xlu1 %v703_v9, %s3036_s19  ;;  %455 = vrot.lane.b32.xlu0 %v3287_v28, %s3027_s26  ;;  %v1017_v28 = vsel %vm5071_vm2, %v1014_v19, %v1016_v47  ;;  %v2805_v9 = vld [vmem:[%s3185_s30 + $0x4e] sm:$0xf]  ;;  %s5121_s30 = smul.u32 4294967294, %s3107_s15 }
  0xc2   : > { %v869_v16 = vrot.slane %v2805_v9, 1  ;;  %v921_v7 = vrot.slane %v2805_v9, 3 }
  0xc3   : > { %v388_v18 = vpop.permute.xlu1 %387  ;;  %v386_v54 = vpop.permute.xlu0 %385 }
  0xc4   : > { %400 = vst.msk [vmem:[#allocation3 + $0x30] sm:$0xff] %vm396_vm5, %v388_v18  ;;  %399 = vst.msk [vmem:[#allocation3 + $0x20] sm:$0xff] %vm396_vm5, %v386_v54 }
  0xc5   : > { %1024 = vrot.lane.b32.xlu1 %v1015_v10, %s3029_s10  ;;  %714 = vrot.lane.b32.xlu0 %v705_v31, %s3036_s19 }
  0xc7   : > { %v646_v39 = vpop.permute.xlu1 %645  ;;  %v644_v26 = vpop.permute.xlu0 %643 }
  0xc8   : > { %660 = vst.msk [vmem:[#allocation3 + $0x10] sm:$0xff] %vm658_vm13, %v646_v39  ;;  %659 = vst.msk [vmem:[#allocation3] sm:$0xff] %vm658_vm13, %v644_v26 }
  0xc9   : > { %488 = vrot.lane.b32.xlu1 %v3294_v29, %s3028_s27  ;;  %1026 = vrot.lane.b32.xlu0 %v1017_v28, %s3029_s10  ;;  %v1048_v29 = vsel %vm5074_vm1, %v1045_v40, %v1047_v45 }
  0xcb   : > { %v957_v55 = vpop.permute.xlu1 %956  ;;  %v955_v32 = vpop.permute.xlu0 %954 }
  0xcc   : > { %970 = vst.msk [vmem:[#allocation3 + $0x18] sm:$0xff] %vm462_vm7, %v957_v55  ;;  %969 = vst.msk [vmem:[#allocation3 + $0x8] sm:$0xff] %vm462_vm7, %v955_v32 }
  0xcd   : > { %746 = vrot.lane.b32.xlu1 %v737_v33, %s3037_s24  ;;  %744 = vrot.lane.b32.xlu0 %v735_v43, %s3037_s24  ;;  %v2812_v33 = vld [vmem:[%s3360_s16 + $0x4e] sm:$0xf]  ;;  %s2914_s16 = smul.u32 80, %s5282_s0 }
  0xce   : > { %v1018_v43 = vrot.slane %v2812_v33, 1 }
  0xcf   : > { %v421_v53 = vpop.permute.xlu1 %420  ;;  %v419_v57 = vpop.permute.xlu0 %418 }
  0xd0   : > { %433 = vst.msk [vmem:[#allocation3 + $0x30] sm:$0xff] %vm429_vm6, %v421_v53  ;;  %432 = vst.msk [vmem:[#allocation3 + $0x20] sm:$0xff] %vm429_vm6, %v419_v57  ;;  %v1019_v55 = vsel %vm5071_vm2, %v1016_v47, %v1018_v43  ;;  %v1080_v57 = vrot.slane %v2812_v33, 3 }
  0xd1   : > { %1057 = vrot.lane.b32.xlu1 %v1048_v29, %s3030_s11  ;;  %1055 = vrot.lane.b32.xlu0 %v1046_v8, %s3030_s11  ;;  %v1049_v29 = vrot.slane %v2812_v33, 2 }
  0xd3   : > { %v678_v14 = vpop.permute.xlu1 %677  ;;  %v676_v62 = vpop.permute.xlu0 %675  ;;  %v1050_v47 = vsel %vm5074_vm1, %v1047_v45, %v1049_v29  ;;  %v1081_v45 = vsel %vm5073_vm3, %v1078_v1, %v1080_v57 }
  0xd4   : > { %692 = vst.msk [vmem:[#allocation3 + $0x10] sm:$0xff] %vm5075_vm14, %v678_v14  ;;  %691 = vst.msk [vmem:[#allocation3] sm:$0xff] %vm5075_vm14, %v676_v62  ;;  %v1111_v62 = vrot.slane %v2812_v33, 4 }
  0xd5   : > { %776 = vrot.lane.b32.xlu1 %v767_v52, %s3038_s29  ;;  %522 = vrot.lane.b32.xlu0 %v3324_v51, %s3029_s10  ;;  %v1079_v51 = vsel %vm5073_vm3, %v1076_v59, %v1078_v1 }
  0xd6   : > { %v1112_v1 = vsel %vm5072_vm4, %v1109_v63, %v1111_v62 }
  0xd7   : > { %v991_v35 = vpop.permute.xlu1 %990  ;;  %v989_v4 = vpop.permute.xlu0 %988 }
  0xd8   : > { %1004 = vst.msk [vmem:[#allocation3 + $0x18] sm:$0xff] %vm495_vm8, %v991_v35  ;;  %1003 = vst.msk [vmem:[#allocation3 + $0x8] sm:$0xff] %vm495_vm8, %v989_v4 }
  0xd9   : > { %1086 = vrot.lane.b32.xlu1 %v1077_v58, %s3031_s12  ;;  %778 = vrot.lane.b32.xlu0 %v769_v22, %s3038_s29 }
  0xdb   : > { %v454_v48 = vpop.permute.xlu1 %453  ;;  %v452_v27 = vpop.permute.xlu0 %451 }
  0xdc   : > { %466 = vst.msk [vmem:[#allocation3 + $0x30] sm:$0xff] %vm462_vm7, %v454_v48  ;;  %465 = vst.msk [vmem:[#allocation3 + $0x20] sm:$0xff] %vm462_vm7, %v452_v27 }
  0xdd   : > { %555 = vrot.lane.b32.xlu1 %v3341_v61, %s3030_s11  ;;  %1088 = vrot.lane.b32.xlu0 %v1079_v51, %s3031_s12  ;;  %v870_v61 = vsel %vm5071_vm2, %v867_v15, %v869_v16  ;;  %v890_v15 = vrot.slane %v2805_v9, 2 }
  0xde   : > { %880 = vst.msk [vmem:[#allocation3 + $0x48] sm:$0xff] %vm5069_vm0, %v870_v61  ;;  %vm5070_vm0 = vcmask 851712  }
  0xdf   : > { %v711_v19 = vpop.permute.xlu1 %710  ;;  %v709_v13 = vpop.permute.xlu0 %708  ;;  %v891_v21 = vsel %vm5074_vm1, %v888_v36, %v890_v15 }
  0xe0   : > { %725 = vst.msk [vmem:[#allocation3 + $0x10] sm:$0xff] %vm723_vm15, %v711_v19  ;;  %724 = vst.msk [vmem:[#allocation3] sm:$0xff] %vm723_vm15, %v709_v13 }
  0xe1   : > { %810 = vrot.lane.b32.xlu1 %v801_v46, %s5097_s28  ;;  %808 = vrot.lane.b32.xlu0 %v799_v5, %s5097_s28 }
  0xe3   : > { %v1023_v17 = vpop.permute.xlu1 %1022  ;;  %v1021_v10 = vpop.permute.xlu0 %1020 }
  0xe4   : > { %1036 = vst.msk [vmem:[#allocation3 + $0x18] sm:$0xff] %vm529_vm9, %v1023_v17  ;;  %1035 = vst.msk [vmem:[#allocation3 + $0x8] sm:$0xff] %vm529_vm9, %v1021_v10 }
  0xe5   : > { %1119 = vrot.lane.b32.xlu1 %v1110_v3, %s3032_s13  ;;  %1117 = vrot.lane.b32.xlu0 %v1108_v49, %s3032_s13 }
  0xe7   : > { %v487_v31 = vpop.permute.xlu1 %486  ;;  %v485_v18 = vpop.permute.xlu0 %484 }
  0xe8   : > { %499 = vst.msk [vmem:[#allocation3 + $0x30] sm:$0xff] %vm495_vm8, %v487_v31  ;;  %498 = vst.msk [vmem:[#allocation3 + $0x20] sm:$0xff] %vm495_vm8, %v485_v18 }
  0xe9   : > { %587 = vrot.lane.b32.xlu0 %v3401_v20, %s3031_s12  ;;  %842 = vrot.lane.b32.xlu1 %v3214_v42, %s3040_s18  ;;  %v922_v42 = vsel %vm5073_vm3, %v919_v50, %v921_v7  ;;  %v952_v20 = vrot.slane %v2805_v9, 4  ;;  %v669_v50 = vld [vmem:[%s5055_s1 + $0x4e] sm:$0xf] }
  0xea   : > { %v738_v32 = vrot.slane %v669_v50, 2  ;;  %v770_v53 = vrot.slane %v669_v50, 3  ;;  %v802_v14 = vrot.slane %v669_v50, 4 }
  0xeb   : > { %v743_v54 = vpop.permute.xlu1 %742  ;;  %v741_v28 = vpop.permute.xlu0 %740 }
  0xec   : > { %757 = vst.msk [vmem:[#allocation3 + $0x10] sm:$0xff] %vm5070_vm0, %v743_v54  ;;  %756 = vst.msk [vmem:[#allocation3] sm:$0xff] %vm5070_vm0, %v741_v28  ;;  %vm787_vm0 = vcmask 917312  }
  0xed   : > { %844 = vrot.lane.b32.xlu0 %v3533_v11, %s3040_s18  ;;  %900 = vrot.lane.b32.xlu1 %v891_v21, %s3026_s21  ;;  %v953_v11 = vsel %vm5072_vm4, %v950_v44, %v952_v20  ;;  %s4098_s21 = scalar_lea.vmem [#allocation2], %s5120_s25 }
  0xef   : > { %v1054_v30 = vpop.permute.xlu1 %1053  ;;  %v1052_v36 = vpop.permute.xlu0 %1051 }
  0xf0   : > { %1067 = vst.msk [vmem:[#allocation3 + $0x18] sm:$0xff] %vm562_vm10, %v1054_v30  ;;  %1066 = vst.msk [vmem:[#allocation3 + $0x8] sm:$0xff] %vm562_vm10, %v1052_v36 }
  0xf1   : > { %619 = vrot.lane.b32.xlu0 %v3431_v41, %s3032_s13  ;;  %931 = vrot.lane.b32.xlu1 %v922_v42, %s3025_s20  ;;  %v706_v41 = vrot.slane %v669_v50, 1 }
  0xf3   : > { %v521_v39 = vpop.permute.xlu1 %520  ;;  %v519_v26 = vpop.permute.xlu0 %518 }
  0xf4   : > { %533 = vst.msk [vmem:[#allocation3 + $0x30] sm:$0xff] %vm529_vm9, %v521_v39  ;;  %532 = vst.msk [vmem:[#allocation3 + $0x20] sm:$0xff] %vm529_vm9, %v519_v26 }
  0xf5   : > { %651 = vrot.lane.b32.xlu0 %v3447_v56, %s3033_s17  ;;  %962 = vrot.lane.b32.xlu1 %v953_v11, %s3027_s26  ;;  %v707_v56 = vsel %vm5071_vm2, %v704_v2, %v706_v41  ;;  %v739_v2 = vsel %vm5074_vm1, %v736_v12, %v738_v32  ;;  %vm819_vm2 = vcmask 982912   ;;  %v771_v12 = vsel %vm5073_vm3, %v768_v6, %v770_v53 }
  0xf6   : > { %v803_v6 = vsel %vm5072_vm4, %v800_v60, %v802_v14  ;;  %vm853_vm4 = vcmask 1048512   ;;  %vm1276_vm3 = vcmask 588800   ;;  %vm5098_vm1 = vcmask 851712  }
  0xf7   : > { %v775_v44 = vpop.permute.xlu1 %774  ;;  %v773_v40 = vpop.permute.xlu0 %772 }
  0xf8   : > { %789 = vst.msk [vmem:[#allocation3 + $0x10] sm:$0xff] %vm787_vm0, %v775_v44  ;;  %788 = vst.msk [vmem:[#allocation3] sm:$0xff] %vm787_vm0, %v773_v40 }
  0xf9   : > { %683 = vrot.lane.b32.xlu0 %v3663_v0, %s3034_s22  ;;  %996 = vrot.lane.b32.xlu1 %v3677_v25, %s3028_s27 }
  0xfb   : > { %v1085_v8 = vpop.permute.xlu1 %1084  ;;  %v1083_v23 = vpop.permute.xlu0 %1082 }
  0xfc   : > { %1098 = vst.msk [vmem:[#allocation3 + $0x18] sm:$0xff] %vm594_vm11, %v1085_v8  ;;  %1097 = vst.msk [vmem:[#allocation3 + $0x8] sm:$0xff] %vm594_vm11, %v1083_v23 }
  0xfd   : > { %716 = vrot.lane.b32.xlu0 %v707_v56, %s3036_s19  ;;  %1028 = vrot.lane.b32.xlu1 %v1019_v55, %s3029_s10 }
  0xff   : > { %v554_v52 = vpop.permute.xlu1 %553  ;;  %v552_v59 = vpop.permute.xlu0 %551 }
 0x100   : > { %566 = vst.msk [vmem:[#allocation3 + $0x30] sm:$0xff] %vm562_vm10, %v554_v52  ;;  %565 = vst.msk [vmem:[#allocation3 + $0x20] sm:$0xff] %vm562_vm10, %v552_v59 }
 0x101   : > { %748 = vrot.lane.b32.xlu0 %v739_v2, %s3037_s24  ;;  %1059 = vrot.lane.b32.xlu1 %v1050_v47, %s3030_s11 }
 0x103   : > { %v807_v58 = vpop.permute.xlu1 %806  ;;  %v805_v22 = vpop.permute.xlu0 %804 }
 0x104   : > { %821 = vst.msk [vmem:[#allocation3 + $0x10] sm:$0xff] %vm819_vm2, %v807_v58  ;;  %820 = vst.msk [vmem:[#allocation3] sm:$0xff] %vm819_vm2, %v805_v22 }
 0x105   : > { %780 = vrot.lane.b32.xlu0 %v771_v12, %s3038_s29  ;;  %1090 = vrot.lane.b32.xlu1 %v1081_v45, %s3031_s12  ;;  %s3874_s12 = scalar_lea.vmem %s5056_s2, %s2914_s16  ;;  %s5119_s29 = ssub.s32 38, %s3107_s15 }
 0x106   : > { %v1144_v51 = vld [vmem:[%s3874_s12 + $0x8] sm:$0xff]  ;;  %v1146_v37 = vld [vmem:[%s3874_s12 + $0x18] sm:$0xff]  ;;  %v1145_v13 = vld [vmem:[%s3874_s12 + $0x10] sm:$0xff]  ;;  %s4125_s16 = scalar_lea.vmem [#allocation2], %s5121_s30 }
 0x107   : > { %v1116_v35 = vpop.permute.xlu1 %1115  ;;  %v1114_v4 = vpop.permute.xlu0 %1113  ;;  %v1148_v62 = vld [vmem:[%s3874_s12 + $0x28] sm:$0xff]  ;;  %v1150_v58 = vld [vmem:[%s3874_s12 + $0x38] sm:$0xff] }
 0x108   : > { %1129 = vst.msk [vmem:[#allocation3 + $0x18] sm:$0xff] %vm626_vm12, %v1116_v35  ;;  %1128 = vst.msk [vmem:[#allocation3 + $0x8] sm:$0xff] %vm626_vm12, %v1114_v4 }
 0x109   : > { %812 = vrot.lane.b32.xlu0 %v803_v6, %s5097_s28  ;;  %1121 = vrot.lane.b32.xlu1 %v1112_v1, %s3032_s13 }
 0x10b   : > { %v586_v0 = vpop.permute.xlu1 %585  ;;  %v584_v25 = vpop.permute.xlu0 %583 }
 0x10c   : > { %598 = vst.msk [vmem:[#allocation3 + $0x30] sm:$0xff] %vm594_vm11, %v586_v0  ;;  %597 = vst.msk [vmem:[#allocation3 + $0x20] sm:$0xff] %vm594_vm11, %v584_v25 }
 0x10d   : > { %846 = vrot.lane.b32.xlu0 %v3536_v38, %s3040_s18  ;;  %v1143_v38 = vld [vmem:[%s3874_s12] sm:$0xff]  ;;  %s4075_s18 = scalar_lea.vmem [#allocation2], %s5119_s29 }
 0x10f   : > { %v841_v60 = vpop.permute.xlu1 %840  ;;  %v839_v48 = vpop.permute.xlu0 %838  ;;  %v1134_v27 = vld [vmem:[#allocation3 + $0x8] sm:$0xff]  ;;  %v1136_v46 = vld [vmem:[#allocation3 + $0x18] sm:$0xff] }
 0x110   : > { %855 = vst.msk [vmem:[#allocation3 + $0x10] sm:$0xff] %vm853_vm4, %v841_v60  ;;  %854 = vst.msk [vmem:[#allocation3] sm:$0xff] %vm853_vm4, %v839_v48  ;;  %v1154_v5 = vmul.f32 %v1144_v51, %v1134_v27  ;;  %v1156_v34 = vmul.f32 %v1146_v37, %v1136_v46  ;;  %v1147_v48 = vld [vmem:[%s3874_s12 + $0x20] sm:$0xff]  ;;  %v1149_v27 = vld [vmem:[%s3874_s12 + $0x30] sm:$0xff] }
 0x112   : > { %v1164_v63 = vpack.c.bf16 %v1156_v34, %v1154_v5 }
 0x113   : > { %v899_v9 = vpop.permute.xlu1 %898  ;;  %v897_v19 = vpop.permute.xlu0 %896 }
 0x114   : > { %910 = vst.msk [vmem:[#allocation3 + $0x38] sm:$0xff] %vm396_vm5, %v899_v9  ;;  %909 = vst.msk [vmem:[#allocation3 + $0x28] sm:$0xff] %vm396_vm5, %v897_v19  ;;  %2827 = vmatprep.mubr.msk.bf16.mxu0 %vm1276_vm3, %v1164_v63 }
 0x117   : > { %v618_v16 = vpop.permute.xlu1 %617  ;;  %v616_v61 = vpop.permute.xlu0 %615  ;;  %v1133_v3 = vld [vmem:[#allocation3] sm:$0xff]  ;;  %v1135_v49 = vld [vmem:[#allocation3 + $0x10] sm:$0xff] }
 0x118   : > { %630 = vst.msk [vmem:[#allocation3 + $0x30] sm:$0xff] %vm626_vm12, %v618_v16  ;;  %629 = vst.msk [vmem:[#allocation3 + $0x20] sm:$0xff] %vm626_vm12, %v616_v61  ;;  %v1153_v17 = vmul.f32 %v1143_v38, %v1133_v3  ;;  %v1155_v10 = vmul.f32 %v1145_v13, %v1135_v49 }
 0x11a   : > { %v1163_v15 = vpack.c.bf16 %v1155_v10, %v1153_v17 }
 0x11b   : > { %v930_v31 = vpop.permute.xlu1 %929  ;;  %v928_v18 = vpop.permute.xlu0 %927 }
 0x11c   : > { %941 = vst.msk [vmem:[#allocation3 + $0x38] sm:$0xff] %vm429_vm6, %v930_v31  ;;  %940 = vst.msk [vmem:[#allocation3 + $0x28] sm:$0xff] %vm429_vm6, %v928_v18  ;;  %1322 = vmatmul.mubr.bf16.vlgmr.msra.gmra.mrb[0].mxu0 %v1163_v15 }
 0x11f   : > { %v648_v21 = vpop.permute.xlu1 %647  ;;  %v390_v7 = vpop.permute.xlu0 %389 }
 0x120   : > { %661 = vst.msk [vmem:[#allocation3 + $0x20] sm:$0xff] %vm658_vm13, %v648_v21  ;;  %v1152_v21 = vld [vmem:[%s3874_s12 + $0x48] sm:$0xff] }
 0x121   : > { %401 = vst.msk [vmem:[#allocation3 + $0x40] sm:$0xff] %vm396_vm5, %v390_v7 }
 0x123   : > { %v959_v54 = vpop.permute.xlu1 %958  ;;  %v650_v28 = vpop.permute.xlu0 %649 }
 0x124   : > { %971 = vst.msk [vmem:[#allocation3 + $0x28] sm:$0xff] %vm462_vm7, %v959_v54 }
 0x125   : > { %662 = vst.msk [vmem:[#allocation3 + $0x30] sm:$0xff] %vm658_vm13, %v650_v28  ;;  %v1151_v28 = vld [vmem:[%s3874_s12 + $0x40] sm:$0xff] }
 0x127   : > { %v423_v42 = vpop.permute.xlu1 %422  ;;  %v961_v20 = vpop.permute.xlu0 %960 }
 0x128   : > { %434 = vst.msk [vmem:[#allocation3 + $0x40] sm:$0xff] %vm429_vm6, %v423_v42 }
 0x129   : > { %972 = vst.msk [vmem:[#allocation3 + $0x38] sm:$0xff] %vm462_vm7, %v961_v20 }
 0x12b   : > { %v682_v30 = vpop.permute.xlu1 %681  ;;  %v680_v36 = vpop.permute.xlu0 %679 }
 0x12c   : > { %694 = vst.msk [vmem:[#allocation3 + $0x30] sm:$0xff] %vm5075_vm14, %v682_v30  ;;  %693 = vst.msk [vmem:[#allocation3 + $0x20] sm:$0xff] %vm5075_vm14, %v680_v36 }
 0x12d   : > { %vm5099_vm14 = vmmov %vm5098_vm1 }
 0x12f   : > { %v995_v11 = vpop.permute.xlu1 %994  ;;  %v993_v39 = vpop.permute.xlu0 %992 }
 0x130   : > { %1006 = vst.msk [vmem:[#allocation3 + $0x38] sm:$0xff] %vm495_vm8, %v995_v11  ;;  %1005 = vst.msk [vmem:[#allocation3 + $0x28] sm:$0xff] %vm495_vm8, %v993_v39  ;;  %v3041_v11 = vmov 0.0   ;;  %v3963_v39 = vld [vmem:[%s5059_s5] ss:$0 sm:$0xff] }
 0x133   : > { %v713_v26 = vpop.permute.xlu1 %712  ;;  %v456_v50 = vpop.permute.xlu0 %455 }
 0x134   : > { %726 = vst.msk [vmem:[#allocation3 + $0x20] sm:$0xff] %vm723_vm15, %v713_v26 }
 0x135   : > { %467 = vst.msk [vmem:[#allocation3 + $0x40] sm:$0xff] %vm462_vm7, %v456_v50 }
 0x137   : > { %v1025_v33 = vpop.permute.xlu1 %1024  ;;  %v715_v41 = vpop.permute.xlu0 %714 }
 0x138   : > { %1037 = vst.msk [vmem:[#allocation3 + $0x28] sm:$0xff] %vm529_vm9, %v1025_v33 }
 0x139   : > { %727 = vst.msk [vmem:[#allocation3 + $0x30] sm:$0xff] %vm723_vm15, %v715_v41 }
 0x13b   : > { %v489_v43 = vpop.permute.xlu1 %488  ;;  %v1027_v44 = vpop.permute.xlu0 %1026 }
 0x13c   : > { %500 = vst.msk [vmem:[#allocation3 + $0x40] sm:$0xff] %vm495_vm8, %v489_v43 }
 0x13d   : > { %1038 = vst.msk [vmem:[#allocation3 + $0x38] sm:$0xff] %vm529_vm9, %v1027_v44 }
 0x13f   : > { %v747_v40 = vpop.permute.xlu1 %746  ;;  %v745_v56 = vpop.permute.xlu0 %744 }
 0x140   : > { %759 = vst.msk [vmem:[#allocation3 + $0x30] sm:$0xff] %vm5098_vm1, %v747_v40  ;;  %vm5100_vm1 = vcmask 720512  }
 0x141   : > { %758 = vst.msk [vmem:[#allocation3 + $0x20] sm:$0xff] %vm5099_vm14, %v745_v56 }
 0x143   : > { %v1058_v55 = vpop.permute.xlu1 %1057  ;;  %v1056_v32 = vpop.permute.xlu0 %1055 }
 0x144   : > { %1069 = vst.msk [vmem:[#allocation3 + $0x38] sm:$0xff] %vm562_vm10, %v1058_v55  ;;  %1068 = vst.msk [vmem:[#allocation3 + $0x28] sm:$0xff] %vm562_vm10, %v1056_v32 }
 0x147   : > { %v777_v29 = vpop.permute.xlu1 %776  ;;  %v523_v8 = vpop.permute.xlu0 %522 }
 0x148   : > { %790 = vst.msk [vmem:[#allocation3 + $0x20] sm:$0xff] %vm787_vm0, %v777_v29 }
 0x149   : > { %534 = vst.msk [vmem:[#allocation3 + $0x40] sm:$0xff] %vm529_vm9, %v523_v8 }
 0x14b   : > { %v1087_v23 = vpop.permute.xlu1 %1086  ;;  %v779_v2 = vpop.permute.xlu0 %778 }
 0x14c   : > { %1099 = vst.msk [vmem:[#allocation3 + $0x28] sm:$0xff] %vm594_vm11, %v1087_v23 }
 0x14d   : > { %791 = vst.msk [vmem:[#allocation3 + $0x30] sm:$0xff] %vm787_vm0, %v779_v2 }
 0x14f   : > { %v556_v47 = vpop.permute.xlu1 %555  ;;  %v1089_v53 = vpop.permute.xlu0 %1088 }
 0x150   : > { %567 = vst.msk [vmem:[#allocation3 + $0x40] sm:$0xff] %vm562_vm10, %v556_v47 }
 0x151   : > { %1100 = vst.msk [vmem:[#allocation3 + $0x38] sm:$0xff] %vm594_vm11, %v1089_v53 }
 0x153   : > { %v811_v57 = vpop.permute.xlu1 %810  ;;  %v809_v52 = vpop.permute.xlu0 %808 }
 0x154   : > { %823 = vst.msk [vmem:[#allocation3 + $0x30] sm:$0xff] %vm819_vm2, %v811_v57  ;;  %822 = vst.msk [vmem:[#allocation3 + $0x20] sm:$0xff] %vm819_vm2, %v809_v52 }
 0x157   : > { %v1120_v59 = vpop.permute.xlu1 %1119  ;;  %v1118_v12 = vpop.permute.xlu0 %1117 }
 0x158   : > { %1131 = vst.msk [vmem:[#allocation3 + $0x38] sm:$0xff] %vm626_vm12, %v1120_v59  ;;  %1130 = vst.msk [vmem:[#allocation3 + $0x28] sm:$0xff] %vm626_vm12, %v1118_v12 }
 0x15b   : > { %v588_v45 = vpop.permute.xlu0 %587  ;;  %v843_v14 = vpop.permute.xlu1 %842 }
 0x15c   : > { %599 = vst.msk [vmem:[#allocation3 + $0x40] sm:$0xff] %vm594_vm11, %v588_v45 }
 0x15d   : > { %856 = vst.msk [vmem:[#allocation3 + $0x20] sm:$0xff] %vm853_vm4, %v843_v14 }
 0x15f   : > { %v845_v22 = vpop.permute.xlu0 %844  ;;  %v901_v6 = vpop.permute.xlu1 %900  ;;  %v1138_v1 = vld [vmem:[#allocation3 + $0x28] sm:$0xff]  ;;  %v1140_v35 = vld [vmem:[#allocation3 + $0x38] sm:$0xff] }
 0x160   : > { %857 = vst.msk [vmem:[#allocation3 + $0x30] sm:$0xff] %vm853_vm4, %v845_v22  ;;  %v1158_v4 = vmul.f32 %v1148_v62, %v1138_v1  ;;  %v1160_v0 = vmul.f32 %v1150_v58, %v1140_v35 }
 0x161   : > { %911 = vst.msk [vmem:[#allocation3 + $0x48] sm:$0xff] %vm396_vm5, %v901_v6  ;;  %vm5101_vm5 = vmmov %vm5099_vm14 }
 0x162   : > { %v1166_v25 = vpack.c.bf16 %v1160_v0, %v1158_v4 }
 0x163   : > { %v620_v51 = vpop.permute.xlu0 %619  ;;  %v932_v37 = vpop.permute.xlu1 %931 }
 0x164   : > { %v1137_v60 = vld [vmem:[#allocation3 + $0x20] sm:$0xff]  ;;  %631 = vst.msk [vmem:[#allocation3 + $0x40] sm:$0xff] %vm626_vm12, %v620_v51  ;;  %2828 = vmatprep.mubr.msk.bf16.mxu0 %vm1276_vm3, %v1166_v25 }
 0x165   : > { %942 = vst.msk [vmem:[#allocation3 + $0x48] sm:$0xff] %vm429_vm6, %v932_v37  ;;  %v1157_v46 = vmul.f32 %v1147_v48, %v1137_v60  ;;  %vm5105_vm6 = vcmask 1045504  }
 0x166   : > { %vm5113_vm14 = vmmov %vm5105_vm6 }
 0x167   : > { %v652_v5 = vpop.permute.xlu0 %651  ;;  %v963_v34 = vpop.permute.xlu1 %962  ;;  %v1139_v63 = vld [vmem:[#allocation3 + $0x30] sm:$0xff] }
 0x168   : > { %663 = vst.msk [vmem:[#allocation3 + $0x40] sm:$0xff] %vm658_vm13, %v652_v5  ;;  %v1159_v9 = vmul.f32 %v1149_v27, %v1139_v63  ;;  %vm5112_vm13 = vmmov %vm5105_vm6 }
 0x169   : > { %973 = vst.msk [vmem:[#allocation3 + $0x48] sm:$0xff] %vm462_vm7, %v963_v34  ;;  %vm5106_vm7 = vcmask 1044480  }
 0x16a   : > { %v1165_v19 = vpack.c.bf16 %v1159_v9, %v1157_v46 }
 0x16b   : > { %v684_v38 = vpop.permute.xlu0 %683  ;;  %v997_v13 = vpop.permute.xlu1 %996 }
 0x16c   : > { %695 = vst.msk [vmem:[#allocation3 + $0x40] sm:$0xff] %vm5100_vm1, %v684_v38  ;;  %1330 = vmatmul.mubr.bf16.gmra.mrb[4].mxu0 %v1165_v19 }
 0x16d   : > { %1007 = vst.msk [vmem:[#allocation3 + $0x48] sm:$0xff] %vm495_vm8, %v997_v13  ;;  %vm5107_vm8 = vcmask 1043456  }
 0x16f   : > { %v717_v16 = vpop.permute.xlu0 %716  ;;  %v1029_v61 = vpop.permute.xlu1 %1028 }
 0x170   : > { %728 = vst.msk [vmem:[#allocation3 + $0x40] sm:$0xff] %vm723_vm15, %v717_v16  ;;  %v3042_v16 = vmov -1.0   ;;  %vm5114_vm15 = vmmov %vm5106_vm7 }
 0x171   : > { %1039 = vst.msk [vmem:[#allocation3 + $0x48] sm:$0xff] %vm529_vm9, %v1029_v61 }
 0x173   : > { %v749_v3 = vpop.permute.xlu0 %748  ;;  %v1060_v49 = vpop.permute.xlu1 %1059 }
 0x174   : > { %760 = vst.msk [vmem:[#allocation3 + $0x40] sm:$0xff] %vm5101_vm5, %v749_v3  ;;  %vm5115_vm5 = vmmov %vm5106_vm7 }
 0x175   : > { %1070 = vst.msk [vmem:[#allocation3 + $0x48] sm:$0xff] %vm562_vm10, %v1060_v49 }
 0x177   : > { %v781_v17 = vpop.permute.xlu0 %780  ;;  %v1091_v10 = vpop.permute.xlu1 %1090 }
 0x178   : > { %792 = vst.msk [vmem:[#allocation3 + $0x40] sm:$0xff] %vm787_vm0, %v781_v17  ;;  %vm1495_vm0 = vcmask 130048  }
 0x179   : > { %1101 = vst.msk [vmem:[#allocation3 + $0x48] sm:$0xff] %vm594_vm11, %v1091_v10 }
 0x17a   : > { %1505 = vst.msk [vmem:[#allocation2 + $0x20] sm:$0xff] %vm1495_vm0, %v3041_v11  ;;  %1501 = vst.msk [vmem:[#allocation2] sm:$0xff] %vm1495_vm0, %v3041_v11 }
 0x17b   : > { %v813_v15 = vpop.permute.xlu0 %812  ;;  %v1122_v31 = vpop.permute.xlu1 %1121  ;;  %1502 = vst.msk [vmem:[#allocation2 + $0x8] sm:$0xff] %vm1495_vm0, %v3041_v11  ;;  %1503 = vst.msk [vmem:[#allocation2 + $0x10] sm:$0xff] %vm1495_vm0, %v3041_v11 }
 0x17c   : > { %824 = vst.msk [vmem:[#allocation3 + $0x40] sm:$0xff] %vm819_vm2, %v813_v15 }
 0x17d   : > { %1132 = vst.msk [vmem:[#allocation3 + $0x48] sm:$0xff] %vm626_vm12, %v1122_v31 }
 0x17e   : > { %1504 = vst.msk [vmem:[#allocation2 + $0x18] sm:$0xff] %vm1495_vm0, %v3041_v11  ;;  %1506 = vst.msk [vmem:[#allocation2 + $0x50] sm:$0xff] %vm1495_vm0, %v3041_v11 }
 0x17f   : > { %v847_v18 = vpop.permute.xlu0 %846  ;;  %1507 = vst.msk [vmem:[#allocation2 + $0x58] sm:$0xff] %vm1495_vm0, %v3041_v11  ;;  %1508 = vst.msk [vmem:[#allocation2 + $0x60] sm:$0xff] %vm1495_vm0, %v3041_v11 }
 0x180   : > { %858 = vst.msk [vmem:[#allocation3 + $0x40] sm:$0xff] %vm853_vm4, %v847_v18  ;;  %vm5104_vm4 = vcmask 1046528  }
 0x181   : > { %1509 = vst.msk [vmem:[#allocation2 + $0x68] sm:$0xff] %vm1495_vm0, %v3041_v11  ;;  %1510 = vst.msk [vmem:[#allocation2 + $0x70] sm:$0xff] %vm1495_vm0, %v3041_v11 }
 0x182   : > { %vm5110_vm11 = vmmov %vm5104_vm4 }
 0x183   : > { %vm5111_vm12 = vmmov %vm5104_vm4 }
 0x184   : > { %v1142_v7 = vld [vmem:[#allocation3 + $0x48] sm:$0xff] }
 0x185   : > { %v1162_v54 = vmul.f32 %v1152_v21, %v1142_v7 }
 0x187   : > { %v1168_v42 = vpack.c.bf16 %v1162_v54, %v1162_v54  ;;  %v1141_v20 = vld [vmem:[#allocation3 + $0x40] sm:$0xff] }
 0x188   : > { %v1161_v30 = vmul.f32 %v1151_v28, %v1141_v20 }
 0x189   : > { %2829 = vmatprep.mubr.msk.bf16.mxu0 %vm1276_vm3, %v1168_v42 }
 0x18a   : > { %v1167_v36 = vpack.c.bf16 %v1161_v30, %v1161_v30 }
 0x18c   : > { %1338 = vmatmul.mubr.bf16.gmra.mrb[8].mxu0 %v1167_v36 }
 0x1ef   : > { %v1323_v26 = vpop.f32.mrb[0].mxu0 }
 0x1f0   : > { %v1324_v50 = vadd.f32 %v3963_v39, %v1323_v26  ;;  %v1325_v33 = vpop.f32.mrb[1].mxu0 }
 0x1f1   : > { %v1326_v41 = vpop.f32.mrb[2].mxu0 }
 0x1f2   : > { %v1350_v43 = vmul.f32 0.70710677, %v1324_v50  ;;  %v1327_v44 = vadd.f32 %v3963_v39, %v1326_v41  ;;  %v1328_v40 = vpop.f32.mrb[3].mxu0  ;;  %v1345_v10 = vmul.f32 0.5, %v1324_v50 }
 0x1f4   : > { %v1365_v56 = vand.u32 2147483647, %v1350_v43  ;;  %v1351_v55 = vmul.f32 0.70710677, %v1327_v44  ;;  %vm1355_vm2 = vcmp.ge.f32.partialorder %v1350_v43, 0.0  ;;  %v1346_v7 = vmul.f32 0.5, %v1327_v44 }
 0x1f5   : > { %v1360_v61 = vsel %vm1355_vm2, 1.0, %v3042_v16  ;;  %vm5116_vm2 = vmmov %vm5107_vm8 }
 0x1f6   : > { %v1370_v32 = vmul.f32 0.3275911, %v1365_v56  ;;  %v1366_v29 = vand.u32 2147483647, %v1351_v55  ;;  %v1430_v47 = vsub.f32 0.0, %v1365_v56  ;;  %vm1356_vm3 = vcmp.ge.f32.partialorder %v1351_v55, 0.0 }
 0x1f7   : > { %v1361_v31 = vsel %vm1356_vm3, 1.0, %v3042_v16  ;;  %vm5117_vm3 = vmmov %vm5116_vm2 }
 0x1f8   : > { %v1375_v8 = vadd.f32 1.0, %v1370_v32  ;;  %v1371_v23 = vmul.f32 0.3275911, %v1366_v29  ;;  %v1431_v53 = vsub.f32 0.0, %v1366_v29  ;;  %v1435_v52 = vmul.f32 %v1430_v47, %v1365_v56 }
 0x1fa   : > { %2982 = vrcp.f32 %v1375_v8  ;;  %v1376_v2 = vadd.f32 1.0, %v1371_v23  ;;  %v1436_v14 = vmul.f32 %v1431_v53, %v1366_v29  ;;  %v1440_v62 = vmul.f32 1.442695, %v1435_v52 }
 0x1fc   : > { %2984 = vrcp.f32 %v1376_v2  ;;  %v1442_v35 = vmul.f32 1.442695, %v1436_v14 }
 0x1fd   : > { %2986 = vpow2.f32 %v1440_v62 }
 0x1fe   : > { %2988 = vpow2.f32 %v1442_v35 }
 0x204   : > { %v2983_v57 = vpop.eup %2982 }
 0x205   : > { %v1385_v59 = vmul.f32 1.0614054, %v2983_v57 }
 0x206   : > { %v2985_v12 = vpop.eup %2984 }
 0x207   : > { %v1390_v45 = vadd.f32 -1.4531521, %v1385_v59  ;;  %v1386_v58 = vmul.f32 1.0614054, %v2985_v12  ;;  %v2987_v34 = vpop.eup %2986 }
 0x208   : > { %v2989_v38 = vpop.eup %2988 }
 0x209   : > { %v1395_v22 = vmul.f32 %v2983_v57, %v1390_v45  ;;  %v1391_v6 = vadd.f32 -1.4531521, %v1386_v58 }
 0x20b   : > { %v1400_v1 = vadd.f32 1.4214138, %v1395_v22  ;;  %v1396_v4 = vmul.f32 %v2985_v12, %v1391_v6 }
 0x20d   : > { %v1405_v0 = vmul.f32 %v2983_v57, %v1400_v1  ;;  %v1401_v25 = vadd.f32 1.4214138, %v1396_v4 }
 0x20f   : > { %v1410_v51 = vadd.f32 -0.28449672, %v1405_v0  ;;  %v1406_v37 = vmul.f32 %v2985_v12, %v1401_v25 }
 0x211   : > { %v1415_v60 = vmul.f32 %v2983_v57, %v1410_v51  ;;  %v1411_v48 = vadd.f32 -0.28449672, %v1406_v37 }
 0x213   : > { %v1420_v27 = vadd.f32 0.2548296, %v1415_v60  ;;  %v1416_v46 = vmul.f32 %v2985_v12, %v1411_v48 }
 0x215   : > { %v1425_v5 = vmul.f32 %v2983_v57, %v1420_v27  ;;  %v1421_v63 = vadd.f32 0.2548296, %v1416_v46 }
 0x217   : > { %v1450_v9 = vmul.f32 %v2987_v34, %v1425_v5  ;;  %v1426_v19 = vmul.f32 %v2985_v12, %v1421_v63 }
 0x219   : > { %v1455_v13 = vsub.f32 1.0, %v1450_v9  ;;  %v1451_v3 = vmul.f32 %v2989_v38, %v1426_v19 }
 0x21b   : > { %v1460_v49 = vmul.f32 %v1455_v13, %v1360_v61  ;;  %v1456_v17 = vsub.f32 1.0, %v1451_v3 }
 0x21d   : > { %v1465_v15 = vadd.f32 1.0, %v1460_v49  ;;  %v1461_v18 = vmul.f32 %v1456_v17, %v1361_v31 }
 0x21f   : > { %v3969_v21 = vmul.f32 %v1465_v15, %v1345_v10  ;;  %v1466_v54 = vadd.f32 1.0, %v1461_v18 }
 0x221   : > { %5102 = vst [vmem:[#allocation8_spill] sm:$0xff] %v3969_v21  ;;  %1511 = vst.msk [vmem:[#allocation2 + $0x28] sm:$0xff] %vm1495_vm0, %v3969_v21  ;;  %v3973_v28 = vmul.f32 %v1466_v54, %v1346_v7 }
 0x223   : > { %5103 = vst [vmem:[#allocation9_spill] sm:$0xff] %v3973_v28  ;;  %1512 = vst.msk [vmem:[#allocation2 + $0x30] sm:$0xff] %vm1495_vm0, %v3973_v28 }
 0x228   : > { %v1812_v42 = vld [vmem:[#allocation2 + $0x26] sm:$0xff] }
 0x229   : > { %1823 = vrot.lane.b32.xlu1 %v1812_v42, %s3028_s27  ;;  %v1844_v30 = vrot.slane %v1812_v42, 1  ;;  %v1875_v50 = vrot.slane %v1812_v42, 2  ;;  %v1906_v43 = vrot.slane %v1812_v42, 3  ;;  %v1937_v56 = vrot.slane %v1812_v42, 4 }
 0x22a   : > { %v3978_v20 = vld [vmem:[#allocation2 + $0x2e] sm:$0xff] }
 0x22b   : > { %1825 = vrot.lane.b32.xlu0 %v3978_v20, %s3028_s27  ;;  %v1845_v36 = vrot.slane %v3978_v20, 1  ;;  %v1876_v26 = vrot.slane %v3978_v20, 2  ;;  %v1907_v41 = vrot.slane %v3978_v20, 3  ;;  %v1938_v40 = vrot.slane %v3978_v20, 4 }
 0x22d   : > { %v1846_v11 = vsel %vm5104_vm4, %v1844_v30, %v1845_v36  ;;  %v1877_v33 = vsel %vm5105_vm6, %v1875_v50, %v1876_v26  ;;  %v1908_v44 = vsel %vm5106_vm7, %v1906_v43, %v1907_v41  ;;  %v1939_v55 = vsel %vm5107_vm8, %v1937_v56, %v1938_v40  ;;  %vm5122_vm4 = vmmov %vm5116_vm2 }
 0x22e   : > { %1855 = vrot.lane.b32.xlu1 %v1846_v11, %s3030_s11  ;;  %vm5123_vm6 = vmmov %vm5116_vm2 }
 0x22f   : > { %vm5124_vm7 = vmmov %vm5116_vm2 }
 0x230   : > { %vm5125_vm8 = vmmov %vm5116_vm2 }
 0x232   : > { %1886 = vrot.lane.b32.xlu1 %v1877_v33, %s3032_s13 }
 0x236   : > { %1917 = vrot.lane.b32.xlu1 %v1908_v44, %s3034_s22 }
 0x23a   : > { %1948 = vrot.lane.b32.xlu1 %v1939_v55, %s3037_s24 }
 0x23f   : > { %v1331_v32 = vpop.f32.mrb[4].mxu0 }
 0x240   : > { %v1332_v29 = vadd.f32 %v3963_v39, %v1331_v32  ;;  %v1333_v8 = vpop.f32.mrb[5].mxu0 }
 0x241   : > { %v1334_v23 = vpop.f32.mrb[6].mxu0 }
 0x242   : > { %v1352_v2 = vmul.f32 0.70710677, %v1332_v29  ;;  %v4004_v47 = vadd.f32 %v3963_v39, %v1334_v23  ;;  %v1336_v53 = vpop.f32.mrb[7].mxu0  ;;  %v1347_v23 = vmul.f32 0.5, %v1332_v29 }
 0x244   : > { %v1367_v57 = vand.u32 2147483647, %v1352_v2  ;;  %v1353_v52 = vmul.f32 0.70710677, %v4004_v47  ;;  %vm1357_vm9 = vcmp.ge.f32.partialorder %v1352_v2, 0.0  ;;  %v1348_v2 = vmul.f32 0.5, %v4004_v47 }
 0x245   : > { %v1362_v56 = vsel %vm1357_vm9, 1.0, %v3042_v16  ;;  %vm5126_vm9 = vmmov %vm5116_vm2 }
 0x246   : > { %v1372_v59 = vmul.f32 0.3275911, %v1367_v57  ;;  %v1368_v12 = vand.u32 2147483647, %v1353_v52  ;;  %v1432_v58 = vsub.f32 0.0, %v1367_v57  ;;  %vm1358_vm10 = vcmp.ge.f32.partialorder %v1353_v52, 0.0 }
 0x248   : > { %v1377_v45 = vadd.f32 1.0, %v1372_v59  ;;  %v1373_v14 = vmul.f32 0.3275911, %v1368_v12  ;;  %v1433_v22 = vsub.f32 0.0, %v1368_v12  ;;  %v1437_v1 = vmul.f32 %v1432_v58, %v1367_v57 }
 0x249   : > { %v1363_v57 = vsel %vm1358_vm10, 1.0, %v3042_v16  ;;  %vm5127_vm10 = vmmov %vm5116_vm2 }
 0x24a   : > { %2990 = vrcp.f32 %v1377_v45  ;;  %v1378_v62 = vadd.f32 1.0, %v1373_v14  ;;  %v1438_v25 = vmul.f32 %v1433_v22, %v1368_v12  ;;  %v1444_v51 = vmul.f32 1.442695, %v1437_v1 }
 0x24c   : > { %2992 = vrcp.f32 %v1378_v62  ;;  %v1446_v46 = vmul.f32 1.442695, %v1438_v25 }
 0x24d   : > { %2994 = vpow2.f32 %v1444_v51 }
 0x24e   : > { %2996 = vpow2.f32 %v1446_v46 }
 0x254   : > { %v2991_v6 = vpop.eup %2990 }
 0x255   : > { %v1387_v35 = vmul.f32 1.0614054, %v2991_v6 }
 0x256   : > { %v2993_v4 = vpop.eup %2992 }
 0x257   : > { %v1392_v0 = vadd.f32 -1.4531521, %v1387_v35  ;;  %v1388_v37 = vmul.f32 1.0614054, %v2993_v4  ;;  %v2995_v42 = vpop.eup %2994 }
 0x258   : > { %v2997_v43 = vpop.eup %2996 }
 0x259   : > { %v1397_v60 = vmul.f32 %v2991_v6, %v1392_v0  ;;  %v1393_v48 = vadd.f32 -1.4531521, %v1388_v37 }
 0x25b   : > { %v1402_v27 = vadd.f32 1.4214138, %v1397_v60  ;;  %v1398_v5 = vmul.f32 %v2993_v4, %v1393_v48 }
 0x25d   : > { %v1407_v34 = vmul.f32 %v2991_v6, %v1402_v27  ;;  %v1403_v63 = vadd.f32 1.4214138, %v1398_v5 }
 0x25f   : > { %v1412_v9 = vadd.f32 -0.28449672, %v1407_v34  ;;  %v1339_v19 = vpop.f32.mrb[8].mxu0  ;;  %v1408_v38 = vmul.f32 %v2993_v4, %v1403_v63 }
 0x260   : > { %v4008_v13 = vadd.f32 %v3963_v39, %v1339_v19  ;;  %v1341_v61 = vpop.f32.mrb[9].mxu0 }
 0x261   : > { %v1417_v3 = vmul.f32 %v2991_v6, %v1412_v9  ;;  %v1342_v49 = vpop.f32.mrb[10].mxu0  ;;  %v1413_v17 = vadd.f32 -0.28449672, %v1408_v38 }
 0x262   : > { %v4011_v10 = vmul.f32 0.70710677, %v4008_v13  ;;  %v1343_v15 = vpop.f32.mrb[11].mxu0 }
 0x263   : > { %v1422_v31 = vadd.f32 0.2548296, %v1417_v3  ;;  %v1418_v18 = vmul.f32 %v2993_v4, %v1413_v17 }
 0x264   : > { %v1369_v7 = vand.u32 2147483647, %v4011_v10  ;;  %vm1359_vm1 = vcmp.ge.f32.partialorder %v4011_v10, 0.0 }
 0x265   : > { %v1427_v54 = vmul.f32 %v2991_v6, %v1422_v31  ;;  %v1423_v30 = vadd.f32 0.2548296, %v1418_v18  ;;  %v1364_v18 = vsel %vm1359_vm1, 1.0, %v3042_v16  ;;  %vm5133_vm1 = vmmov %vm5115_vm5 }
 0x266   : > { %v1374_v11 = vmul.f32 0.3275911, %v1369_v7  ;;  %v1434_v14 = vsub.f32 0.0, %v1369_v7 }
 0x267   : > { %v1452_v50 = vmul.f32 %v2995_v42, %v1427_v54  ;;  %v1428_v39 = vmul.f32 %v2993_v4, %v1423_v30 }
 0x268   : > { %v1379_v33 = vadd.f32 1.0, %v1374_v11  ;;  %v1439_v29 = vmul.f32 %v1434_v14, %v1369_v7 }
 0x269   : > { %v1457_v44 = vsub.f32 1.0, %v1452_v50  ;;  %v1453_v55 = vmul.f32 %v2997_v43, %v1428_v39 }
 0x26a   : > { %2998 = vrcp.f32 %v1379_v33  ;;  %v1448_v6 = vmul.f32 1.442695, %v1439_v29 }
 0x26b   : > { %v1462_v32 = vmul.f32 %v1457_v44, %v1362_v56  ;;  %v1458_v8 = vsub.f32 1.0, %v1453_v55 }
 0x26c   : > { %3000 = vpow2.f32 %v1448_v6 }
 0x26d   : > { %v1467_v53 = vadd.f32 1.0, %v1462_v32  ;;  %v1463_v59 = vmul.f32 %v1458_v8, %v1363_v57 }
 0x26f   : > { %v4016_v12 = vmul.f32 %v1467_v53, %v1347_v23  ;;  %v1468_v45 = vadd.f32 1.0, %v1463_v59 }
 0x271   : > { %5108 = vst [vmem:[#allocation10_spill] sm:$0xff] %v4016_v12  ;;  %1513 = vst.msk [vmem:[#allocation2 + $0x38] sm:$0xff] %vm1495_vm0, %v4016_v12  ;;  %v4021_v62 = vmul.f32 %v1468_v45, %v1348_v2 }
 0x273   : > { %5109 = vst [vmem:[#allocation11_spill] sm:$0xff] %v4021_v62  ;;  %1514 = vst.msk [vmem:[#allocation2 + $0x40] sm:$0xff] %vm1495_vm0, %v4021_v62 }
 0x274   : > { %v2999_v52 = vpop.eup %2998 }
 0x275   : > { %v1389_v58 = vmul.f32 1.0614054, %v2999_v52 }
 0x276   : > { %v3001_v61 = vpop.eup %3000 }
 0x277   : > { %v1394_v22 = vadd.f32 -1.4531521, %v1389_v58 }
 0x278   : > { %v1814_v1 = vld [vmem:[#allocation2 + $0x36] sm:$0xff] }
 0x279   : > { %v1399_v35 = vmul.f32 %v2999_v52, %v1394_v22  ;;  %1827 = vrot.lane.b32.xlu1 %v1814_v1, %s3028_s27  ;;  %v1847_v0 = vrot.slane %v1814_v1, 1  ;;  %v1878_v46 = vrot.slane %v1814_v1, 2  ;;  %v1909_v38 = vrot.slane %v1814_v1, 3 }
 0x27a   : > { %v4026_v4 = vld [vmem:[#allocation2 + $0x3e] sm:$0xff]  ;;  %v1940_v15 = vrot.slane %v1814_v1, 4 }
 0x27b   : > { %v1404_v47 = vadd.f32 1.4214138, %v1399_v35  ;;  %1829 = vrot.lane.b32.xlu0 %v4026_v4, %s3028_s27  ;;  %v5079_v25 = vrot.slane %v4026_v4, 1  ;;  %v5076_v60 = vrot.slane %v4026_v4, 2  ;;  %v1848_v27 = vsel %vm5111_vm12, %v1845_v36, %v1847_v0  ;;  %vm5129_vm12 = vmmov %vm5116_vm2 }
 0x27c   : > { %v1911_v63 = vrot.slane %v4026_v4, 3  ;;  %v1879_v19 = vsel %vm5113_vm14, %v1876_v26, %v1878_v46  ;;  %v1942_v49 = vrot.slane %v4026_v4, 4  ;;  %v1910_v26 = vsel %vm5115_vm5, %v1907_v41, %v1909_v38  ;;  %vm5131_vm14 = vmmov %vm5116_vm2 }
 0x27d   : > { %v1409_v51 = vmul.f32 %v2999_v52, %v1404_v47  ;;  %v1850_v37 = vsel %vm5110_vm11, %v1847_v0, %v5079_v25  ;;  %v1881_v34 = vsel %vm5112_vm13, %v1878_v46, %v5076_v60  ;;  %v1941_v54 = vsel %vm5117_vm3, %v1938_v40, %v1940_v15  ;;  %vm5128_vm11 = vmmov %vm5115_vm5 }
 0x27e   : > { %1859 = vrot.lane.b32.xlu1 %v1850_v37, %s3030_s11  ;;  %v1912_v3 = vsel %vm5114_vm15, %v1909_v38, %v1911_v63  ;;  %v1943_v7 = vsel %vm5116_vm2, %v1940_v15, %v1942_v49  ;;  %v1349_v41 = vmul.f32 0.5, %v4008_v13  ;;  %vm5130_vm13 = vcmask 1046528   ;;  %vm5134_vm5 = vmmov %vm5116_vm2 }
 0x27f   : > { %v1414_v48 = vadd.f32 -0.28449672, %v1409_v51  ;;  %1857 = vrot.lane.b32.xlu0 %v1848_v27, %s3030_s11  ;;  %vm5132_vm15 = vcmask 1045504   ;;  %vm5135_vm2 = vmmov %vm5130_vm13 }
 0x280   : > { %vm5136_vm3 = vmmov %vm5135_vm2 }
 0x281   : > { %v1419_v5 = vmul.f32 %v2999_v52, %v1414_v48 }
 0x282   : > { %1890 = vrot.lane.b32.xlu1 %v1881_v34, %s3032_s13 }
 0x283   : > { %v1424_v9 = vadd.f32 0.2548296, %v1419_v5  ;;  %1888 = vrot.lane.b32.xlu0 %v1879_v19, %s3032_s13 }
 0x285   : > { %v1429_v36 = vmul.f32 %v2999_v52, %v1424_v9 }
 0x286   : > { %1921 = vrot.lane.b32.xlu1 %v1912_v3, %s3034_s22 }
 0x287   : > { %v1454_v17 = vmul.f32 %v3001_v61, %v1429_v36  ;;  %1919 = vrot.lane.b32.xlu0 %v1910_v26, %s3034_s22  ;;  %v2957_v26 = vld [vmem:[%s5060_s6 + $0x40] sm:$0xff]  }
 0x288   : > { %2880 = vmatprep.subr.bf16.mxu1 %v2957_v26 }
 0x289   : > { %v1459_v31 = vsub.f32 1.0, %v1454_v17 }
 0x28a   : > { %1952 = vrot.lane.b32.xlu1 %v1943_v7, %s3037_s24 }
 0x28b   : > { %v1464_v10 = vmul.f32 %v1459_v31, %v1364_v18  ;;  %1950 = vrot.lane.b32.xlu0 %v1941_v54, %s3037_s24 }
 0x28d   : > { %v1469_v42 = vadd.f32 1.0, %v1464_v10 }
 0x28f   : > { %v4069_v30 = vmul.f32 %v1469_v42, %v1349_v41 }
 0x291   : > { %5118 = vst [vmem:[#allocation12_spill] sm:$0xff] %v4069_v30  ;;  %1515 = vst.msk [vmem:[#allocation2 + $0x48] sm:$0xff] %vm1495_vm0, %v4069_v30 }
 0x298   : > { %v4078_v16 = vld [vmem:[%s4075_s18 + $0x8] sm:$0xff]  ;;  %v4081_v20 = vld [vmem:[%s4075_s18] sm:$0xff]  ;;  %v4121_v32 = vld [vmem:[%s4098_s21 + $0x36] sm:$0xff] }
 0x299   : > { %1676 = vrot.lane.b32.xlu0 %v4078_v16, %s3034_s22  ;;  %1674 = vrot.lane.b32.xlu1 %v4081_v20, %s3034_s22  ;;  %v4091_v40 = vld [vmem:[%s4088_s23 + $0x2e] sm:$0xff]  ;;  %v4094_v13 = vld [vmem:[%s4088_s23 + $0x26] sm:$0xff]  ;;  %v2244_v23 = vrot.slane %v4121_v32, 4  ;;  %v1782_v6 = vrot.slane %v4078_v16, 4  ;;  %v1781_v1 = vrot.slane %v4081_v20, 4 }
 0x29a   : > { %v4101_v11 = vld [vmem:[%s4098_s21 + $0x2e] sm:$0xff]  ;;  %v4105_v39 = vld [vmem:[%s4098_s21 + $0x3e] sm:$0xff]  ;;  %v4108_v33 = vld [vmem:[%s4098_s21 + $0x26] sm:$0xff]  ;;  %v2053_v48 = vrot.slane %v4094_v13, 3 }
 0x29b   : > { %v2242_v50 = vrot.slane %v4101_v11, 4  ;;  %v4111_v43 = vld [vmem:[%s4098_s21 + $0x46] sm:$0xff]  ;;  %v2246_v44 = vrot.slane %v4105_v39, 4  ;;  %v2241_v56 = vrot.slane %v4108_v33, 4  ;;  %v4128_v8 = vld [vmem:[%s4125_s16 + $0x2e] sm:$0xff]  ;;  %v4132_v53 = vld [vmem:[%s4125_s16 + $0x36] sm:$0xff]  ;;  %v4193_v5 = vsel %vm5126_vm9, %v1781_v1, %v1782_v6 }
 0x29c   : > { %v5087_v55 = vrot.slane %v4111_v43, 4  ;;  %1524 = vst.msk [vmem:[#allocation4 + $0x20] sm:$0xff] %vm1495_vm0, %v4128_v8  ;;  %v4137_v57 = vld [vmem:[%s4125_s16 + $0x26] sm:$0xff]  ;;  %1525 = vst.msk [vmem:[#allocation4 + $0x40] sm:$0xff] %vm1495_vm0, %v4132_v53  ;;  %v4148_v45 = vld [vmem:[%s4125_s16 + $0x3e] sm:$0xff]  ;;  %v5089_v51 = vrot.slane %v4132_v53, 4 }
 0x29d   : > { %1982 = vrot.lane.b32.xlu0 %v4091_v40, %s5097_s28  ;;  %1980 = vrot.lane.b32.xlu1 %v4094_v13, %s5097_s28  ;;  %v2243_v59 = vsel %vm5122_vm4, %v2241_v56, %v2242_v50  ;;  %1523 = vst.msk [vmem:[#allocation4] sm:$0xff] %vm1495_vm0, %v4137_v57  ;;  %v4151_v14 = vld [vmem:[%s4125_s16 + $0x46] sm:$0xff]  ;;  %v4154_v52 = vld [vmem:[%s4075_s18 + $0x18] sm:$0xff]  ;;  %v2245_v58 = vsel %vm5124_vm7, %v2242_v50, %v2244_v23  ;;  %1526 = vst.msk [vmem:[#allocation4 + $0x60] sm:$0xff] %vm1495_vm0, %v4148_v45  ;;  %v5078_v27 = vrot.slane %v4148_v45, 3 }
 0x29e   : > { %v2249_v2 = vsel %vm5123_vm6, %v2246_v44, %v5087_v55  ;;  %v4157_v29 = vld [vmem:[%s4075_s18 + $0x10] sm:$0xff]  ;;  %2257 = vst.msk [vmem:[#allocation4 + $0x18] sm:$0xff] %vm1495_vm0, %v2243_v59  ;;  %v2247_v22 = vsel %vm5125_vm8, %v2244_v23, %v2246_v44  ;;  %1527 = vst.msk [vmem:[#allocation4 + $0x80] sm:$0xff] %vm1495_vm0, %v4151_v14  ;;  %v4176_v35 = vld [vmem:[%s4088_s23 + $0x3e] sm:$0xff]  ;;  %v1605_v19 = vrot.slane %v4151_v14, 3  ;;  %v5091_v61 = vrot.slane %v4128_v8, 1 }
 0x29f   : > { %2260 = vst.msk [vmem:[#allocation4 + $0x78] sm:$0xff] %vm1495_vm0, %v2249_v2  ;;  %2258 = vst.msk [vmem:[#allocation4 + $0x38] sm:$0xff] %vm1495_vm0, %v2245_v58  ;;  %v4179_v47 = vld [vmem:[%s4088_s23 + $0x36] sm:$0xff]  ;;  %v5082_v0 = vrot.slane %v4157_v29, 4  ;;  %v4190_v46 = vld [vmem:[#allocation2 + $0x46] sm:$0xff]  ;;  %v5086_v34 = vrot.slane %v4157_v29, 1 }
 0x2a0   : > { %2259 = vst.msk [vmem:[#allocation4 + $0x58] sm:$0xff] %vm1495_vm0, %v2247_v22  ;;  %v5084_v9 = vrot.slane %v4157_v29, 2  ;;  %v4199_v38 = vld [vmem:[%s4075_s18 + $0x20] sm:$0xff]  ;;  %v1635_v17 = vrot.slane %v4148_v45, 4  ;;  %v4217_v15 = vsel %vm5128_vm11, %v5078_v27, %v1605_v19  ;;  %v1701_v31 = vrot.slane %v4154_v52, 1  ;;  %vm5137_vm4 = vmmov %vm5132_vm15 }
 0x2a1   : > { %1680 = vrot.lane.b32.xlu0 %v4154_v52, %s3034_s22  ;;  %1678 = vrot.lane.b32.xlu1 %v4157_v29, %s3034_s22  ;;  %v4204_v36 = vsel %vm5127_vm10, %v1782_v6, %v5082_v0  ;;  %v1637_v18 = vrot.slane %v4151_v14, 4  ;;  %v5085_v7 = vrot.slane %v4132_v53, 1  ;;  %v1733_v54 = vrot.slane %v4154_v52, 2  ;;  %v2835_v23 = vld [vmem:[%s4125_s16 + $0x4e] sm:$0xf]  ;;  %v4241_v59 = vld [vmem:[%s4088_s23 + $0x46] sm:$0xff]  ;;  %vm5138_vm6 = vmmov %vm5135_vm2 }
 0x2a2   : > { %v4225_v10 = vsel %vm5129_vm12, %v5089_v51, %v1635_v17  ;;  %v5077_v41 = vrot.slane %v4190_v46, 3  ;;  %v4233_v50 = vsel %vm5130_vm13, %v5086_v34, %v1701_v31  ;;  %v5083_v56 = vrot.slane %v4190_v46, 4  ;;  %vm5139_vm7 = vmmov %vm5137_vm4 }
 0x2a3   : > { %v4236_v44 = vsel %vm5131_vm14, %v1635_v17, %v1637_v18  ;;  %v5088_v58 = vrot.slane %v4151_v14, 1  ;;  %v4248_v22 = vsel %vm5132_vm15, %v5084_v9, %v1733_v54  ;;  %v5090_v1 = vrot.slane %v4151_v14, 2  ;;  %vm5140_vm8 = vmmov %vm5137_vm4 }
 0x2a4   : > { %v4255_v6 = vsel %vm5133_vm1, %v1911_v63, %v5077_v41  ;;  %v4267_v17 = vsel %vm5134_vm5, %v1942_v49, %v5083_v56  ;;  %v1703_v60 = vrot.slane %v4199_v38, 1  ;;  %v1735_v63 = vrot.slane %v4199_v38, 2  ;;  %vm5141_vm9 = vmmov %vm5133_vm1 }
 0x2a5   : > { %1986 = vrot.lane.b32.xlu0 %v4176_v35, %s5097_s28  ;;  %1984 = vrot.lane.b32.xlu1 %v4179_v47, %s5097_s28  ;;  %v4276_v41 = vsel %vm5135_vm2, %v5091_v61, %v5085_v7  ;;  %v1543_v24 = vrot.slane %v2835_v23, 1  ;;  %v1575_v9 = vrot.slane %v2835_v23, 2  ;;  %v4290_v7 = vld [vmem:[%s4075_s18 + $0x28] sm:$0xf]  ;;  %v2022_v55 = vrot.slane %v4094_v13, 2  ;;  %vm5142_vm10 = vmmov %vm5133_vm1  ;;  %s2916_s18 = smul.u32 40, %s5282_s0 }
 0x2a6   : > { %v4282_v49 = vsel %vm5136_vm3, %v1701_v31, %v1703_v60  ;;  %v4285_v56 = vsel %vm5137_vm4, %v1733_v54, %v1735_v63  ;;  %v2023_v54 = vrot.slane %v4091_v40, 2  ;;  %v1607_v37 = vrot.slane %v2835_v23, 3  ;;  %vm5143_vm11 = vmmov %vm5134_vm5 }
 0x2a7   : > { %v4295_v34 = vsel %vm5138_vm6, %v5088_v58, %v1543_v24  ;;  %v4305_v31 = vsel %vm5139_vm7, %v5090_v1, %v1575_v9  ;;  %v2054_v24 = vrot.slane %v4091_v40, 3  ;;  %v1639_v58 = vrot.slane %v2835_v23, 4  ;;  %v2958_v9 = vld [vmem:[%s5060_s6] sm:$0xff]   ;;  %vm5144_vm12 = vmmov %vm5134_vm5  ;;  %s340_s16 = scalar_lea.vmem %s5062_s8, %s2916_s18 }
 0x2a8   : > { %v2084_v51 = vrot.slane %v4094_v13, 4  ;;  %v2085_v0 = vrot.slane %v4091_v40, 4  ;;  %v4319_v1 = vsel %vm5140_vm8, %v2022_v55, %v2023_v54  ;;  %v4322_v25 = vsel %vm5141_vm9, %v1605_v19, %v1607_v37  ;;  %v2959_v55 = vld [vmem:[%s5060_s6 + $0x48] sm:$0xff]   ;;  %vm5145_vm13 = vmmov %vm5135_vm2  ;;  %2881 = vmatpush3.bf16.msra.mxu1 %v2958_v9 }
 0x2a9   : > { %1682 = vrot.lane.b32.xlu0 %v4199_v38, %s3034_s22  ;;  %1831 = vrot.lane.b32.xlu1 %v4190_v46, %s3028_s27  ;;  %v1705_v23 = vrot.slane %v4290_v7, 1  ;;  %v2148_v27 = vrot.slane %v4108_v33, 1  ;;  %v4327_v3 = vsel %vm5142_vm10, %v2053_v48, %v2054_v24  ;;  %v4330_v2 = vsel %vm5143_vm11, %v1637_v18, %v1639_v58  ;;  %vm5146_vm14 = vmmov %vm5135_vm2 }
 0x2aa   : > { %v4333_v42 = vsel %vm5144_vm12, %v2084_v51, %v2085_v0  ;;  %v2149_v61 = vrot.slane %v4101_v11, 1  ;;  %v1737_v48 = vrot.slane %v4290_v7, 2  ;;  %v2179_v51 = vrot.slane %v4108_v33, 2  ;;  %vm5148_vm15 = vmmov %vm5137_vm4  ;;  %2882 = vmatprep.subr.bf16.mxu1 %v2959_v55 }
 0x2ab   : > { %v4344_v37 = vsel %vm5145_vm13, %v1703_v60, %v1705_v23  ;;  %v2180_v19 = vrot.slane %v4101_v11, 2  ;;  %v2025_v18 = vrot.slane %v4179_v47, 2  ;;  %v2210_v58 = vrot.slane %v4108_v33, 3  ;;  %v2960_v60 = vld [vmem:[%s5060_s6 + $0x8] sm:$0xff]   ;;  %vm5150_vm1 = vmmov %vm5137_vm4 }
 0x2ac   : > { %v4350_v26 = vsel %vm5146_vm14, %v2148_v27, %v2149_v61  ;;  %v2211_v30 = vrot.slane %v4101_v11, 3  ;;  %v4359_v23 = vsel %vm5148_vm15, %v1735_v63, %v1737_v48  ;;  %v2056_v27 = vrot.slane %v4179_v47, 3  ;;  %vm5152_vm5 = vmmov %vm5150_vm1  ;;  %v2961_v63 = vld [vmem:[%s5060_s6 + $0x50] sm:$0xff]   ;;  %2883 = vmatpush3.bf16.msra.mxu1 %v2960_v60 }
 0x2ad   : > { %2129 = vrot.lane.b32.xlu0 %v4101_v11, %s3032_s13  ;;  %1988 = vrot.lane.b32.xlu1 %v4241_v59, %s5097_s28  ;;  %5147 = vst [vmem:[#allocation13_spill] sm:$0xff] %v4350_v26  ;;  %5149 = vst [vmem:[#allocation14_spill] sm:$0xff] %v4359_v23  ;;  %v4362_v12 = vsel %vm5150_vm1, %v2179_v51, %v2180_v19  ;;  %v2027_v21 = vrot.slane %v4176_v35, 2  ;;  %v2087_v9 = vrot.slane %v4179_v47, 4  ;;  %v2058_v62 = vrot.slane %v4176_v35, 3 }
 0x2ae   : > { %5151 = vst [vmem:[#allocation15_spill] sm:$0xff] %v4362_v12  ;;  %vm5154_vm2 = vmmov %vm5141_vm9  ;;  %v2151_v48 = vrot.slane %v4121_v32, 1  ;;  %v2089_v51 = vrot.slane %v4176_v35, 4  ;;  %2884 = vmatprep.subr.bf16.mxu1 %v2961_v63 }
 0x2af   : > { %v4370_v11 = vsel %vm5154_vm2, %v2210_v58, %v2211_v30  ;;  %vm5156_vm3 = vmmov %vm5154_vm2 }
 0x2b0   : > { %5155 = vst [vmem:[#allocation17_spill] sm:$0xff] %v4370_v11  ;;  %vm5158_vm4 = vmmov %vm5150_vm1 }
 0x2b1   : > { %2133 = vrot.lane.b32.xlu0 %v4105_v39, %s3032_s13  ;;  %2127 = vrot.lane.b32.xlu1 %v4108_v33, %s3032_s13  ;;  %v4367_v33 = vsel %vm5152_vm5, %v2023_v54, %v2025_v18  ;;  %v4382_v54 = vsel %vm5156_vm3, %v2054_v24, %v2056_v27  ;;  %v4385_v55 = vsel %vm5158_vm4, %v2025_v18, %v2027_v21  ;;  %vm5160_vm6 = vmmov %vm5143_vm11  ;;  %v2962_v24 = vld [vmem:[%s5060_s6 + $0x10] sm:$0xff]   ;;  %v5164_v18 = vrot.slane %v4128_v8, 1 }
 0x2b2   : > { %5153 = vst [vmem:[#allocation16_spill] sm:$0xff] %v4367_v33  ;;  %5157 = vst [vmem:[#allocation18_spill] sm:$0xff] %v4382_v54  ;;  %v4390_v58 = vsel %vm5160_vm6, %v2085_v0, %v2087_v9  ;;  %v5167_v0 = vrot.slane %v4132_v53, 2  ;;  %v5175_v33 = vrot.slane %v4137_v57, 2  ;;  %2885 = vmatpush3.bf16.msra.mxu1 %v2962_v24 }
 0x2b3   : > { %5159 = vst [vmem:[#allocation19_spill] sm:$0xff] %v4385_v55  ;;  %5161 = vst [vmem:[#allocation20_spill] sm:$0xff] %v4390_v58  ;;  %v5165_v55 = vrot.slane %v4137_v57, 1 }
 0x2b4   : > { %vm5162_vm7 = vmmov %vm5154_vm2 }
 0x2b5   : > { %2135 = vrot.lane.b32.xlu0 %v4111_v43, %s3032_s13  ;;  %2131 = vrot.lane.b32.xlu1 %v4121_v32, %s3032_s13  ;;  %v4393_v28 = vsel %vm5162_vm7, %v2056_v27, %v2058_v62  ;;  %vm5166_vm8 = vmmov %vm5145_vm13  ;;  %v5168_v27 = vrot.slane %v4128_v8, 2 }
 0x2b6   : > { %5163 = vst [vmem:[#allocation21_spill] sm:$0xff] %v4393_v28  ;;  %v1536_v54 = vsel %vm5166_vm8, %v5165_v55, %v5164_v18  ;;  %vm5169_vm9 = vmmov %vm5150_vm1  ;;  %v5177_v55 = vrot.slane %v4132_v53, 3  ;;  %v5178_v18 = vrot.slane %v4128_v8, 3 }
 0x2b7   : > { %v1570_v28 = vsel %vm5169_vm9, %v5168_v27, %v5167_v0  ;;  %vm5170_vm10 = vmmov %vm5166_vm8  ;;  %v5174_v11 = vmov %v5168_v27  ;;  %v5187_v27 = vrot.slane %v4132_v53, 4 }
 0x2b8   : > { %v4411_v58 = vsel %vm5170_vm10, %v2149_v61, %v2151_v48  ;;  %vm5172_vm11 = vmmov %vm5160_vm6 }
 0x2b9   : > { %1794 = vrot.lane.b32.xlu0 %v4204_v36, %s3025_s20  ;;  %1792 = vrot.lane.b32.xlu1 %v4193_v5, %s3025_s20  ;;  %v2182_v36 = vrot.slane %v4121_v32, 2  ;;  %v2153_v5 = vrot.slane %v4105_v39, 1  ;;  %5171 = vst [vmem:[#allocation22_spill] sm:$0xff] %v4411_v58  ;;  %v4414_v60 = vsel %vm5172_vm11, %v2087_v9, %v2089_v51  ;;  %vm5176_vm12 = vmmov %vm5150_vm1  ;;  %v4433_v9 = vld [vmem:[%s4088_s23 + $0x4e] sm:$0xf] }
 0x2ba   : > { %5173 = vst [vmem:[#allocation23_spill] sm:$0xff] %v4414_v60  ;;  %v1568_v12 = vsel %vm5176_vm12, %v5175_v33, %v5174_v11  ;;  %vm5179_vm13 = vmmov %vm5154_vm2  ;;  %v5184_v33 = vmov %v5178_v18  ;;  %v5185_v11 = vrot.slane %v4137_v57, 3  ;;  %v2848_v60 = vld [vmem:[%s4098_s21 + $0x4e] sm:$0xf] }
 0x2bb   : > { %v1602_v23 = vsel %vm5179_vm13, %v5178_v18, %v5177_v55  ;;  %vm5180_vm14 = vmmov %vm5150_vm1  ;;  %v1763_v18 = vrot.slane %v4157_v29, 3 }
 0x2bc   : > { %v4427_v0 = vsel %vm5180_vm14, %v2180_v19, %v2182_v36  ;;  %vm5182_vm15 = vmmov %vm5166_vm8  ;;  %v5188_v19 = vrot.slane %v4128_v8, 4  ;;  %v2964_v8 = vld [vmem:[%s5060_s6 + $0x18] sm:$0xff]  }
 0x2bd   : > { %5181 = vst [vmem:[#allocation24_spill] sm:$0xff] %v4427_v0  ;;  %v4430_v61 = vsel %vm5182_vm15, %v2151_v48, %v2153_v5  ;;  %1547 = vrot.lane.b32.xlu0 %v4276_v41, %s3025_s20  ;;  %1545 = vrot.lane.b32.xlu1 %v1536_v54, %s3025_s20  ;;  %vm5186_vm1 = vmmov %vm5154_vm2  ;;  %v5191_v41 = vrot.slane %v4137_v57, 4  ;;  %v2029_v57 = vrot.slane %v4241_v59, 2  ;;  %v2031_v0 = vrot.slane %v4433_v9, 2 }
 0x2be   : > { %5183 = vst [vmem:[#allocation25_spill] sm:$0xff] %v4430_v61  ;;  %v1600_v63 = vsel %vm5186_vm1, %v5185_v11, %v5184_v33  ;;  %vm5189_vm5 = vmmov %vm5160_vm6  ;;  %v5190_v55 = vmov %v5188_v19  ;;  %v2963_v33 = vld [vmem:[%s5060_s6 + $0x58] sm:$0xff]   ;;  %v1761_v11 = vrot.slane %v4078_v16, 3  ;;  %v1760_v61 = vrot.slane %v4081_v20, 3 }
 0x2bf   : > { %v4448_v48 = vsel %vm5189_vm5, %v5188_v19, %v5187_v27  ;;  %vm5192_vm2 = vmmov %vm5189_vm5  ;;  %v2213_v27 = vrot.slane %v4121_v32, 3  ;;  %v2184_v19 = vrot.slane %v4105_v39, 2  ;;  %2886 = vmatprep.subr.bf16.mxu1 %v2963_v33  ;;  %v2091_v33 = vrot.slane %v4241_v59, 4 }
 0x2c0   : > { %v4455_v54 = vsel %vm5192_vm2, %v5191_v41, %v5190_v55  ;;  %v2215_v55 = vrot.slane %v4105_v39, 3  ;;  %v2060_v41 = vrot.slane %v4241_v59, 3  ;;  %vm5193_vm3 = vmmov %vm5186_vm1  ;;  %v2965_v39 = vld [vmem:[%s5060_s6 + $0x60] sm:$0xff]   ;;  %2887 = vmatpush3.bf16.msra.mxu1 %v2964_v8 }
 0x2c1   : > { %v1764_v58 = vsel %vm5193_vm3, %v1761_v11, %v1763_v18  ;;  %vm5194_vm4 = vmmov %vm5186_vm1  ;;  %1579 = vrot.lane.b32.xlu0 %v1570_v28, %s3028_s27  ;;  %1577 = vrot.lane.b32.xlu1 %v1568_v12, %s3028_s27  ;;  %v2093_v28 = vrot.slane %v4433_v9, 4  ;;  %v2155_v12 = vrot.slane %v4111_v43, 1 }
 0x2c2   : > { %v1762_v32 = vsel %vm5194_vm4, %v1760_v61, %v1761_v11  ;;  %vm5195_vm6 = vmmov %vm5186_vm1  ;;  %1777 = vst.msk [vmem:[#allocation4 + $0x28] sm:$0xff] %vm1495_vm0, %v1764_v58  ;;  %v2157_v58 = vrot.slane %v2848_v60, 1  ;;  %2888 = vmatprep.subr.bf16.mxu1 %v2965_v39  ;;  %v5207_v39 = vrot.slane %v4111_v43, 4 }
 0x2c3   : > { %v4476_v24 = vsel %vm5195_vm6, %v2211_v30, %v2213_v27  ;;  %vm5196_vm7 = vmmov %vm5169_vm9  ;;  %1776 = vst.msk [vmem:[#allocation4 + $0x8] sm:$0xff] %vm1495_vm0, %v1762_v32  ;;  %v2186_v32 = vrot.slane %v4111_v43, 2 }
 0x2c4   : > { %v4479_v26 = vsel %vm5196_vm7, %v2182_v36, %v2184_v19  ;;  %vm5197_vm8 = vmmov %vm5196_vm7 }
 0x2c5   : > { %v4489_v61 = vsel %vm5197_vm8, %v2027_v21, %v2029_v57  ;;  %vm5198_vm9 = vmmov %vm5186_vm1  ;;  %v2966_v21 = vld [vmem:[%s5060_s6 + $0x20] sm:$0xff]   ;;  %1611 = vrot.lane.b32.xlu0 %v1602_v23, %s3030_s11  ;;  %1609 = vrot.lane.b32.xlu1 %v1600_v63, %s3030_s11  ;;  %v1767_v23 = vrot.slane %v4199_v38, 3  ;;  %v2062_v63 = vrot.slane %v4433_v9, 3 }
 0x2c6   : > { %v4492_v30 = vsel %vm5198_vm9, %v2213_v27, %v2215_v55  ;;  %vm5199_vm10 = vmmov %vm5186_vm1  ;;  %2889 = vmatpush3.bf16.msra.mxu1 %v2966_v21  ;;  %v2002_v21 = vrot.slane %v4091_v40, 1 }
 0x2c7   : > { %v4495_v36 = vsel %vm5199_vm10, %v2058_v62, %v2060_v41  ;;  %vm5201_vm11 = vmmov %vm5196_vm7  ;;  %v2250_v62 = vrot.slane %v2848_v60, 4 }
 0x2c8   : > { %5200 = vst [vmem:[#allocation26_spill] sm:$0xff] %v4495_v36  ;;  %v4499_v11 = vsel %vm5201_vm11, %v2029_v57, %v2031_v0  ;;  %vm5203_vm12 = vmmov %vm5192_vm2  ;;  %v2217_v0 = vrot.slane %v4111_v43, 3  ;;  %v2219_v36 = vrot.slane %v2848_v60, 3  ;;  %v2968_v43 = vld [vmem:[%s5060_s6 + $0x28] sm:$0xff]  }
 0x2c9   : > { %5202 = vst [vmem:[#allocation27_spill] sm:$0xff] %v4499_v11  ;;  %v4507_v27 = vsel %vm5203_vm12, %v2089_v51, %v2091_v33  ;;  %vm5204_vm13 = vmmov %vm5192_vm2  ;;  %v2967_v51 = vld [vmem:[%s5060_s6 + $0x68] sm:$0xff]   ;;  %1643 = vrot.lane.b32.xlu0 %v4448_v48, %s3032_s13  ;;  %1641 = vrot.lane.b32.xlu1 %v4455_v54, %s3032_s13  ;;  %v2008_v48 = vrot.slane %v4241_v59, 1  ;;  %v1729_v54 = vrot.slane %v4078_v16, 2  ;;  %v5224_v59 = vrot.slane %v4081_v20, 1 }
 0x2ca   : > { %v4512_v57 = vsel %vm5204_vm13, %v2091_v33, %v2093_v28  ;;  %vm5205_vm14 = vmmov %vm5182_vm15  ;;  %2890 = vmatprep.subr.bf16.mxu1 %v2967_v51 }
 0x2cb   : > { %v4515_v8 = vsel %vm5205_vm14, %v2153_v5, %v2155_v12  ;;  %vm5206_vm15 = vmmov %vm5205_vm14  ;;  %2891 = vmatpush3.bf16.msra.mxu1 %v2968_v43 }
 0x2cc   : > { %v4518_v11 = vsel %vm5206_vm15, %v2155_v12, %v2157_v58  ;;  %vm5208_vm1 = vmmov %vm5192_vm2  ;;  %v1765_v12 = vrot.slane %v4154_v52, 3 }
 0x2cd   : > { %v2251_v33 = vsel %vm5208_vm1, %v5207_v39, %v2250_v62  ;;  %vm5209_vm5 = vmmov %vm5196_vm7  ;;  %v1769_v62 = vrot.slane %v4290_v7, 3  ;;  %v2001_v39 = vrot.slane %v4094_v13, 1 }
 0x2ce   : > { %v4529_v28 = vsel %vm5209_vm5, %v2184_v19, %v2186_v32  ;;  %vm5210_vm2 = vmmov %vm5193_vm3  ;;  %2261 = vst.msk [vmem:[#allocation4 + $0x98] sm:$0xff] %vm1495_vm0, %v2251_v33  ;;  %v2188_v19 = vrot.slane %v2848_v60, 2  ;;  %v2004_v60 = vrot.slane %v4179_v47, 1 }
 0x2cf   : > { %v4532_v5 = vsel %vm5210_vm2, %v2215_v55, %v2217_v0  ;;  %vm5211_vm3 = vmmov %vm5210_vm2 }
 0x2d0   : > { %v4537_v58 = vsel %vm5211_vm3, %v2217_v0, %v2219_v36  ;;  %vm5212_vm4 = vmmov %vm5210_vm2  ;;  %vm5230_vm3 = vcmask 1043456  }
 0x2d1   : > { %v1766_v55 = vsel %vm5212_vm4, %v1763_v18, %v1765_v12  ;;  %vm5213_vm6 = vmmov %vm5210_vm2  ;;  %v2006_v18 = vrot.slane %v4176_v35, 1  ;;  %v5220_v35 = vrot.slane %v4157_v29, 1 }
 0x2d2   : > { %v1768_v36 = vsel %vm5213_vm6, %v1765_v12, %v1767_v23  ;;  %1778 = vst.msk [vmem:[#allocation4 + $0x48] sm:$0xff] %vm1495_vm0, %v1766_v55  ;;  %vm5214_vm7 = vmmov %vm5210_vm2  ;;  %v5221_v12 = vrot.slane %v4078_v16, 1  ;;  %v2969_v16 = vld [vmem:[%s5060_s6 + $0x70] sm:$0xff]   ;;  %v2971_v55 = vld [vmem:[%s5060_s6 + $0x78] sm:$0xff]  }
 0x2d3   : > { %v4551_v0 = vsel %vm5214_vm7, %v2060_v41, %v2062_v63  ;;  %vm5215_vm8 = vmmov %vm5209_vm5  ;;  %1779 = vst.msk [vmem:[#allocation4 + $0x68] sm:$0xff] %vm1495_vm0, %v1768_v36  ;;  %v2010_v41 = vrot.slane %v4433_v9, 1  ;;  %v1786_v36 = vrot.slane %v4154_v52, 4  ;;  %2892 = vmatprep.subr.bf16.mxu1 %v2969_v16 }
 0x2d4   : > { %v4554_v33 = vsel %vm5215_vm8, %v2186_v32, %v2188_v19  ;;  %vm5216_vm9 = vmmov %vm5210_vm2  ;;  %v1728_v32 = vrot.slane %v4081_v20, 2  ;;  %v2970_v20 = vld [vmem:[%s5060_s6 + $0x30] sm:$0xff]  }
 0x2d5   : > { %v1770_v40 = vsel %vm5216_vm9, %v1767_v23, %v1769_v62  ;;  %vm5217_vm10 = vmmov %vm5205_vm14  ;;  %v5223_v23 = vmov %v5221_v12  ;;  %v5228_v62 = vrot.slane %v4157_v29, 2  ;;  %2893 = vmatpush3.bf16.msra.mxu1 %v2970_v20  ;;  %v5245_v20 = vrot.slane %v4132_v53, 3 }
 0x2d6   : > { %v2003_v13 = vsel %vm5217_vm10, %v2001_v39, %v2002_v21  ;;  %1780 = vst.msk [vmem:[#allocation4 + $0x88] sm:$0xff] %vm1495_vm0, %v1770_v40  ;;  %vm5218_vm11 = vmmov %vm5217_vm10  ;;  %v2972_v40 = vld [vmem:[%s5060_s6 + $0x38] sm:$0xff]   ;;  %2894 = vmatprep.subr.bf16.mxu1 %v2971_v55 }
 0x2d7   : > { %2017 = vst.msk [vmem:[#allocation4 + $0x10] sm:$0xff] %vm1495_vm0, %v2003_v13  ;;  %v2005_v47 = vsel %vm5218_vm11, %v2002_v21, %v2004_v60  ;;  %vm5219_vm12 = vmmov %vm5217_vm10  ;;  %v1732_v39 = vsel %vm5209_vm5, %v1729_v54, %v5228_v62  ;;  %v4611_v13 = vpop.permute.xlu1 %1823  ;;  %vm5246_vm11 = vcmask 1044480   ;;  %v1882_v62 = vrot.slane %v4190_v46, 2 }
 0x2d8   : > { %2018 = vst.msk [vmem:[#allocation4 + $0x30] sm:$0xff] %vm1495_vm0, %v2005_v47  ;;  %v2007_v51 = vsel %vm5219_vm12, %v2004_v60, %v2006_v18  ;;  %vm5222_vm13 = vmmov %vm5217_vm10  ;;  %v1788_v60 = vrot.slane %v4199_v38, 4  ;;  %v5231_v47 = vrot.slane %v4157_v29, 4  ;;  %v1539_v38 = vrot.slane %v4148_v45, 1 }
 0x2d9   : > { %v1700_v43 = vsel %vm5222_vm13, %v5221_v12, %v5220_v35  ;;  %vm5225_vm14 = vmmov %vm5217_vm10  ;;  %2019 = vst.msk [vmem:[#allocation4 + $0x50] sm:$0xff] %vm1495_vm0, %v2007_v51  ;;  %2895 = vmatpush3.bf16.msra.mxu1 %v2972_v40  ;;  %v1571_v29 = vrot.slane %v4148_v45, 2  ;;  %v5238_v12 = vrot.slane %v4151_v14, 2  ;;  %v1790_v40 = vrot.slane %v4290_v7, 4 }
 0x2da   : > { %v1698_v9 = vsel %vm5225_vm14, %v5224_v59, %v5223_v23  ;;  %vm5226_vm15 = vmmov %vm5217_vm10  ;;  %1709 = vrot.lane.b32.xlu0 %v1700_v43, %s3037_s24  ;;  %v5240_v23 = vrot.slane %v4132_v53, 2 }
 0x2db   : > { %v2009_v63 = vsel %vm5226_vm15, %v2006_v18, %v2008_v48  ;;  %vm5227_vm1 = vmmov %vm5217_vm10  ;;  %1707 = vrot.lane.b32.xlu1 %v1698_v9, %s3037_s24  ;;  %v1789_v18 = vsel %vm5230_vm3, %v1786_v36, %v1788_v60  ;;  %v4628_v35 = vpop.permute.xlu1 %1855  ;;  %v1851_v9 = vrot.slane %v4190_v46, 1 }
 0x2dc   : > { %v2011_v19 = vsel %vm5227_vm1, %v2008_v48, %v2010_v41  ;;  %2020 = vst.msk [vmem:[#allocation4 + $0x70] sm:$0xff] %vm1495_vm0, %v2009_v63  ;;  %vm5229_vm2 = vmmov %vm5209_vm5  ;;  %v5233_v48 = vmov 0   ;;  %v5234_v41 = vrot.slane %v4151_v14, 1  ;;  %v5244_v14 = vrot.slane %v4148_v45, 3 }
 0x2dd   : > { %2021 = vst.msk [vmem:[#allocation4 + $0x90] sm:$0xff] %vm1495_vm0, %v2011_v19  ;;  %v1730_v21 = vsel %vm5229_vm2, %v1728_v32, %v1729_v54  ;;  %vm5232_vm4 = vmmov %vm5230_vm3  ;;  %2606 = vmatprep.subr.bf16.mxu1 %v5233_v48  ;;  %v5236_v32 = vrot.slane %v4132_v53, 1  ;;  %v5242_v19 = vrot.slane %v4026_v4, 1  ;;  %v5247_v45 = vrot.slane %v4026_v4, 2  ;;  %v1817_v4 = vld [vmem:[#allocation2 + $0x4e] sm:$0xf] }
 0x2de   : > { %1741 = vrot.lane.b32.xlu0 %v1732_v39, %s5097_s28  ;;  %v1787_v52 = vsel %vm5232_vm4, %v5231_v47, %v1786_v36  ;;  %vm5235_vm6 = vmmov %vm5227_vm1  ;;  %v1604_v55 = vsel %vm5246_vm11, %v5245_v20, %v5244_v14  ;;  %v1884_v47 = vrot.slane %v1817_v4, 2  ;;  %v5261_v14 = vld [vmem:[#allocation18_spill] sm:$0xff]  ;;  %v5262_v20 = vld [vmem:[#allocation19_spill] sm:$0xff]  ;;  %vm1624_vm4 = vcmask 523648  }
 0x2df   : > { %1739 = vrot.lane.b32.xlu1 %v1730_v21, %s5097_s28  ;;  %v1542_v54 = vsel %vm5235_vm6, %v1539_v38, %v5234_v41  ;;  %vm5237_vm7 = vmmov %vm5227_vm1  ;;  %v4641_v63 = vpop.permute.xlu1 %1886  ;;  %v4666_v21 = vpop.permute.xlu0 %1825  ;;  %v5252_v41 = vrot.slane %v4190_v46, 3  ;;  %vm1656_vm6 = vcmask 654848  }
 0x2e0   : > { %v1540_v51 = vsel %vm5237_vm7, %v5236_v32, %v1539_v38  ;;  %vm5239_vm8 = vmmov %vm5229_vm2  ;;  %v1946_v32 = vrot.slane %v1817_v4, 4  ;;  %vm1689_vm7 = vcmask 786048  }
 0x2e1   : > { %v1574_v43 = vsel %vm5239_vm8, %v1571_v29, %v5238_v12  ;;  %vm5241_vm9 = vmmov %vm5229_vm2  ;;  %vm1722_vm8 = vcmask 917248  }
 0x2e2   : > { %1798 = vrot.lane.b32.xlu0 %v1789_v18, %s3025_s20  ;;  %v1572_v59 = vsel %vm5241_vm9, %v5240_v23, %v1571_v29  ;;  %vm5243_vm10 = vmmov %vm5227_vm1  ;;  %v5257_v23 = vld [vmem:[#allocation14_spill] sm:$0xff]  ;;  %vm1754_vm9 = vcmask 1048448  }
 0x2e3   : > { %1796 = vrot.lane.b32.xlu1 %v1787_v52, %s3025_s20  ;;  %v1852_v16 = vsel %vm5243_vm10, %v5242_v19, %v1851_v9  ;;  %v4654_v39 = vpop.permute.xlu1 %1917  ;;  %vm5248_vm12 = vmmov %vm5229_vm2 }
 0x2e4   : > { %v1883_v53 = vsel %vm5248_vm12, %v5247_v45, %v1882_v62  ;;  %vm5249_vm13 = vmmov %vm5230_vm3  ;;  %v5263_v45 = vld [vmem:[#allocation20_spill] sm:$0xff] }
 0x2e5   : > { %v1791_v18 = vsel %vm5249_vm13, %v1788_v60, %v1790_v40  ;;  %vm5250_vm14 = vmmov %vm5227_vm1  ;;  %v1915_v60 = vrot.slane %v1817_v4, 3 }
 0x2e6   : > { %1551 = vrot.lane.b32.xlu0 %v1542_v54, %s3025_s20  ;;  %vm5251_vm15 = vmmov %vm5229_vm2  ;;  %vm1560_vm2 = vcmask 261248  }
 0x2e7   : > { %1549 = vrot.lane.b32.xlu1 %v1540_v51, %s3025_s20  ;;  %v4668_v36 = vpop.permute.xlu1 %1948  ;;  %vm5253_vm1 = vmmov %vm5246_vm11 }
 0x2e8   : > { %v1916_v54 = vsel %vm5253_vm1, %v5252_v41, %v1915_v60  ;;  %vm5255_vm5 = vmmov %vm5230_vm3  ;;  %v5268_v60 = vld [vmem:[#allocation25_spill] sm:$0xff]  ;;  %vm1592_vm3 = vcmask 392448  }
 0x2ea   : > { %1583 = vrot.lane.b32.xlu0 %v1574_v43, %s3028_s27 }
 0x2eb   : > { %1581 = vrot.lane.b32.xlu1 %v1572_v59, %s3028_s27 }
 0x2ee   : > { %1861 = vrot.lane.b32.xlu0 %v1852_v16, %s3030_s11 }
 0x2ef   : > { %1613 = vrot.lane.b32.xlu1 %v1604_v55, %s3030_s11 }
 0x2f2   : > { %1615 = vrot.lane.b32.xlu0 %v4217_v15, %s3030_s11  ;;  %v4675_v15 = vpop.permute.xlu1 %1827 }
 0x2f3   : > { %1645 = vrot.lane.b32.xlu1 %v4225_v10, %s3032_s13  ;;  %v4677_v10 = vpop.permute.xlu0 %1829 }
 0x2f6   : > { %1892 = vrot.lane.b32.xlu0 %v1883_v53, %s3032_s13  ;;  %v5264_v53 = vld [vmem:[#allocation21_spill] sm:$0xff] }
 0x2f7   : > { %1711 = vrot.lane.b32.xlu1 %v4233_v50, %s3037_s24  ;;  %v1853_v50 = vrot.slane %v1817_v4, 1  ;;  %v4686_v52 = vpop.permute.xlu0 %1857 }
 0x2f9   : > { %v1854_v7 = vsel %vm5250_vm14, %v1851_v9, %v1853_v50  ;;  %v5259_v9 = vld [vmem:[#allocation16_spill] sm:$0xff]  ;;  %v5266_v50 = vld [vmem:[#allocation23_spill] sm:$0xff] }
 0x2fa   : > { %1647 = vrot.lane.b32.xlu0 %v4236_v44, %s3032_s13  ;;  %v4684_v44 = vpop.permute.xlu1 %1859 }
 0x2fb   : > { %1743 = vrot.lane.b32.xlu1 %v4248_v22, %s5097_s28  ;;  %v1885_v22 = vsel %vm5251_vm15, %v1882_v62, %v1884_v47  ;;  %v4697_v38 = vpop.permute.xlu0 %1888 }
 0x2fe   : > { %1923 = vrot.lane.b32.xlu0 %v4255_v6, %s3034_s22  ;;  %v4695_v6 = vpop.permute.xlu1 %1890 }
 0x2ff   : > { %1800 = vrot.lane.b32.xlu1 %v1791_v18, %s3025_s20  ;;  %v1920_v29 = vpop.permute.xlu0 %1919  ;;  %v5265_v18 = vld [vmem:[#allocation22_spill] sm:$0xff] }
 0x302   : > { %1954 = vrot.lane.b32.xlu0 %v4267_v17, %s3037_s24  ;;  %v5254_v17 = vrot.slane %v4190_v46, 4  ;;  %v4708_v51 = vpop.permute.xlu1 %1921 }
 0x303   : > { %1863 = vrot.lane.b32.xlu1 %v1854_v7, %s3030_s11  ;;  %v1951_v12 = vpop.permute.xlu0 %1950 }
 0x306   : > { %1713 = vrot.lane.b32.xlu0 %v4282_v49, %s3037_s24  ;;  %v1947_v49 = vsel %vm5255_vm5, %v5254_v17, %v1946_v32 }
 0x307   : > { %1894 = vrot.lane.b32.xlu1 %v1885_v22, %s3032_s13  ;;  %v5267_v22 = vld [vmem:[#allocation24_spill] sm:$0xff] }
 0x30a   : > { %1745 = vrot.lane.b32.xlu0 %v4285_v56, %s5097_s28  ;;  %v4717_v56 = vpop.permute.xlu1 %1952 }
 0x30b   : > { %1925 = vrot.lane.b32.xlu1 %v1916_v54, %s3034_s22  ;;  %v4723_v46 = vpop.permute.xlu0 %1676 }
 0x30e   : > { %1553 = vrot.lane.b32.xlu0 %v4295_v34, %s3025_s20  ;;  %v4725_v34 = vpop.permute.xlu1 %1674 }
 0x30f   : > { %1956 = vrot.lane.b32.xlu1 %v1947_v49, %s3037_s24 }
 0x312   : > { %1585 = vrot.lane.b32.xlu0 %v4305_v31, %s3028_s27  ;;  %v1981_v31 = vpop.permute.xlu1 %1980 }
 0x313   : > { %2033 = vrot.lane.b32.xlu1 %v4319_v1, %s3025_s20  ;;  %v1983_v1 = vpop.permute.xlu0 %1982 }
 0x316   : > { %1617 = vrot.lane.b32.xlu0 %v4322_v25, %s3030_s11  ;;  %v5256_v25 = vld [vmem:[#allocation13_spill] sm:$0xff] }
 0x317   : > { %2064 = vrot.lane.b32.xlu1 %v4327_v3, %s3028_s27  ;;  %v4735_v43 = vpop.permute.xlu0 %1680  ;;  %v4737_v3 = vpop.permute.xlu1 %1678 }
 0x31a   : > { %1649 = vrot.lane.b32.xlu0 %v4330_v2, %s3032_s13  ;;  %v5258_v2 = vld [vmem:[#allocation15_spill] sm:$0xff]  ;;  %s2915_s13 = smul.u32 160, %s5282_s0 }
 0x31b   : > { %2095 = vrot.lane.b32.xlu1 %v4333_v42, %s3030_s11  ;;  %v4743_v59 = vpop.permute.xlu0 %1986  ;;  %v4745_v42 = vpop.permute.xlu1 %1984 }
 0x31c   : > { %s4825_s25 = scalar_lea.vmem %s5057_s3, %s2915_s13 }
 0x31e   : > { %1715 = vrot.lane.b32.xlu0 %v4344_v37, %s3037_s24  ;;  %v5260_v37 = vld [vmem:[#allocation17_spill] sm:$0xff] }
 0x31f   : > { %2159 = vrot.lane.b32.xlu1 %v5256_v25, %s3034_s22  ;;  %v4751_v19 = vpop.permute.xlu0 %1682  ;;  %v4753_v16 = vpop.permute.xlu1 %1831 }
 0x322   : > { %1747 = vrot.lane.b32.xlu0 %v5257_v23, %s5097_s28 }
 0x323   : > { %2190 = vrot.lane.b32.xlu1 %v5258_v2, %s3037_s24  ;;  %v4759_v55 = vpop.permute.xlu0 %2129  ;;  %v4761_v62 = vpop.permute.xlu1 %1988 }
 0x326   : > { %2035 = vrot.lane.b32.xlu0 %v5259_v9, %s3025_s20 }
 0x327   : > { %2221 = vrot.lane.b32.xlu1 %v5260_v37, %s5097_s28  ;;  %v4767_v40 = vpop.permute.xlu0 %2133  ;;  %v4769_v4 = vpop.permute.xlu1 %2127  ;;  %v5274_v37 = vld [vmem:[#allocation10_spill] sm:$0xff] }
 0x32a   : > { %2066 = vrot.lane.b32.xlu0 %v5261_v14, %s3028_s27  ;;  %v2975_v14 = vld [vmem:[%s5060_s6 + $0x90] sm:$0xff]  }
 0x32b   : > { %2037 = vrot.lane.b32.xlu1 %v5262_v20, %s3025_s20  ;;  %v4775_v7 = vpop.permute.xlu0 %2135  ;;  %v4777_v47 = vpop.permute.xlu1 %2131 }
 0x32e   : > { %2097 = vrot.lane.b32.xlu0 %v5263_v45, %s3030_s11 }
 0x32f   : > { %2068 = vrot.lane.b32.xlu1 %v5264_v53, %s3028_s27  ;;  %v1795_v41 = vpop.permute.xlu0 %1794  ;;  %v1793_v54 = vpop.permute.xlu1 %1792  ;;  %v5275_v53 = vld [vmem:[#allocation12_spill] sm:$0xff] }
 0x330   : > { %1808 = vst.msk [vmem:[#allocation4 + $0x28] sm:$0xff] %vm1560_vm2, %v1795_v41  ;;  %1807 = vst.msk [vmem:[#allocation4 + $0x8] sm:$0xff] %vm1560_vm2, %v1793_v54  ;;  %v2978_v54 = vld [vmem:[%s5060_s6 + $0xa8] sm:$0xff]  }
 0x331   : > { %1839 = vst.msk [vmem:[#allocation4 + $0x28] sm:$0xff] %vm1592_vm3, %v4666_v21  ;;  %1838 = vst.msk [vmem:[#allocation4 + $0x8] sm:$0xff] %vm1592_vm3, %v4611_v13  ;;  %v2283_v21 = vld [vmem:[%s4825_s25 + $0x8] sm:$0xff] }
 0x332   : > { %2161 = vrot.lane.b32.xlu0 %v5265_v18, %s3034_s22  ;;  %1871 = vst.msk [vmem:[#allocation4 + $0x28] sm:$0xff] %vm1624_vm4, %v4686_v52  ;;  %1870 = vst.msk [vmem:[#allocation4 + $0x8] sm:$0xff] %vm1624_vm4, %v4628_v35  ;;  %v2976_v18 = vld [vmem:[%s5060_s6 + $0x98] sm:$0xff]  }
 0x333   : > { %2099 = vrot.lane.b32.xlu1 %v5266_v50, %s3030_s11  ;;  %1902 = vst.msk [vmem:[#allocation4 + $0x28] sm:$0xff] %vm1656_vm6, %v4697_v38  ;;  %1901 = vst.msk [vmem:[#allocation4 + $0x8] sm:$0xff] %vm1656_vm6, %v4641_v63  ;;  %v1548_v13 = vpop.permute.xlu0 %1547  ;;  %v5269_v63 = vld [vmem:[#allocation26_spill] sm:$0xff] }
 0x334   : > { %1933 = vst.msk [vmem:[#allocation4 + $0x28] sm:$0xff] %vm1689_vm7, %v1920_v29  ;;  %1932 = vst.msk [vmem:[#allocation4 + $0x8] sm:$0xff] %vm1689_vm7, %v4654_v39  ;;  %v5270_v39 = vld [vmem:[#allocation27_spill] sm:$0xff] }
 0x335   : > { %1562 = vst.msk [vmem:[#allocation4 + $0x20] sm:$0xff] %vm1560_vm2, %v1548_v13 }
 0x336   : > { %2192 = vrot.lane.b32.xlu0 %v5267_v22, %s3037_s24  ;;  %1964 = vst.msk [vmem:[#allocation4 + $0x28] sm:$0xff] %vm1722_vm8, %v1951_v12  ;;  %1963 = vst.msk [vmem:[#allocation4 + $0x8] sm:$0xff] %vm1722_vm8, %v4668_v36  ;;  %v2287_v36 = vld [vmem:[%s4825_s25 + $0x28] sm:$0xff] }
 0x337   : > { %2163 = vrot.lane.b32.xlu1 %v5268_v60, %s3034_s22  ;;  %1996 = vst.msk [vmem:[#allocation4 + $0x28] sm:$0xff] %vm1754_vm9, %v1983_v1  ;;  %1995 = vst.msk [vmem:[#allocation4 + $0x8] sm:$0xff] %vm1754_vm9, %v1981_v31 }
 0x33a   : > { %2223 = vrot.lane.b32.xlu0 %v4476_v24, %s5097_s28  ;;  %v1546_v24 = vpop.permute.xlu1 %1545 }
 0x33b   : > { %2194 = vrot.lane.b32.xlu1 %v4479_v26, %s3037_s24  ;;  %1561 = vst.msk [vmem:[#allocation4] sm:$0xff] %vm1560_vm2, %v1546_v24  ;;  %v1580_v26 = vpop.permute.xlu0 %1579 }
 0x33c   : > { %1594 = vst.msk [vmem:[#allocation4 + $0x20] sm:$0xff] %vm1592_vm3, %v1580_v26 }
 0x33e   : > { %2039 = vrot.lane.b32.xlu0 %v4489_v61, %s3025_s20  ;;  %v1578_v35 = vpop.permute.xlu1 %1577  ;;  %v2263_v52 = vld [vmem:[#allocation4 + $0x8] sm:$0xff] }
 0x33f   : > { %2225 = vrot.lane.b32.xlu1 %v4492_v30, %s5097_s28  ;;  %1593 = vst.msk [vmem:[#allocation4] sm:$0xff] %vm1592_vm3, %v1578_v35  ;;  %v1612_v61 = vpop.permute.xlu0 %1611  ;;  %v2267_v38 = vld [vmem:[#allocation4 + $0x28] sm:$0xff]  ;;  %v2303_v32 = vmul.f32 %v2283_v21, %v2263_v52  ;;  %v2295_v21 = vld [vmem:[%s4825_s25 + $0x68] sm:$0xff] }
 0x340   : > { %1626 = vst.msk [vmem:[#allocation4 + $0x20] sm:$0xff] %vm1624_vm4, %v1612_v61  ;;  %v2307_v17 = vmul.f32 %v2287_v36, %v2267_v38  ;;  %v2981_v61 = vld [vmem:[%s5060_s6 + $0xc0] sm:$0xff]  }
 0x342   : > { %2070 = vrot.lane.b32.xlu0 %v5269_v63, %s3028_s27  ;;  %v1610_v30 = vpop.permute.xlu1 %1609  ;;  %v2323_v12 = vpack.c.bf16 %v2307_v17, %v2303_v32 }
 0x343   : > { %2041 = vrot.lane.b32.xlu1 %v5270_v39, %s3025_s20  ;;  %1625 = vst.msk [vmem:[#allocation4] sm:$0xff] %vm1624_vm4, %v1610_v30  ;;  %v1644_v49 = vpop.permute.xlu0 %1643 }
 0x344   : > { %1658 = vst.msk [vmem:[#allocation4 + $0x20] sm:$0xff] %vm1656_vm6, %v1644_v49  ;;  %2582 = vmatprep.mubr.bf16.mxu1 %v2323_v12 }
 0x345   : > { %1691 = vst.msk [vmem:[#allocation4 + $0x20] sm:$0xff] %vm1689_vm7, %v4723_v46 }
 0x346   : > { %2101 = vrot.lane.b32.xlu0 %v4507_v27, %s3030_s11  ;;  %v1642_v29 = vpop.permute.xlu1 %1641 }
 0x347   : > { %2103 = vrot.lane.b32.xlu1 %v4512_v57, %s3030_s11  ;;  %1657 = vst.msk [vmem:[#allocation4] sm:$0xff] %vm1656_vm6, %v1642_v29 }
 0x348   : > { %1690 = vst.msk [vmem:[#allocation4] sm:$0xff] %vm1689_vm7, %v4725_v34 }
 0x34a   : > { %2165 = vrot.lane.b32.xlu0 %v4515_v8, %s3034_s22 }
 0x34b   : > { %2167 = vrot.lane.b32.xlu1 %v4518_v11, %s3034_s22  ;;  %v5271_v11 = vld [vmem:[#allocation9_spill] sm:$0xff] }
 0x34c   : > { %v1710_v27 = vpop.permute.xlu0 %1709 }
 0x34d   : > { %v1708_v57 = vpop.permute.xlu1 %1707  ;;  %1724 = vst.msk [vmem:[#allocation4 + $0x20] sm:$0xff] %vm1722_vm8, %v1710_v27  ;;  %v2290_v27 = vld [vmem:[%s4825_s25 + $0x40] sm:$0xff] }
 0x34e   : > { %1723 = vst.msk [vmem:[#allocation4] sm:$0xff] %vm1722_vm8, %v1708_v57  ;;  %2196 = vrot.lane.b32.xlu0 %v4529_v28, %s3037_s24  ;;  %v5272_v28 = vld [vmem:[#allocation11_spill] sm:$0xff] }
 0x34f   : > { %2229 = vrot.lane.b32.xlu1 %v4537_v58, %s5097_s28  ;;  %v2286_v58 = vld [vmem:[%s4825_s25 + $0x20] sm:$0xff] }
 0x350   : > { %v1742_v46 = vpop.permute.xlu0 %1741  ;;  %v2294_v57 = vld [vmem:[%s4825_s25 + $0x60] sm:$0xff] }
 0x351   : > { %v1740_v8 = vpop.permute.xlu1 %1739  ;;  %1756 = vst.msk [vmem:[#allocation4 + $0x20] sm:$0xff] %vm1754_vm9, %v1742_v46 }
 0x352   : > { %1755 = vst.msk [vmem:[#allocation4] sm:$0xff] %vm1754_vm9, %v1740_v8  ;;  %2227 = vrot.lane.b32.xlu0 %v4532_v5, %s5097_s28  ;;  %v2282_v5 = vld [vmem:[%s4825_s25] sm:$0xff] }
 0x353   : > { %1482 = vrot.lane.b32.xlu1 %v5271_v11, %s5097_s28 }
 0x354   : > { %v1799_v34 = vpop.permute.xlu0 %1798 }
 0x355   : > { %v1797_v1 = vpop.permute.xlu1 %1796  ;;  %1810 = vst.msk [vmem:[#allocation4 + $0x68] sm:$0xff] %vm1560_vm2, %v1799_v34 }
 0x356   : > { %1809 = vst.msk [vmem:[#allocation4 + $0x48] sm:$0xff] %vm1560_vm2, %v1797_v1  ;;  %2072 = vrot.lane.b32.xlu0 %v4551_v0, %s3028_s27  ;;  %s5013_s27 = scalar_lea.vmem %s5063_s9, %s2916_s18 }
 0x357   : > { %1841 = vst.msk [vmem:[#allocation4 + $0x68] sm:$0xff] %vm1592_vm3, %v4677_v10  ;;  %1840 = vst.msk [vmem:[#allocation4 + $0x48] sm:$0xff] %vm1592_vm3, %v4675_v15  ;;  %1486 = vrot.lane.b32.xlu1 %v5272_v28, %s5097_s28 }
 0x358   : > { %1872 = vst.msk [vmem:[#allocation4 + $0x48] sm:$0xff] %vm1624_vm4, %v4684_v44  ;;  %v1552_v31 = vpop.permute.xlu0 %1551  ;;  %v2266_v23 = vld [vmem:[#allocation4 + $0x20] sm:$0xff]  ;;  %v2973_v44 = vld [vmem:[%s5060_s6 + $0x80] sm:$0xff]  }
 0x359   : > { %1903 = vst.msk [vmem:[#allocation4 + $0x48] sm:$0xff] %vm1656_vm6, %v4695_v6  ;;  %v1550_v25 = vpop.permute.xlu1 %1549  ;;  %v2262_v10 = vld [vmem:[#allocation4] sm:$0xff]  ;;  %v2306_v15 = vmul.f32 %v2286_v58, %v2266_v23 }
 0x35a   : > { %1934 = vst.msk [vmem:[#allocation4 + $0x48] sm:$0xff] %vm1689_vm7, %v4708_v51  ;;  %v2302_v0 = vmul.f32 %v2282_v5, %v2262_v10  ;;  %2198 = vrot.lane.b32.xlu0 %v4554_v33, %s3037_s24  ;;  %v2974_v33 = vld [vmem:[%s5060_s6 + $0x88] sm:$0xff]  }
 0x35b   : > { %1564 = vst.msk [vmem:[#allocation4 + $0x60] sm:$0xff] %vm1560_vm2, %v1552_v31  ;;  %1563 = vst.msk [vmem:[#allocation4 + $0x40] sm:$0xff] %vm1560_vm2, %v1550_v25  ;;  %v2299_v5 = vld [vmem:[%s4825_s25 + $0x88] sm:$0xff] }
 0x35c   : > { %1965 = vst.msk [vmem:[#allocation4 + $0x48] sm:$0xff] %vm1722_vm8, %v4717_v56  ;;  %v2322_v6 = vpack.c.bf16 %v2306_v15, %v2302_v0  ;;  %v1584_v51 = vpop.permute.xlu0 %1583  ;;  %v5273_v56 = vld [vmem:[#allocation8_spill] sm:$0xff] }
 0x35d   : > { %1997 = vst.msk [vmem:[#allocation4 + $0x48] sm:$0xff] %vm1754_vm9, %v4745_v42  ;;  %v1582_v2 = vpop.permute.xlu1 %1581 }
 0x35e   : > { %1596 = vst.msk [vmem:[#allocation4 + $0x60] sm:$0xff] %vm1592_vm3, %v1584_v51  ;;  %1595 = vst.msk [vmem:[#allocation4 + $0x40] sm:$0xff] %vm1592_vm3, %v1582_v2  ;;  %2583 = vmatmul.mubr.bf16.vlgmr.msra.gmra.mrb[0].mxu1 %v2322_v6  ;;  %1480 = vrot.lane.b32.xlu0 %v5273_v56, %s5097_s28  ;;  %v2285_v56 = vld [vmem:[%s4825_s25 + $0x18] sm:$0xff] }
 0x35f   : > { %2607 = vmatpush1.bf16.msra.mxu1 %v2973_v44 }
 0x360   : > { %2608 = vmatprep.subr.bf16.mxu1 %v5233_v48  ;;  %v1862_v9 = vpop.permute.xlu0 %1861 }
 0x361   : > { %v1614_v42 = vpop.permute.xlu1 %1613  ;;  %1873 = vst.msk [vmem:[#allocation4 + $0x68] sm:$0xff] %vm1624_vm4, %v1862_v9  ;;  %v2289_v9 = vld [vmem:[%s4825_s25 + $0x38] sm:$0xff] }
 0x362   : > { %1627 = vst.msk [vmem:[#allocation4 + $0x40] sm:$0xff] %vm1624_vm4, %v1614_v42  ;;  %1484 = vrot.lane.b32.xlu0 %v5274_v37, %s5097_s28  ;;  %v2298_v42 = vld [vmem:[%s4825_s25 + $0x80] sm:$0xff] }
 0x363   : > { %2609 = vmatpush1.bf16.msra.mxu1 %v2974_v33  ;;  %v2269_v33 = vld [vmem:[#allocation4 + $0x38] sm:$0xff] }
 0x364   : > { %2610 = vmatprep.subr.bf16.mxu1 %v5233_v48  ;;  %v1616_v20 = vpop.permute.xlu0 %1615  ;;  %v2271_v30 = vld [vmem:[#allocation4 + $0x48] sm:$0xff] }
 0x365   : > { %v1646_v45 = vpop.permute.xlu1 %1645  ;;  %1628 = vst.msk [vmem:[#allocation4 + $0x60] sm:$0xff] %vm1624_vm4, %v1616_v20 }
 0x366   : > { %1659 = vst.msk [vmem:[#allocation4 + $0x40] sm:$0xff] %vm1656_vm6, %v1646_v45  ;;  %1488 = vrot.lane.b32.xlu0 %v5275_v53, %s5097_s28  ;;  %v2309_v53 = vmul.f32 %v2289_v9, %v2269_v33 }
 0x367   : > { %1692 = vst.msk [vmem:[#allocation4 + $0x40] sm:$0xff] %vm1689_vm7, %v4737_v3  ;;  %2611 = vmatpush1.bf16.msra.mxu1 %v2975_v14  ;;  %v2977_v3 = vld [vmem:[%s5060_s6 + $0xa0] sm:$0xff]  }
 0x368   : > { %2612 = vmatprep.subr.bf16.mxu1 %v5233_v48  ;;  %v1893_v50 = vpop.permute.xlu0 %1892 }
 0x369   : > { %v1712_v22 = vpop.permute.xlu1 %1711  ;;  %1904 = vst.msk [vmem:[#allocation4 + $0x68] sm:$0xff] %vm1656_vm6, %v1893_v50 }
 0x36a   : > { %1725 = vst.msk [vmem:[#allocation4 + $0x40] sm:$0xff] %vm1722_vm8, %v1712_v22 }
 0x36b   : > { %2613 = vmatpush1.bf16.msra.mxu1 %v2976_v18 }
 0x36c   : > { %2614 = vmatprep.subr.bf16.mxu1 %v5233_v48  ;;  %v1648_v60 = vpop.permute.xlu0 %1647 }
 0x36d   : > { %v1744_v41 = vpop.permute.xlu1 %1743  ;;  %1660 = vst.msk [vmem:[#allocation4 + $0x60] sm:$0xff] %vm1656_vm6, %v1648_v60 }
 0x36e   : > { %1757 = vst.msk [vmem:[#allocation4 + $0x40] sm:$0xff] %vm1754_vm9, %v1744_v41 }
 0x36f   : > { %1693 = vst.msk [vmem:[#allocation4 + $0x60] sm:$0xff] %vm1689_vm7, %v4735_v43  ;;  %2615 = vmatpush1.bf16.msra.mxu1 %v2977_v3  ;;  %v2979_v43 = vld [vmem:[%s5060_s6 + $0xb0] sm:$0xff]  }
 0x370   : > { %2616 = vmatprep.subr.bf16.mxu1 %v5233_v48  ;;  %v1924_v13 = vpop.permute.xlu0 %1923 }
 0x371   : > { %v1801_v24 = vpop.permute.xlu1 %1800  ;;  %1935 = vst.msk [vmem:[#allocation4 + $0x68] sm:$0xff] %vm1689_vm7, %v1924_v13 }
 0x372   : > { %1811 = vst.msk [vmem:[#allocation4 + $0x88] sm:$0xff] %vm1560_vm2, %v1801_v24 }
 0x373   : > { %1842 = vst.msk [vmem:[#allocation4 + $0x88] sm:$0xff] %vm1592_vm3, %v4753_v16  ;;  %2617 = vmatpush1.bf16.msra.mxu1 %v2978_v54  ;;  %v2980_v16 = vld [vmem:[%s5060_s6 + $0xb8] sm:$0xff]  }
 0x374   : > { %2618 = vmatprep.subr.bf16.mxu1 %v5233_v48  ;;  %v1955_v26 = vpop.permute.xlu0 %1954 }
 0x375   : > { %v1864_v35 = vpop.permute.xlu1 %1863  ;;  %1966 = vst.msk [vmem:[#allocation4 + $0x68] sm:$0xff] %vm1722_vm8, %v1955_v26 }
 0x376   : > { %1874 = vst.msk [vmem:[#allocation4 + $0x88] sm:$0xff] %vm1624_vm4, %v1864_v35 }
 0x377   : > { %1998 = vst.msk [vmem:[#allocation4 + $0x68] sm:$0xff] %vm1754_vm9, %v4743_v59  ;;  %2619 = vmatpush1.bf16.msra.mxu1 %v2979_v43  ;;  %v2291_v59 = vld [vmem:[%s4825_s25 + $0x48] sm:$0xff] }
 0x378   : > { %2620 = vmatprep.subr.bf16.mxu1 %v5233_v48  ;;  %v1714_v63 = vpop.permute.xlu0 %1713  ;;  %v2311_v32 = vmul.f32 %v2291_v59, %v2271_v30  ;;  %v2284_v30 = vld [vmem:[%s4825_s25 + $0x10] sm:$0xff] }
 0x379   : > { %v1895_v39 = vpop.permute.xlu1 %1894  ;;  %1726 = vst.msk [vmem:[#allocation4 + $0x60] sm:$0xff] %vm1722_vm8, %v1714_v63  ;;  %v2277_v63 = vld [vmem:[#allocation4 + $0x78] sm:$0xff]  ;;  %v2288_v59 = vld [vmem:[%s4825_s25 + $0x30] sm:$0xff] }
 0x37a   : > { %1905 = vst.msk [vmem:[#allocation4 + $0x88] sm:$0xff] %vm1656_vm6, %v1895_v39  ;;  %v2297_v39 = vld [vmem:[%s4825_s25 + $0x78] sm:$0xff] }
 0x37b   : > { %2621 = vmatpush1.bf16.msra.mxu1 %v2980_v16  ;;  %v2293_v16 = vld [vmem:[%s4825_s25 + $0x58] sm:$0xff] }
 0x37c   : > { %2622 = vmatprep.subr.bf16.mxu1 %v5233_v48  ;;  %v1746_v36 = vpop.permute.xlu0 %1745  ;;  %v2270_v48 = vld [vmem:[#allocation4 + $0x40] sm:$0xff] }
 0x37d   : > { %v1926_v52 = vpop.permute.xlu1 %1925  ;;  %1758 = vst.msk [vmem:[#allocation4 + $0x60] sm:$0xff] %vm1754_vm9, %v1746_v36  ;;  %v2310_v34 = vmul.f32 %v2290_v27, %v2270_v48 }
 0x37e   : > { %1936 = vst.msk [vmem:[#allocation4 + $0x88] sm:$0xff] %vm1689_vm7, %v1926_v52  ;;  %v2275_v38 = vld [vmem:[#allocation4 + $0x68] sm:$0xff] }
 0x37f   : > { %v2315_v17 = vmul.f32 %v2295_v21, %v2275_v38  ;;  %2623 = vmatpush1.bf16.msra.mxu1 %v2981_v61 }
 0x380   : > { %v1554_v49 = vpop.permute.xlu0 %1553 }
 0x381   : > { %v1957_v29 = vpop.permute.xlu1 %1956  ;;  %v2327_v12 = vpack.c.bf16 %v2315_v17, %v2311_v32  ;;  %1565 = vst.msk [vmem:[#allocation4 + $0x80] sm:$0xff] %vm1560_vm2, %v1554_v49  ;;  %v2317_v32 = vmul.f32 %v2297_v39, %v2277_v63 }
 0x382   : > { %1967 = vst.msk [vmem:[#allocation4 + $0x88] sm:$0xff] %vm1722_vm8, %v1957_v29 }
 0x383   : > { %1999 = vst.msk [vmem:[#allocation4 + $0x88] sm:$0xff] %vm1754_vm9, %v4761_v62  ;;  %2590 = vmatprep.mubr.bf16.mxu1 %v2327_v12 }
 0x384   : > { %v1586_v46 = vpop.permute.xlu0 %1585  ;;  %v2274_v11 = vld [vmem:[#allocation4 + $0x60] sm:$0xff] }
 0x385   : > { %v2034_v8 = vpop.permute.xlu1 %2033  ;;  %1597 = vst.msk [vmem:[#allocation4 + $0x80] sm:$0xff] %vm1592_vm3, %v1586_v46  ;;  %v2314_v1 = vmul.f32 %v2294_v57, %v2274_v11 }
 0x386   : > { %2048 = vst.msk [vmem:[#allocation4 + $0x10] sm:$0xff] %vm1560_vm2, %v2034_v8 }
 0x387   : > { %v2326_v28 = vpack.c.bf16 %v2314_v1, %v2310_v34 }
 0x388   : > { %v1618_v58 = vpop.permute.xlu0 %1617 }
 0x389   : > { %v2065_v31 = vpop.permute.xlu1 %2064  ;;  %1629 = vst.msk [vmem:[#allocation4 + $0x80] sm:$0xff] %vm1624_vm4, %v1618_v58  ;;  %2591 = vmatmul.mubr.bf16.gmra.mrb[4].mxu1 %v2326_v28  ;;  %v2301_v58 = vld [vmem:[%s4825_s25 + $0x98] sm:$0xff] }
 0x38a   : > { %2079 = vst.msk [vmem:[#allocation4 + $0x10] sm:$0xff] %vm1592_vm3, %v2065_v31  ;;  %v2279_v62 = vld [vmem:[#allocation4 + $0x88] sm:$0xff] }
 0x38b   : > { %v2319_v25 = vmul.f32 %v2299_v5, %v2279_v62  ;;  %v2281_v5 = vld [vmem:[#allocation4 + $0x98] sm:$0xff]  ;;  %v2292_v62 = vld [vmem:[%s4825_s25 + $0x50] sm:$0xff] }
 0x38c   : > { %v1650_v10 = vpop.permute.xlu0 %1649 }
 0x38d   : > { %v2096_v23 = vpop.permute.xlu1 %2095  ;;  %v2331_v0 = vpack.c.bf16 %v2319_v25, %v2319_v25  ;;  %1661 = vst.msk [vmem:[#allocation4 + $0x80] sm:$0xff] %vm1656_vm6, %v1650_v10  ;;  %v2296_v25 = vld [vmem:[%s4825_s25 + $0x70] sm:$0xff] }
 0x38e   : > { %2110 = vst.msk [vmem:[#allocation4 + $0x10] sm:$0xff] %vm1624_vm4, %v2096_v23 }
 0x38f   : > { %1694 = vst.msk [vmem:[#allocation4 + $0x80] sm:$0xff] %vm1689_vm7, %v4751_v19  ;;  %2598 = vmatprep.mubr.bf16.mxu1 %v2331_v0  ;;  %v2321_v0 = vmul.f32 %v2301_v58, %v2281_v5 }
 0x390   : > { %2142 = vst.msk [vmem:[#allocation4 + $0x10] sm:$0xff] %vm1656_vm6, %v4769_v4  ;;  %v1716_v15 = vpop.permute.xlu0 %1715  ;;  %v2265_v4 = vld [vmem:[#allocation4 + $0x18] sm:$0xff] }
 0x391   : > { %v2160_v44 = vpop.permute.xlu1 %2159  ;;  %1727 = vst.msk [vmem:[#allocation4 + $0x80] sm:$0xff] %vm1722_vm8, %v1716_v15  ;;  %v2305_v45 = vmul.f32 %v2285_v56, %v2265_v4 }
 0x392   : > { %2174 = vst.msk [vmem:[#allocation4 + $0x10] sm:$0xff] %vm1689_vm7, %v2160_v44 }
 0x393   : > { %v2325_v60 = vpack.c.bf16 %v2309_v53, %v2305_v45 }
 0x394   : > { %v1748_v6 = vpop.permute.xlu0 %1747 }
 0x395   : > { %v2191_v51 = vpop.permute.xlu1 %2190  ;;  %1759 = vst.msk [vmem:[#allocation4 + $0x80] sm:$0xff] %vm1754_vm9, %v1748_v6 }
 0x396   : > { %2205 = vst.msk [vmem:[#allocation4 + $0x10] sm:$0xff] %vm1722_vm8, %v2191_v51 }
 0x398   : > { %v2036_v2 = vpop.permute.xlu0 %2035 }
 0x399   : > { %v2222_v19 = vpop.permute.xlu1 %2221  ;;  %2049 = vst.msk [vmem:[#allocation4 + $0x30] sm:$0xff] %vm1560_vm2, %v2036_v2  ;;  %v2333_v2 = vpack.c.bf16 %v2321_v0, %v2321_v0 }
 0x39a   : > { %2236 = vst.msk [vmem:[#allocation4 + $0x10] sm:$0xff] %vm1754_vm9, %v2222_v19 }
 0x39c   : > { %v2067_v37 = vpop.permute.xlu0 %2066  ;;  %v2278_v20 = vld [vmem:[#allocation4 + $0x80] sm:$0xff] }
 0x39d   : > { %v2038_v14 = vpop.permute.xlu1 %2037  ;;  %2080 = vst.msk [vmem:[#allocation4 + $0x30] sm:$0xff] %vm1592_vm3, %v2067_v37  ;;  %v2318_v18 = vmul.f32 %v2298_v42, %v2278_v20 }
 0x39e   : > { %2050 = vst.msk [vmem:[#allocation4 + $0x50] sm:$0xff] %vm1560_vm2, %v2038_v14 }
 0x39f   : > { %v2330_v50 = vpack.c.bf16 %v2318_v18, %v2318_v18 }
 0x3a0   : > { %v2098_v22 = vpop.permute.xlu0 %2097 }
 0x3a1   : > { %v2069_v3 = vpop.permute.xlu1 %2068  ;;  %2111 = vst.msk [vmem:[#allocation4 + $0x30] sm:$0xff] %vm1624_vm4, %v2098_v22  ;;  %2599 = vmatmul.mubr.bf16.gmra.mrb[8].mxu1 %v2330_v50  ;;  %v2264_v61 = vld [vmem:[#allocation4 + $0x10] sm:$0xff] }
 0x3a2   : > { %2081 = vst.msk [vmem:[#allocation4 + $0x50] sm:$0xff] %vm1592_vm3, %v2069_v3  ;;  %2875 = vmatprep.mubr.msk.bf16.mxu1 %vm1495_vm0, %v2325_v60  ;;  %v2304_v17 = vmul.f32 %v2284_v30, %v2264_v61 }
 0x3a3   : > { %2143 = vst.msk [vmem:[#allocation4 + $0x30] sm:$0xff] %vm1656_vm6, %v4759_v55 }
 0x3a4   : > { %v2162_v41 = vpop.permute.xlu0 %2161 }
 0x3a5   : > { %v2100_v54 = vpop.permute.xlu1 %2099  ;;  %2175 = vst.msk [vmem:[#allocation4 + $0x30] sm:$0xff] %vm1689_vm7, %v2162_v41 }
 0x3a6   : > { %2112 = vst.msk [vmem:[#allocation4 + $0x50] sm:$0xff] %vm1624_vm4, %v2100_v54 }
 0x3a7   : > { %2144 = vst.msk [vmem:[#allocation4 + $0x50] sm:$0xff] %vm1656_vm6, %v4777_v47  ;;  %v2273_v47 = vld [vmem:[#allocation4 + $0x58] sm:$0xff] }
 0x3a8   : > { %v2193_v13 = vpop.permute.xlu0 %2192  ;;  %v2313_v38 = vmul.f32 %v2293_v16, %v2273_v47 }
 0x3a9   : > { %v2164_v24 = vpop.permute.xlu1 %2163  ;;  %2206 = vst.msk [vmem:[#allocation4 + $0x30] sm:$0xff] %vm1722_vm8, %v2193_v13 }
 0x3aa   : > { %2176 = vst.msk [vmem:[#allocation4 + $0x50] sm:$0xff] %vm1689_vm7, %v2164_v24  ;;  %v2329_v27 = vpack.c.bf16 %v2317_v32, %v2313_v38 }
 0x3ac   : > { %v2224_v55 = vpop.permute.xlu0 %2223 }
 0x3ad   : > { %v2195_v43 = vpop.permute.xlu1 %2194  ;;  %2237 = vst.msk [vmem:[#allocation4 + $0x30] sm:$0xff] %vm1754_vm9, %v2224_v55 }
 0x3ae   : > { %2207 = vst.msk [vmem:[#allocation4 + $0x50] sm:$0xff] %vm1722_vm8, %v2195_v43 }
 0x3b0   : > { %v2040_v26 = vpop.permute.xlu0 %2039 }
 0x3b1   : > { %v2226_v35 = vpop.permute.xlu1 %2225  ;;  %2051 = vst.msk [vmem:[#allocation4 + $0x70] sm:$0xff] %vm1560_vm2, %v2040_v26  ;;  %v2849_v26 = vld [vmem:[%s5061_s7] ss:$0 sm:$0xff] }
 0x3b2   : > { %2238 = vst.msk [vmem:[#allocation4 + $0x50] sm:$0xff] %vm1754_vm9, %v2226_v35 }
 0x3b4   : > { %v2071_v21 = vpop.permute.xlu0 %2070  ;;  %v2268_v52 = vld [vmem:[#allocation4 + $0x30] sm:$0xff] }
 0x3b5   : > { %v2042_v36 = vpop.permute.xlu1 %2041  ;;  %2082 = vst.msk [vmem:[#allocation4 + $0x70] sm:$0xff] %vm1592_vm3, %v2071_v21  ;;  %v2308_v49 = vmul.f32 %v2288_v59, %v2268_v52 }
 0x3b6   : > { %2052 = vst.msk [vmem:[#allocation4 + $0x90] sm:$0xff] %vm1560_vm2, %v2042_v36 }
 0x3b7   : > { %v2324_v29 = vpack.c.bf16 %v2308_v49, %v2304_v17 }
 0x3b8   : > { %v2102_v12 = vpop.permute.xlu0 %2101 }
 0x3b9   : > { %v2104_v48 = vpop.permute.xlu1 %2103  ;;  %2113 = vst.msk [vmem:[#allocation4 + $0x70] sm:$0xff] %vm1624_vm4, %v2102_v12  ;;  %2639 = vmatmul.mubr.bf16.vlgmr.msra.gmra.mrb[12].mxu1 %v2324_v29  ;;  %v2272_v31 = vld [vmem:[#allocation4 + $0x50] sm:$0xff] }
 0x3ba   : > { %2145 = vst.msk [vmem:[#allocation4 + $0x70] sm:$0xff] %vm1656_vm6, %v4767_v40  ;;  %2876 = vmatprep.mubr.msk.bf16.mxu1 %vm1495_vm0, %v2329_v27  ;;  %v2312_v15 = vmul.f32 %v2292_v62, %v2272_v31 }
 0x3bc   : > { %v2166_v57 = vpop.permute.xlu0 %2165 }
 0x3bd   : > { %v2168_v46 = vpop.permute.xlu1 %2167  ;;  %2177 = vst.msk [vmem:[#allocation4 + $0x70] sm:$0xff] %vm1689_vm7, %v2166_v57 }
 0x3c0   : > { %v2197_v8 = vpop.permute.xlu0 %2196 }
 0x3c1   : > { %v2230_v11 = vpop.permute.xlu1 %2229  ;;  %2208 = vst.msk [vmem:[#allocation4 + $0x70] sm:$0xff] %vm1722_vm8, %v2197_v8 }
 0x3c4   : > { %v2228_v40 = vpop.permute.xlu0 %2227 }
 0x3c5   : > { %v1483_v34 = vpop.permute.xlu1 %1482  ;;  %2239 = vst.msk [vmem:[#allocation4 + $0x70] sm:$0xff] %vm1754_vm9, %v2228_v40 }
 0x3c6   : > { %1497 = vst.msk [vmem:[%s5013_s27 + $0x8] sm:$0xff] %vm1495_vm0, %v1483_v34 }
 0x3c8   : > { %v2073_v1 = vpop.permute.xlu0 %2072 }
 0x3c9   : > { %v1487_v28 = vpop.permute.xlu1 %1486  ;;  %2083 = vst.msk [vmem:[#allocation4 + $0x90] sm:$0xff] %vm1592_vm3, %v2073_v1 }
 0x3ca   : > { %1499 = vst.msk [vmem:[%s5013_s27 + $0x18] sm:$0xff] %vm1495_vm0, %v1487_v28 }
 0x3cb   : > { %2114 = vst.msk [vmem:[#allocation4 + $0x90] sm:$0xff] %vm1624_vm4, %v2104_v48 }
 0x3cc   : > { %2146 = vst.msk [vmem:[#allocation4 + $0x90] sm:$0xff] %vm1656_vm6, %v4775_v7  ;;  %v2199_v10 = vpop.permute.xlu0 %2198  ;;  %v2276_v23 = vld [vmem:[#allocation4 + $0x70] sm:$0xff]  ;;  %v2300_v7 = vld [vmem:[%s4825_s25 + $0x90] sm:$0xff] }
 0x3cd   : > { %2178 = vst.msk [vmem:[#allocation4 + $0x90] sm:$0xff] %vm1689_vm7, %v2168_v46  ;;  %v2316_v44 = vmul.f32 %v2296_v25, %v2276_v23 }
 0x3ce   : > { %2209 = vst.msk [vmem:[#allocation4 + $0x90] sm:$0xff] %vm1722_vm8, %v2199_v10 }
 0x3cf   : > { %2240 = vst.msk [vmem:[#allocation4 + $0x90] sm:$0xff] %vm1754_vm9, %v2230_v11  ;;  %v2328_v6 = vpack.c.bf16 %v2316_v44, %v2312_v15 }
 0x3d0   : > { %v1481_v51 = vpop.permute.xlu0 %1480 }
 0x3d1   : > { %1496 = vst.msk [vmem:[%s5013_s27] sm:$0xff] %vm1495_vm0, %v1481_v51  ;;  %2647 = vmatmul.mubr.bf16.gmra.mrb[16].mxu1 %v2328_v6 }
 0x3d2   : > { %2877 = vmatprep.mubr.msk.bf16.mxu1 %vm1495_vm0, %v2333_v2 }
 0x3d4   : > { %v1485_v19 = vpop.permute.xlu0 %1484 }
 0x3d5   : > { %1498 = vst.msk [vmem:[%s5013_s27 + $0x10] sm:$0xff] %vm1495_vm0, %v1485_v19 }
 0x3d6   : > { %v2280_v56 = vld [vmem:[#allocation4 + $0x90] sm:$0xff] }
 0x3d7   : > { %v2320_v4 = vmul.f32 %v2300_v7, %v2280_v56 }
 0x3d8   : > { %v1489_v33 = vpop.permute.xlu0 %1488 }
 0x3d9   : > { %v2332_v9 = vpack.c.bf16 %v2320_v4, %v2320_v4  ;;  %1500 = vst.msk [vmem:[%s5013_s27 + $0x20] sm:$0xff] %vm1495_vm0, %v1489_v33  ;;  %vm5276_vm0 = vcmask 64512  }
 0x3da   : > { %vm5277_vm10 = vmmov %vm5276_vm0 }
 0x3db   : > { %2655 = vmatmul.mubr.bf16.gmra.mrb[20].mxu1 %v2332_v9  ;;  %vm5278_vm11 = vmmov %vm5276_vm0 }
 0x3dc   : > { %vm5279_vm12 = vmmov %vm5276_vm0 }
 0x3dd   : > { %vm5280_vm13 = vmmov %vm5276_vm0 }
 0x431   : > { %v2896_v42 = vpop.f32.mrb[0].mxu1 }
 0x432   : > { %v2897_v37 = vpop.f32.mrb[1].mxu1 }
 0x433   : > { %v2898_v14 = vadd.f32 %v2897_v37, %v2896_v42  ;;  %v2899_v20 = vpop.f32.mrb[2].mxu1 }
 0x434   : > { %v2900_v45 = vpop.f32.mrb[3].mxu1 }
 0x435   : > { %v2901_v53 = vadd.f32 %v2900_v45, %v2899_v20  ;;  %v2585_v35 = vadd.f32 %v2898_v14, %v2849_v26 }
 0x437   : > { %v2588_v39 = vadd.f32 %v2901_v53, %v2849_v26 }
 0x45c   : > { %v2902_v18 = vpop.f32.mrb[4].mxu1 }
 0x45d   : > { %v2903_v50 = vpop.f32.mrb[5].mxu1 }
 0x45e   : > { %v2904_v22 = vadd.f32 %v2903_v50, %v2902_v18  ;;  %v2905_v3 = vpop.f32.mrb[6].mxu1 }
 0x45f   : > { %v2906_v60 = vpop.f32.mrb[7].mxu1 }
 0x460   : > { %v2907_v41 = vadd.f32 %v2906_v60, %v2905_v3  ;;  %v2593_v21 = vadd.f32 %v2904_v22, %v2849_v26 }
 0x462   : > { %v2596_v32 = vadd.f32 %v2907_v41, %v2849_v26 }
 0x474   : > { %v2908_v54 = vpop.f32.mrb[8].mxu1 }
 0x475   : > { %v2909_v13 = vpop.f32.mrb[9].mxu1 }
 0x476   : > { %v2910_v24 = vadd.f32 %v2909_v13, %v2908_v54  ;;  %v2911_v55 = vpop.f32.mrb[10].mxu1 }
 0x477   : > { %v2912_v43 = vpop.f32.mrb[11].mxu1 }
 0x478   : > { %v2601_v12 = vadd.f32 %v2910_v24, %v2849_v26 }
 0x48c   : > { %v2640_v16 = vpop.f32.mrb[12].mxu1 }
 0x48d   : > { %v2641_v47 = vadd.f32 %v2640_v16, %v2585_v35  ;;  %v2642_v63 = vpop.f32.mrb[13].mxu1 }
 0x48e   : > { %v2643_v61 = vpop.f32.mrb[14].mxu1 }
 0x48f   : > { %2662 = vst.msk [vmem:[%s340_s16] sm:$0xff] %vm5276_vm0, %v2641_v47  ;;  %v2644_v30 = vadd.f32 %v2643_v61, %v2588_v39  ;;  %v2645_v59 = vpop.f32.mrb[15].mxu1 }
 0x491   : > { %2663 = vst.msk [vmem:[%s340_s16 + $0x8] sm:$0xff] %vm5277_vm10, %v2644_v30 }
 0x4a4   : > { %v2648_v36 = vpop.f32.mrb[16].mxu1 }
 0x4a5   : > { %v2649_v52 = vadd.f32 %v2648_v36, %v2593_v21  ;;  %v2650_v38 = vpop.f32.mrb[17].mxu1 }
 0x4a6   : > { %v2651_v17 = vpop.f32.mrb[18].mxu1 }
 0x4a7   : > { %2664 = vst.msk [vmem:[%s340_s16 + $0x10] sm:$0xff] %vm5278_vm11, %v2649_v52  ;;  %v2652_v49 = vadd.f32 %v2651_v17, %v2596_v32  ;;  %v2653_v29 = vpop.f32.mrb[19].mxu1 }
 0x4a9   : > { %2665 = vst.msk [vmem:[%s340_s16 + $0x18] sm:$0xff] %vm5279_vm12, %v2652_v49 }
 0x4ae   : > { %v2656_v48 = vpop.f32.mrb[20].mxu1 }
 0x4af   : > { %v2657_v27 = vadd.f32 %v2656_v48, %v2601_v12  ;;  %v2658_v57 = vpop.f32.mrb[21].mxu1 }
 0x4b0   : > { %v2659_v46 = vpop.f32.mrb[22].mxu1 }
 0x4b1   : > { %2666 = vst.msk [vmem:[%s340_s16 + $0x20] sm:$0xff] %vm5280_vm13, %v2657_v27  ;;  %v2660_v8 = vpop.f32.mrb[23].mxu1 }
 0x4b2 PF: > { %s26_s14 = sadd.s32 1, %s3022_s14  }
 0x4b3   : > { %p23_p9 = scmp.ge.s32.totalorder %s26_s14, 4  }
 0x4b5   :  { %25 = sbr.rel (!%p23_p9) target bundleno = 16 (0x10), region = 101 }

</bundles_post_ra>
